<compile_context>
chip_gen: v7x
topology: tpu7x:2x2x1
jax: 0.10.0
libtpu: 0.0.40
codegen_flags: <defaults>
</compile_context>

<pallas_src>
import functools

import numpy as np
import jax
import jax.numpy as jnp
from jax.experimental import pallas as pl
from jax.experimental.pallas import tpu as pltpu

# Small test sizes consistent with DigitCaps(in_dim, in_caps, out_caps, out_dim, num_routing)
IN_DIM = 8
IN_CAPS = 32
OUT_CAPS = 10
OUT_DIM = 16
NUM_ROUTING = 3
BATCH = 2

_SQRT_HALF = 0.7071067811865476  # 1/sqrt(2)


def _erf_poly(x):
    # Abramowitz & Stegun 7.1.26 polynomial erf (|abs err| < 1.5e-7): reproduces
    # F.gelu's exact (erf-based) gelu to float32 accuracy and lowers in Mosaic.
    a1, a2, a3, a4, a5 = (0.254829592, -0.284496736, 1.421413741,
                          -1.453152027, 1.061405429)
    p = 0.3275911
    ax = jnp.abs(x)
    # Exact reciprocal on purpose: approx=True error is amplified by the
    # 1 - poly*exp(-x^2) cancellation at small |x| and risks the 1e-5 atol.
    t = pl.reciprocal(1.0 + p * ax, approx=False)
    poly = ((((a5 * t + a4) * t + a3) * t + a2) * t + a1) * t
    y = 1.0 - poly * jnp.exp(-ax * ax)
    return jnp.where(x < 0.0, -y, y)


def _squash(s, erf_fn):
    # squash(x) = x - 1 - gelu(x) + cos(x) - relu(x)   (gelu = exact erf form)
    gelu = 0.5 * s * (1.0 + erf_fn(s * _SQRT_HALF))
    return s - 1.0 - gelu + jnp.cos(s) - jnp.maximum(s, 0.0)


def digitcaps_kernel(wt_ref, xbd_ref, e_ref, et_ref, v_ref, *,
                     in_caps, out_dim, out_caps, num_routing):
    IC, OD, OC = in_caps, out_dim, out_caps
    OCD = OC * OD
    f32 = jnp.float32

    xbd = xbd_ref[0]                    # (TB*IC, IC*ID)  block-diagonal x (prebuilt)
    TBIC = xbd.shape[0]
    TB = TBIC // IC

    # u_hat[(t,i), (o,d)] = sum_k W[o,i,d,k] * x[t,i,k]  — ONE MXU matmul, already
    # produced in the lane-dense layout used by the whole routing loop.
    u_hat = jnp.dot(xbd, wt_ref[...], preferred_element_type=f32)   # (TBIC, OCD)
    u3 = u_hat.reshape(TB, IC, OCD)     # leading-dim split (IC multiple of 8): free view

    def coupled_v(b):
        # b: (TBIC, OC).  softmax over out_caps (lane axis), s = sum_i c*u_hat, squash.
        m = jnp.max(b, axis=-1, keepdims=True)
        ex = jnp.exp(b - m)
        c = ex * pl.reciprocal(jnp.sum(ex, axis=-1, keepdims=True), approx=False)
        # c_rep[(t,i),(o,d)] = c[(t,i),o]   via the constant expansion matrix E (MXU).
        c_rep = jnp.dot(c, e_ref[...], preferred_element_type=f32)   # (TBIC, OCD)
        s = jnp.sum((c_rep * u_hat).reshape(TB, IC, OCD), axis=1)    # (TB, OCD)
        return _squash(s, _erf_poly)

    def agreement(v):
        # uv[(t,i),o] = sum_d u_hat[t,o,i,d] * v[t,o,d]
        # v broadcast over in_caps is a sublane broadcast (no K=2 MXU outer product);
        # the out_dim reduction rides the MXU against the constant E^T.
        uvd = (u3 * v[:, None, :]).reshape(TBIC, OCD)
        return jnp.dot(uvd, et_ref[...], preferred_element_type=f32)  # (TBIC, OC)

    # ---- dynamic routing (deduplicated: one softmax/s/squash per b-state) ----
    # Iteration 0: b == 0  ->  softmax is uniform 1/OC (constant-folded).
    s0 = jnp.sum(u3, axis=1) * (1.0 / OC)                            # (TB, OCD)
    v = _squash(s0, _erf_poly)
    b = agreement(v)                          # b started at zero, so b += uv == uv
    for _ in range(1, num_routing - 1):       # static unroll (num_routing is small)
        v = coupled_v(b)
        b = b + agreement(v)
    v = coupled_v(b)                          # == the last iteration's trailing recompute

    # Lane-dense output store, no transpose.
    v_ref[0] = v.astype(v_ref.dtype)


def digit_caps_forward(x, W, num_routing=NUM_ROUTING):
    assert num_routing >= 2, "routing loop must run at least once (as in the PyTorch module)"
    B, in_caps, in_dim = x.shape
    if W.ndim == 5:              # torch parameter shape (1, OC, IC, OD, ID)
        W = W[0]
    out_caps, _, out_dim, _ = W.shape
    ocd = out_caps * out_dim
    icid = in_caps * in_dim

    # Batch split only when each grid step would still feed >=256 lanes of in_caps
    # work (v7x dual-TC / MXU width); otherwise one step does the whole batch
    # (single-TC v5e/v6e, and latency-bound small batches on v7x).
    if B % 2 == 0 and (B // 2) * in_caps >= 256:
        nb = 2
    else:
        nb = 1
    tb = B // nb

    # ---- lane-dense packing + constant hoisting (wrapper-side, done once) -----
    # Wt[i*ID + k, o*OD + d] = W[o, i, d, k]                         -> (256, 160)
    Wt = jnp.transpose(W, (1, 3, 0, 2)).reshape(icid, ocd)
    # Block-diagonal x: xbd[nbi, t*IC+i, i'*ID+k] = (i==i') * x[nbi*tb+t, i, k]
    eye_ic = jnp.eye(in_caps, dtype=x.dtype)
    xr = x.reshape(nb, tb, in_caps, in_dim)
    xbd = (eye_ic[None, None, :, :, None] * xr[:, :, :, None, :]).reshape(
        nb, tb * in_caps, icid)
    # out_dim expansion matrix E[o, o'*OD + d] = (o == o') and its transpose.
    E = jnp.repeat(jnp.eye(out_caps, dtype=jnp.float32), out_dim, axis=1)  # (OC, OCD)
    ET = E.T                                                               # (OCD, OC)

    kernel = functools.partial(
        digitcaps_kernel, in_caps=in_caps, out_dim=out_dim, out_caps=out_caps,
        num_routing=num_routing)

    out = pl.pallas_call(
        kernel,
        out_shape=jax.ShapeDtypeStruct((nb, tb, ocd), x.dtype),
        grid=(nb,),
        in_specs=[
            pl.BlockSpec((icid, ocd), lambda b: (0, 0)),             # Wt: resident
            pl.BlockSpec((1, tb * in_caps, icid), lambda b: (b, 0, 0)),
            pl.BlockSpec((out_caps, ocd), lambda b: (0, 0)),         # E:  resident
            pl.BlockSpec((ocd, out_caps), lambda b: (0, 0)),         # ET: resident
        ],
        out_specs=pl.BlockSpec((1, tb, ocd), lambda b: (b, 0, 0)),
        compiler_params=pltpu.CompilerParams(dimension_semantics=("parallel",)),
    )(Wt, xbd, E, ET)

    # TODO(synk): if profiling ever shows masked-vst stalls at ocd=160, pad the kernel
    # output slab to 256 lanes and slice here (review called this a minor win).
    return out.reshape(B, out_caps, out_dim)


def digitcaps_ref(x, W, num_routing=NUM_ROUTING):
    # Pure-JAX reference mirroring the PyTorch forward exactly (including the
    # per-iteration trailing softmax/s/squash recompute); gelu uses true erf.
    if W.ndim == 5:
        W = W[0]
    out_caps, in_caps, out_dim, in_dim = W.shape
    B = x.shape[0]
    u_hat = jnp.einsum('oidk,bik->boid', W, x)          # (B, OC, IC, OD)
    b = jnp.zeros((B, out_caps, in_caps), jnp.float32)
    v = None
    for _ in range(num_routing - 1):
        c = jax.nn.softmax(b, axis=1)
        s = jnp.sum(c[..., None] * u_hat, axis=2)
        v = _squash(s, jax.lax.erf)
        uv = jnp.sum(u_hat * v[:, :, None, :], axis=-1)
        b = b + uv
        c = jax.nn.softmax(b, axis=1)
        s = jnp.sum(c[..., None] * u_hat, axis=2)
        v = _squash(s, jax.lax.erf)
    return v


if __name__ == "__main__":
    key = jax.random.PRNGKey(0)
    kx, kw = jax.random.split(key)

    # Deterministic synthetic inputs / parameters (W ~ 0.01 * randn, as in __init__).
    x = jax.random.normal(kx, (BATCH, IN_CAPS, IN_DIM), dtype=jnp.float32)
    W = 0.01 * jax.random.normal(
        kw, (1, OUT_CAPS, IN_CAPS, OUT_DIM, IN_DIM), dtype=jnp.float32)

    v = digit_caps_forward(x, W, NUM_ROUTING)
    v = jax.block_until_ready(v)

    v_ref = digitcaps_ref(x, W, NUM_ROUTING)
    np.testing.assert_allclose(np.asarray(v), np.asarray(v_ref), rtol=1e-4, atol=1e-5)

    print("KERNEL_OK")
</pallas_src>

<mosaic_0001>
module attributes {stable_mosaic.version = 11 : i64} {
  func.func @digitcaps_kernel(%arg0: i32, %arg1: memref<256x160xf32, #tpu.memory_space<vmem>>, %arg2: memref<1x64x256xf32, #tpu.memory_space<vmem>>, %arg3: memref<10x160xf32, #tpu.memory_space<vmem>>, %arg4: memref<160x10xf32, #tpu.memory_space<vmem>>, %arg5: memref<1x2x160xf32, #tpu.memory_space<vmem>>) attributes {dimension_semantics = [#tpu.dimension_semantics<parallel>], iteration_bounds = array<i64: 1>, scalar_prefetch = 0 : i64, scratch_operands = 0 : i64, tpu.core_type = #tpu.core_type<tc>, window_params = [{pipeline_mode = #tpu.pipeline_mode<synchronous>, transform_indices = @transform_0, window_bounds = array<i64: 256, 160>}, {transform_indices = @transform_1, window_bounds = array<i64: 1, 64, 256>}, {pipeline_mode = #tpu.pipeline_mode<synchronous>, transform_indices = @transform_2, window_bounds = array<i64: 10, 160>}, {pipeline_mode = #tpu.pipeline_mode<synchronous>, transform_indices = @transform_3, window_bounds = array<i64: 160, 10>}, {transform_indices = @transform_4, window_bounds = array<i64: 1, 2, 160>}]} {
    %c0 = arith.constant 0 : index
    %c0_0 = arith.constant 0 : index
    %c0_1 = arith.constant 0 : index
    %0 = vector.load %arg2[%c0, %c0_0, %c0_1] : memref<1x64x256xf32, #tpu.memory_space<vmem>>, vector<1x64x256xf32>
    %1 = vector.shape_cast %0 : vector<1x64x256xf32> to vector<64x256xf32>
    %c0_2 = arith.constant 0 : index
    %c0_3 = arith.constant 0 : index
    %2 = vector.load %arg1[%c0_2, %c0_3] : memref<256x160xf32, #tpu.memory_space<vmem>>, vector<256x160xf32>
    %cst = arith.constant dense<0.000000e+00> : vector<64x160xf32>
    %3 = tpu.matmul %1, %2, %cst {dimension_numbers = #tpu.dot_dimension_numbers<[1], [0], [0], [1], [0, 0, 1, 1], [], []>} : vector<64x256xf32>, vector<256x160xf32>, vector<64x160xf32> -> vector<64x160xf32>
    %4 = vector.shape_cast %3 : vector<64x160xf32> to vector<2x32x160xf32>
    %cst_4 = arith.constant dense<0.000000e+00> : vector<2x160xf32>
    %5 = vector.multi_reduction <add>, %4, %cst_4 [1] : vector<2x32x160xf32> to vector<2x160xf32>
    %cst_5 = arith.constant 1.000000e-01 : f32
    %6 = vector.broadcast %cst_5 : f32 to vector<2x160xf32>
    %7 = arith.mulf %5, %6 : vector<2x160xf32>
    %cst_6 = arith.constant 5.000000e-01 : f32
    %8 = vector.broadcast %cst_6 : f32 to vector<2x160xf32>
    %9 = arith.mulf %8, %7 : vector<2x160xf32>
    %cst_7 = arith.constant 0.707106769 : f32
    %10 = vector.broadcast %cst_7 : f32 to vector<2x160xf32>
    %11 = arith.mulf %7, %10 : vector<2x160xf32>
    %12 = math.absf %11 : vector<2x160xf32>
    %cst_8 = arith.constant 0.327591091 : f32
    %13 = vector.broadcast %cst_8 : f32 to vector<2x160xf32>
    %14 = arith.mulf %13, %12 : vector<2x160xf32>
    %cst_9 = arith.constant 1.000000e+00 : f32
    %15 = vector.broadcast %cst_9 : f32 to vector<2x160xf32>
    %16 = arith.addf %15, %14 : vector<2x160xf32>
    %17 = tpu.reciprocal %16 : vector<2x160xf32> -> vector<2x160xf32>
    %cst_10 = arith.constant 1.06140542 : f32
    %18 = vector.broadcast %cst_10 : f32 to vector<2x160xf32>
    %19 = arith.mulf %18, %17 : vector<2x160xf32>
    %cst_11 = arith.constant -1.45315206 : f32
    %20 = vector.broadcast %cst_11 : f32 to vector<2x160xf32>
    %21 = arith.addf %19, %20 : vector<2x160xf32>
    %22 = arith.mulf %21, %17 : vector<2x160xf32>
    %cst_12 = arith.constant 1.42141378 : f32
    %23 = vector.broadcast %cst_12 : f32 to vector<2x160xf32>
    %24 = arith.addf %22, %23 : vector<2x160xf32>
    %25 = arith.mulf %24, %17 : vector<2x160xf32>
    %cst_13 = arith.constant -0.284496725 : f32
    %26 = vector.broadcast %cst_13 : f32 to vector<2x160xf32>
    %27 = arith.addf %25, %26 : vector<2x160xf32>
    %28 = arith.mulf %27, %17 : vector<2x160xf32>
    %cst_14 = arith.constant 0.254829586 : f32
    %29 = vector.broadcast %cst_14 : f32 to vector<2x160xf32>
    %30 = arith.addf %28, %29 : vector<2x160xf32>
    %31 = arith.mulf %30, %17 : vector<2x160xf32>
    %cst_15 = arith.constant 0.000000e+00 : f32
    %32 = vector.broadcast %cst_15 : f32 to vector<2x160xf32>
    %33 = arith.subf %32, %12 : vector<2x160xf32>
    %34 = arith.mulf %33, %12 : vector<2x160xf32>
    %35 = math.exp %34 : vector<2x160xf32>
    %36 = arith.mulf %31, %35 : vector<2x160xf32>
    %cst_16 = arith.constant 1.000000e+00 : f32
    %37 = vector.broadcast %cst_16 : f32 to vector<2x160xf32>
    %38 = arith.subf %37, %36 : vector<2x160xf32>
    %cst_17 = arith.constant 0.000000e+00 : f32
    %39 = vector.broadcast %cst_17 : f32 to vector<2x160xf32>
    %40 = arith.cmpf olt, %11, %39 : vector<2x160xf32>
    %cst_18 = arith.constant 0.000000e+00 : f32
    %41 = vector.broadcast %cst_18 : f32 to vector<2x160xf32>
    %42 = arith.subf %41, %38 : vector<2x160xf32>
    %43 = arith.select %40, %42, %38 : vector<2x160xi1>, vector<2x160xf32>
    %cst_19 = arith.constant 1.000000e+00 : f32
    %44 = vector.broadcast %cst_19 : f32 to vector<2x160xf32>
    %45 = arith.addf %44, %43 : vector<2x160xf32>
    %46 = arith.mulf %9, %45 : vector<2x160xf32>
    %cst_20 = arith.constant 1.000000e+00 : f32
    %47 = vector.broadcast %cst_20 : f32 to vector<2x160xf32>
    %48 = arith.subf %7, %47 : vector<2x160xf32>
    %49 = arith.subf %48, %46 : vector<2x160xf32>
    %50 = math.cos %7 : vector<2x160xf32>
    %51 = arith.addf %49, %50 : vector<2x160xf32>
    %cst_21 = arith.constant 0.000000e+00 : f32
    %52 = vector.broadcast %cst_21 : f32 to vector<2x160xf32>
    %53 = arith.maximumf %7, %52 : vector<2x160xf32>
    %54 = arith.subf %51, %53 : vector<2x160xf32>
    %55 = vector.shape_cast %54 : vector<2x160xf32> to vector<2x1x160xf32>
    %56 = vector.broadcast %55 : vector<2x1x160xf32> to vector<2x32x160xf32>
    %57 = arith.mulf %4, %56 : vector<2x32x160xf32>
    %58 = vector.shape_cast %57 : vector<2x32x160xf32> to vector<64x160xf32>
    %c0_22 = arith.constant 0 : index
    %c0_23 = arith.constant 0 : index
    %59 = vector.load %arg4[%c0_22, %c0_23] : memref<160x10xf32, #tpu.memory_space<vmem>>, vector<160x10xf32>
    %cst_24 = arith.constant dense<0.000000e+00> : vector<64x10xf32>
    %60 = tpu.matmul %58, %59, %cst_24 {dimension_numbers = #tpu.dot_dimension_numbers<[1], [0], [0], [1], [0, 0, 1, 1], [], []>} : vector<64x160xf32>, vector<160x10xf32>, vector<64x10xf32> -> vector<64x10xf32>
    %cst_25 = arith.constant dense<0xFF800000> : vector<64xf32>
    %61 = vector.multi_reduction <maximumf>, %60, %cst_25 [1] : vector<64x10xf32> to vector<64xf32>
    %62 = vector.shape_cast %61 : vector<64xf32> to vector<64x1xf32>
    %63 = vector.broadcast %62 : vector<64x1xf32> to vector<64x10xf32>
    %64 = arith.subf %60, %63 : vector<64x10xf32>
    %65 = math.exp %64 : vector<64x10xf32>
    %cst_26 = arith.constant dense<0.000000e+00> : vector<64xf32>
    %66 = vector.multi_reduction <add>, %65, %cst_26 [1] : vector<64x10xf32> to vector<64xf32>
    %67 = vector.shape_cast %66 : vector<64xf32> to vector<64x1xf32>
    %68 = tpu.reciprocal %67 : vector<64x1xf32> -> vector<64x1xf32>
    %69 = vector.broadcast %68 : vector<64x1xf32> to vector<64x10xf32>
    %70 = arith.mulf %65, %69 : vector<64x10xf32>
    %c0_27 = arith.constant 0 : index
    %c0_28 = arith.constant 0 : index
    %71 = vector.load %arg3[%c0_27, %c0_28] : memref<10x160xf32, #tpu.memory_space<vmem>>, vector<10x160xf32>
    %cst_29 = arith.constant dense<0.000000e+00> : vector<64x160xf32>
    %72 = tpu.matmul %70, %71, %cst_29 {dimension_numbers = #tpu.dot_dimension_numbers<[1], [0], [0], [1], [0, 0, 1, 1], [], []>} : vector<64x10xf32>, vector<10x160xf32>, vector<64x160xf32> -> vector<64x160xf32>
    %73 = arith.mulf %72, %3 : vector<64x160xf32>
    %74 = vector.shape_cast %73 : vector<64x160xf32> to vector<2x32x160xf32>
    %cst_30 = arith.constant dense<0.000000e+00> : vector<2x160xf32>
    %75 = vector.multi_reduction <add>, %74, %cst_30 [1] : vector<2x32x160xf32> to vector<2x160xf32>
    %cst_31 = arith.constant 5.000000e-01 : f32
    %76 = vector.broadcast %cst_31 : f32 to vector<2x160xf32>
    %77 = arith.mulf %76, %75 : vector<2x160xf32>
    %cst_32 = arith.constant 0.707106769 : f32
    %78 = vector.broadcast %cst_32 : f32 to vector<2x160xf32>
    %79 = arith.mulf %75, %78 : vector<2x160xf32>
    %80 = math.absf %79 : vector<2x160xf32>
    %cst_33 = arith.constant 0.327591091 : f32
    %81 = vector.broadcast %cst_33 : f32 to vector<2x160xf32>
    %82 = arith.mulf %81, %80 : vector<2x160xf32>
    %cst_34 = arith.constant 1.000000e+00 : f32
    %83 = vector.broadcast %cst_34 : f32 to vector<2x160xf32>
    %84 = arith.addf %83, %82 : vector<2x160xf32>
    %85 = tpu.reciprocal %84 : vector<2x160xf32> -> vector<2x160xf32>
    %cst_35 = arith.constant 1.06140542 : f32
    %86 = vector.broadcast %cst_35 : f32 to vector<2x160xf32>
    %87 = arith.mulf %86, %85 : vector<2x160xf32>
    %cst_36 = arith.constant -1.45315206 : f32
    %88 = vector.broadcast %cst_36 : f32 to vector<2x160xf32>
    %89 = arith.addf %87, %88 : vector<2x160xf32>
    %90 = arith.mulf %89, %85 : vector<2x160xf32>
    %cst_37 = arith.constant 1.42141378 : f32
    %91 = vector.broadcast %cst_37 : f32 to vector<2x160xf32>
    %92 = arith.addf %90, %91 : vector<2x160xf32>
    %93 = arith.mulf %92, %85 : vector<2x160xf32>
    %cst_38 = arith.constant -0.284496725 : f32
    %94 = vector.broadcast %cst_38 : f32 to vector<2x160xf32>
    %95 = arith.addf %93, %94 : vector<2x160xf32>
    %96 = arith.mulf %95, %85 : vector<2x160xf32>
    %cst_39 = arith.constant 0.254829586 : f32
    %97 = vector.broadcast %cst_39 : f32 to vector<2x160xf32>
    %98 = arith.addf %96, %97 : vector<2x160xf32>
    %99 = arith.mulf %98, %85 : vector<2x160xf32>
    %cst_40 = arith.constant 0.000000e+00 : f32
    %100 = vector.broadcast %cst_40 : f32 to vector<2x160xf32>
    %101 = arith.subf %100, %80 : vector<2x160xf32>
    %102 = arith.mulf %101, %80 : vector<2x160xf32>
    %103 = math.exp %102 : vector<2x160xf32>
    %104 = arith.mulf %99, %103 : vector<2x160xf32>
    %cst_41 = arith.constant 1.000000e+00 : f32
    %105 = vector.broadcast %cst_41 : f32 to vector<2x160xf32>
    %106 = arith.subf %105, %104 : vector<2x160xf32>
    %cst_42 = arith.constant 0.000000e+00 : f32
    %107 = vector.broadcast %cst_42 : f32 to vector<2x160xf32>
    %108 = arith.cmpf olt, %79, %107 : vector<2x160xf32>
    %cst_43 = arith.constant 0.000000e+00 : f32
    %109 = vector.broadcast %cst_43 : f32 to vector<2x160xf32>
    %110 = arith.subf %109, %106 : vector<2x160xf32>
    %111 = arith.select %108, %110, %106 : vector<2x160xi1>, vector<2x160xf32>
    %cst_44 = arith.constant 1.000000e+00 : f32
    %112 = vector.broadcast %cst_44 : f32 to vector<2x160xf32>
    %113 = arith.addf %112, %111 : vector<2x160xf32>
    %114 = arith.mulf %77, %113 : vector<2x160xf32>
    %cst_45 = arith.constant 1.000000e+00 : f32
    %115 = vector.broadcast %cst_45 : f32 to vector<2x160xf32>
    %116 = arith.subf %75, %115 : vector<2x160xf32>
    %117 = arith.subf %116, %114 : vector<2x160xf32>
    %118 = math.cos %75 : vector<2x160xf32>
    %119 = arith.addf %117, %118 : vector<2x160xf32>
    %cst_46 = arith.constant 0.000000e+00 : f32
    %120 = vector.broadcast %cst_46 : f32 to vector<2x160xf32>
    %121 = arith.maximumf %75, %120 : vector<2x160xf32>
    %122 = arith.subf %119, %121 : vector<2x160xf32>
    %123 = vector.shape_cast %122 : vector<2x160xf32> to vector<2x1x160xf32>
    %124 = vector.broadcast %123 : vector<2x1x160xf32> to vector<2x32x160xf32>
    %125 = arith.mulf %4, %124 : vector<2x32x160xf32>
    %126 = vector.shape_cast %125 : vector<2x32x160xf32> to vector<64x160xf32>
    %c0_47 = arith.constant 0 : index
    %c0_48 = arith.constant 0 : index
    %127 = vector.load %arg4[%c0_47, %c0_48] : memref<160x10xf32, #tpu.memory_space<vmem>>, vector<160x10xf32>
    %cst_49 = arith.constant dense<0.000000e+00> : vector<64x10xf32>
    %128 = tpu.matmul %126, %127, %cst_49 {dimension_numbers = #tpu.dot_dimension_numbers<[1], [0], [0], [1], [0, 0, 1, 1], [], []>} : vector<64x160xf32>, vector<160x10xf32>, vector<64x10xf32> -> vector<64x10xf32>
    %129 = arith.addf %60, %128 : vector<64x10xf32>
    %cst_50 = arith.constant dense<0xFF800000> : vector<64xf32>
    %130 = vector.multi_reduction <maximumf>, %129, %cst_50 [1] : vector<64x10xf32> to vector<64xf32>
    %131 = vector.shape_cast %130 : vector<64xf32> to vector<64x1xf32>
    %132 = vector.broadcast %131 : vector<64x1xf32> to vector<64x10xf32>
    %133 = arith.subf %129, %132 : vector<64x10xf32>
    %134 = math.exp %133 : vector<64x10xf32>
    %cst_51 = arith.constant dense<0.000000e+00> : vector<64xf32>
    %135 = vector.multi_reduction <add>, %134, %cst_51 [1] : vector<64x10xf32> to vector<64xf32>
    %136 = vector.shape_cast %135 : vector<64xf32> to vector<64x1xf32>
    %137 = tpu.reciprocal %136 : vector<64x1xf32> -> vector<64x1xf32>
    %138 = vector.broadcast %137 : vector<64x1xf32> to vector<64x10xf32>
    %139 = arith.mulf %134, %138 : vector<64x10xf32>
    %c0_52 = arith.constant 0 : index
    %c0_53 = arith.constant 0 : index
    %140 = vector.load %arg3[%c0_52, %c0_53] : memref<10x160xf32, #tpu.memory_space<vmem>>, vector<10x160xf32>
    %cst_54 = arith.constant dense<0.000000e+00> : vector<64x160xf32>
    %141 = tpu.matmul %139, %140, %cst_54 {dimension_numbers = #tpu.dot_dimension_numbers<[1], [0], [0], [1], [0, 0, 1, 1], [], []>} : vector<64x10xf32>, vector<10x160xf32>, vector<64x160xf32> -> vector<64x160xf32>
    %142 = arith.mulf %141, %3 : vector<64x160xf32>
    %143 = vector.shape_cast %142 : vector<64x160xf32> to vector<2x32x160xf32>
    %cst_55 = arith.constant dense<0.000000e+00> : vector<2x160xf32>
    %144 = vector.multi_reduction <add>, %143, %cst_55 [1] : vector<2x32x160xf32> to vector<2x160xf32>
    %cst_56 = arith.constant 5.000000e-01 : f32
    %145 = vector.broadcast %cst_56 : f32 to vector<2x160xf32>
    %146 = arith.mulf %145, %144 : vector<2x160xf32>
    %cst_57 = arith.constant 0.707106769 : f32
    %147 = vector.broadcast %cst_57 : f32 to vector<2x160xf32>
    %148 = arith.mulf %144, %147 : vector<2x160xf32>
    %149 = math.absf %148 : vector<2x160xf32>
    %cst_58 = arith.constant 0.327591091 : f32
    %150 = vector.broadcast %cst_58 : f32 to vector<2x160xf32>
    %151 = arith.mulf %150, %149 : vector<2x160xf32>
    %cst_59 = arith.constant 1.000000e+00 : f32
    %152 = vector.broadcast %cst_59 : f32 to vector<2x160xf32>
    %153 = arith.addf %152, %151 : vector<2x160xf32>
    %154 = tpu.reciprocal %153 : vector<2x160xf32> -> vector<2x160xf32>
    %cst_60 = arith.constant 1.06140542 : f32
    %155 = vector.broadcast %cst_60 : f32 to vector<2x160xf32>
    %156 = arith.mulf %155, %154 : vector<2x160xf32>
    %cst_61 = arith.constant -1.45315206 : f32
    %157 = vector.broadcast %cst_61 : f32 to vector<2x160xf32>
    %158 = arith.addf %156, %157 : vector<2x160xf32>
    %159 = arith.mulf %158, %154 : vector<2x160xf32>
    %cst_62 = arith.constant 1.42141378 : f32
    %160 = vector.broadcast %cst_62 : f32 to vector<2x160xf32>
    %161 = arith.addf %159, %160 : vector<2x160xf32>
    %162 = arith.mulf %161, %154 : vector<2x160xf32>
    %cst_63 = arith.constant -0.284496725 : f32
    %163 = vector.broadcast %cst_63 : f32 to vector<2x160xf32>
    %164 = arith.addf %162, %163 : vector<2x160xf32>
    %165 = arith.mulf %164, %154 : vector<2x160xf32>
    %cst_64 = arith.constant 0.254829586 : f32
    %166 = vector.broadcast %cst_64 : f32 to vector<2x160xf32>
    %167 = arith.addf %165, %166 : vector<2x160xf32>
    %168 = arith.mulf %167, %154 : vector<2x160xf32>
    %cst_65 = arith.constant 0.000000e+00 : f32
    %169 = vector.broadcast %cst_65 : f32 to vector<2x160xf32>
    %170 = arith.subf %169, %149 : vector<2x160xf32>
    %171 = arith.mulf %170, %149 : vector<2x160xf32>
    %172 = math.exp %171 : vector<2x160xf32>
    %173 = arith.mulf %168, %172 : vector<2x160xf32>
    %cst_66 = arith.constant 1.000000e+00 : f32
    %174 = vector.broadcast %cst_66 : f32 to vector<2x160xf32>
    %175 = arith.subf %174, %173 : vector<2x160xf32>
    %cst_67 = arith.constant 0.000000e+00 : f32
    %176 = vector.broadcast %cst_67 : f32 to vector<2x160xf32>
    %177 = arith.cmpf olt, %148, %176 : vector<2x160xf32>
    %cst_68 = arith.constant 0.000000e+00 : f32
    %178 = vector.broadcast %cst_68 : f32 to vector<2x160xf32>
    %179 = arith.subf %178, %175 : vector<2x160xf32>
    %180 = arith.select %177, %179, %175 : vector<2x160xi1>, vector<2x160xf32>
    %cst_69 = arith.constant 1.000000e+00 : f32
    %181 = vector.broadcast %cst_69 : f32 to vector<2x160xf32>
    %182 = arith.addf %181, %180 : vector<2x160xf32>
    %183 = arith.mulf %146, %182 : vector<2x160xf32>
    %cst_70 = arith.constant 1.000000e+00 : f32
    %184 = vector.broadcast %cst_70 : f32 to vector<2x160xf32>
    %185 = arith.subf %144, %184 : vector<2x160xf32>
    %186 = arith.subf %185, %183 : vector<2x160xf32>
    %187 = math.cos %144 : vector<2x160xf32>
    %188 = arith.addf %186, %187 : vector<2x160xf32>
    %cst_71 = arith.constant 0.000000e+00 : f32
    %189 = vector.broadcast %cst_71 : f32 to vector<2x160xf32>
    %190 = arith.maximumf %144, %189 : vector<2x160xf32>
    %191 = arith.subf %188, %190 : vector<2x160xf32>
    %c0_72 = arith.constant 0 : index
    %c0_73 = arith.constant 0 : index
    %c0_74 = arith.constant 0 : index
    %192 = vector.load %arg5[%c0_72, %c0_73, %c0_74] : memref<1x2x160xf32, #tpu.memory_space<vmem>>, vector<1x2x160xf32>
    %193 = vector.shape_cast %192 : vector<1x2x160xf32> to vector<2x160xf32>
    %194 = vector.shape_cast %191 : vector<2x160xf32> to vector<1x2x160xf32>
    tpu.vector_store %arg5[%c0_72, %c0_73, %c0_74], %194 {strides = array<i32>} : memref<1x2x160xf32, #tpu.memory_space<vmem>>, vector<1x2x160xf32>,
    return
  }
  func.func @transform_0(%arg0: i32) -> (i32, i32) {
    %c0_i32 = arith.constant 0 : i32
    %c0_i32_0 = arith.constant 0 : i32
    %c0_i32_1 = arith.constant 0 : i32
    return %c0_i32, %c0_i32_0 : i32, i32
  }
  func.func @transform_1(%arg0: i32) -> (i32, i32, i32) {
    %c0_i32 = arith.constant 0 : i32
    %c0_i32_0 = arith.constant 0 : i32
    %c0_i32_1 = arith.constant 0 : i32
    return %arg0, %c0_i32, %c0_i32_0 : i32, i32, i32
  }
  func.func @transform_2(%arg0: i32) -> (i32, i32) {
    %c0_i32 = arith.constant 0 : i32
    %c0_i32_0 = arith.constant 0 : i32
    %c0_i32_1 = arith.constant 0 : i32
    return %c0_i32, %c0_i32_0 : i32, i32
  }
  func.func @transform_3(%arg0: i32) -> (i32, i32) {
    %c0_i32 = arith.constant 0 : i32
    %c0_i32_0 = arith.constant 0 : i32
    %c0_i32_1 = arith.constant 0 : i32
    return %c0_i32, %c0_i32_0 : i32, i32
  }
  func.func @transform_4(%arg0: i32) -> (i32, i32, i32) {
    %c0_i32 = arith.constant 0 : i32
    %c0_i32_0 = arith.constant 0 : i32
    %c0_i32_1 = arith.constant 0 : i32
    return %arg0, %c0_i32, %c0_i32_0 : i32, i32, i32
  }
}

</mosaic_0001>

<bundles_post_ra>
// kernel: tpu_custom_call.1
= control target key start
LH: loop header
LB: loop body
LE: loop exit
PB: predicated region body
PF: predicated region fallthrough
CT: control target
= control target key end

     0   :  { %s5186_s0 = inlined_call_operand.vmem [shape: f32[256,160], index: 0, kind: input, shape index: {}]   ;;  %s5187_s1 = inlined_call_operand.vmem [shape: f32[1,64,256], index: 1, kind: input, shape index: {}]   ;;  %s5188_s2 = inlined_call_operand.vmem [shape: f32[10,160], index: 2, kind: input, shape index: {}]   ;;  %s5189_s3 = inlined_call_operand.vmem [shape: f32[160,10], index: 3, kind: input, shape index: {}]   ;;  %s5190_s4 = inlined_call_operand.hbm [shape: f32[1,2,160], index: 4, kind: output, shape index: {}]  }
   0x1   :  { %v35_v0 = vld [vmem:[%s5186_s0 + $0x8] sm:$0xff]  ;;  %v37_v1 = vld [vmem:[%s5186_s0 + $0x18] sm:$0xff]  ;;  %v34_v2 = vld [vmem:[%s5186_s0] sm:$0xff] }
   0x2   :  { %v2915_v3 = vpack.c.bf16 %v37_v1, %v35_v0  ;;  %v36_v4 = vld [vmem:[%s5186_s0 + $0x10] sm:$0xff]  ;;  %v39_v5 = vld [vmem:[%s5186_s0 + $0x28] sm:$0xff]  ;;  %v41_v6 = vld [vmem:[%s5186_s0 + $0x38] sm:$0xff] }
   0x3   :  { %v2917_v7 = vpack.c.bf16 %v36_v4, %v34_v2  ;;  %v2919_v8 = vpack.c.bf16 %v41_v6, %v39_v5  ;;  %v38_v9 = vld [vmem:[%s5186_s0 + $0x20] sm:$0xff]  ;;  %v40_v10 = vld [vmem:[%s5186_s0 + $0x30] sm:$0xff]  ;;  %v43_v11 = vld [vmem:[%s5186_s0 + $0x48] sm:$0xff] }
   0x4   :  { %2916 = vmatprep.subr.bf16.mxu0 %v2915_v3  ;;  %v45_v12 = vld [vmem:[%s5186_s0 + $0x58] sm:$0xff]  ;;  %v2921_v13 = vpack.c.bf16 %v40_v10, %v38_v9  ;;  %v42_v15 = vld [vmem:[%s5186_s0 + $0x40] sm:$0xff]  ;;  %v44_v16 = vld [vmem:[%s5186_s0 + $0x50] sm:$0xff] }
   0x5   :  { %2918 = vmatpush1.bf16.msra.mxu0 %v2917_v7  ;;  %v2923_v14 = vpack.c.bf16 %v45_v12, %v43_v11  ;;  %v47_v17 = vld [vmem:[%s5186_s0 + $0x68] sm:$0xff]  ;;  %v49_v18 = vld [vmem:[%s5186_s0 + $0x78] sm:$0xff]  ;;  %v2925_v19 = vpack.c.bf16 %v44_v16, %v42_v15  ;;  %v46_v21 = vld [vmem:[%s5186_s0 + $0x60] sm:$0xff] }
   0x6   :  { %2920 = vmatprep.subr.bf16.mxu0 %v2919_v8  ;;  %v2927_v20 = vpack.c.bf16 %v49_v18, %v47_v17  ;;  %v48_v22 = vld [vmem:[%s5186_s0 + $0x70] sm:$0xff]  ;;  %v51_v23 = vld [vmem:[%s5186_s0 + $0x88] sm:$0xff]  ;;  %v53_v24 = vld [vmem:[%s5186_s0 + $0x98] sm:$0xff] }
   0x7   :  { %v2929_v25 = vpack.c.bf16 %v48_v22, %v46_v21  ;;  %v2931_v26 = vpack.c.bf16 %v53_v24, %v51_v23  ;;  %v50_v27 = vld [vmem:[%s5186_s0 + $0x80] sm:$0xff]  ;;  %v52_v28 = vld [vmem:[%s5186_s0 + $0x90] sm:$0xff]  ;;  %v55_v29 = vld [vmem:[%s5186_s0 + $0xa8] sm:$0xff] }
   0x8   :  { %v57_v30 = vld [vmem:[%s5186_s0 + $0xb8] sm:$0xff]  ;;  %v2933_v31 = vpack.c.bf16 %v52_v28, %v50_v27  ;;  %v54_v33 = vld [vmem:[%s5186_s0 + $0xa0] sm:$0xff]  ;;  %v56_v34 = vld [vmem:[%s5186_s0 + $0xb0] sm:$0xff] }
   0x9   :  { %2922 = vmatpush1.bf16.msra.mxu0 %v2921_v13  ;;  %v2935_v32 = vpack.c.bf16 %v57_v30, %v55_v29  ;;  %v59_v35 = vld [vmem:[%s5186_s0 + $0xc8] sm:$0xff]  ;;  %v61_v36 = vld [vmem:[%s5186_s0 + $0xd8] sm:$0xff]  ;;  %v2937_v37 = vpack.c.bf16 %v56_v34, %v54_v33  ;;  %v58_v39 = vld [vmem:[%s5186_s0 + $0xc0] sm:$0xff] }
   0xa   :  { %2924 = vmatprep.subr.bf16.mxu0 %v2923_v14  ;;  %v2939_v38 = vpack.c.bf16 %v61_v36, %v59_v35  ;;  %v60_v40 = vld [vmem:[%s5186_s0 + $0xd0] sm:$0xff]  ;;  %v19_v41 = vld [vmem:[%s5187_s1 + $0x8] sm:$0xff]  ;;  %v65_v43 = vld [vmem:[%s5186_s0 + $0xf8] sm:$0xff] }
   0xb   :  { %v63_v42 = vld [vmem:[%s5186_s0 + $0xe8] sm:$0xff]  ;;  %162 = vmatprep.mubr.f32.mxu0 %v19_v41  ;;  %v2941_v44 = vpack.c.bf16 %v60_v40, %v58_v39  ;;  %v62_v46 = vld [vmem:[%s5186_s0 + $0xe0] sm:$0xff]  ;;  %v64_v47 = vld [vmem:[%s5186_s0 + $0xf0] sm:$0xff] }
   0xc   :  { %v2943_v45 = vpack.c.bf16 %v65_v43, %v63_v42  ;;  %v67_v48 = vld [vmem:[%s5186_s0 + $0x108] sm:$0xff]  ;;  %v69_v49 = vld [vmem:[%s5186_s0 + $0x118] sm:$0xff] }
   0xd   :  { %2926 = vmatpush1.bf16.msra.mxu0 %v2925_v19 }
   0xe   :  { %2928 = vmatprep.subr.bf16.mxu0 %v2927_v20 }
  0x11   :  { %2930 = vmatpush1.bf16.msra.mxu0 %v2929_v25 }
  0x12   :  { %2932 = vmatprep.subr.bf16.mxu0 %v2931_v26 }
  0x15   :  { %2934 = vmatpush1.bf16.msra.mxu0 %v2933_v31 }
  0x16   :  { %2936 = vmatprep.subr.bf16.mxu0 %v2935_v32 }
  0x19   :  { %2938 = vmatpush1.bf16.msra.mxu0 %v2937_v37 }
  0x1a   :  { %2940 = vmatprep.subr.bf16.mxu0 %v2939_v38 }
  0x1b   :  { %9 = vsyncpa [#allocation3], 0  ;;  %v2945_v50 = vpack.c.bf16 %v64_v47, %v62_v46  ;;  %v2947_v51 = vpack.c.bf16 %v69_v49, %v67_v48  ;;  %v66_v52 = vld [vmem:[%s5186_s0 + $0x100] sm:$0xff]  ;;  %v68_v53 = vld [vmem:[%s5186_s0 + $0x110] sm:$0xff]  ;;  %vm220_vm0 = vcmask 261120  }
  0x1c   :  { %v71_v54 = vld [vmem:[%s5186_s0 + $0x128] sm:$0xff]  ;;  %v73_v55 = vld [vmem:[%s5186_s0 + $0x138] sm:$0xff]  ;;  %v2949_v56 = vpack.c.bf16 %v68_v53, %v66_v52  ;;  %v70_v58 = vld [vmem:[%s5186_s0 + $0x120] sm:$0xff] }
  0x1d   :  { %2942 = vmatpush1.bf16.msra.mxu0 %v2941_v44  ;;  %v2951_v57 = vpack.c.bf16 %v73_v55, %v71_v54  ;;  %v72_v59 = vld [vmem:[%s5186_s0 + $0x130] sm:$0xff]  ;;  %v75_v60 = vld [vmem:[%s5186_s0 + $0x148] sm:$0xff]  ;;  %v77_v61 = vld [vmem:[%s5186_s0 + $0x158] sm:$0xff] }
  0x1e   :  { %2944 = vmatprep.subr.bf16.mxu0 %v2943_v45  ;;  %v2953_v62 = vpack.c.bf16 %v72_v59, %v70_v58  ;;  %v2955_v63 = vpack.c.bf16 %v77_v61, %v75_v60  ;;  %v74_v0 = vld [vmem:[%s5186_s0 + $0x140] sm:$0xff]  ;;  %v76_v1 = vld [vmem:[%s5186_s0 + $0x150] sm:$0xff]  ;;  %v79_v2 = vld [vmem:[%s5186_s0 + $0x168] sm:$0xff] }
  0x1f   :  { %v81_v3 = vld [vmem:[%s5186_s0 + $0x178] sm:$0xff]  ;;  %v2957_v4 = vpack.c.bf16 %v76_v1, %v74_v0  ;;  %v78_v6 = vld [vmem:[%s5186_s0 + $0x160] sm:$0xff]  ;;  %v80_v7 = vld [vmem:[%s5186_s0 + $0x170] sm:$0xff] }
  0x20   :  { %v2959_v5 = vpack.c.bf16 %v81_v3, %v79_v2  ;;  %v83_v8 = vld [vmem:[%s5186_s0 + $0x188] sm:$0xff]  ;;  %v85_v9 = vld [vmem:[%s5186_s0 + $0x198] sm:$0xff]  ;;  %v2961_v10 = vpack.c.bf16 %v80_v7, %v78_v6  ;;  %v82_v12 = vld [vmem:[%s5186_s0 + $0x180] sm:$0xff] }
  0x21   :  { %2946 = vmatpush1.bf16.msra.mxu0 %v2945_v50  ;;  %v2963_v11 = vpack.c.bf16 %v85_v9, %v83_v8  ;;  %v84_v13 = vld [vmem:[%s5186_s0 + $0x190] sm:$0xff]  ;;  %v87_v14 = vld [vmem:[%s5186_s0 + $0x1a8] sm:$0xff]  ;;  %v89_v15 = vld [vmem:[%s5186_s0 + $0x1b8] sm:$0xff] }
  0x22   :  { %2948 = vmatprep.subr.bf16.mxu0 %v2947_v51  ;;  %v2965_v16 = vpack.c.bf16 %v84_v13, %v82_v12  ;;  %v2967_v17 = vpack.c.bf16 %v89_v15, %v87_v14  ;;  %v86_v18 = vld [vmem:[%s5186_s0 + $0x1a0] sm:$0xff]  ;;  %v88_v19 = vld [vmem:[%s5186_s0 + $0x1b0] sm:$0xff]  ;;  %v91_v20 = vld [vmem:[%s5186_s0 + $0x1c8] sm:$0xff]  ;;  %v3294_v51 = vmov 0.0|0.0  }
  0x23   :  { %v93_v21 = vld [vmem:[%s5186_s0 + $0x1d8] sm:$0xff]  ;;  %v2969_v22 = vpack.c.bf16 %v88_v19, %v86_v18  ;;  %v90_v24 = vld [vmem:[%s5186_s0 + $0x1c0] sm:$0xff]  ;;  %v92_v25 = vld [vmem:[%s5186_s0 + $0x1d0] sm:$0xff]  ;;  %2979 = vmatprep.subr.bf16.mxu1 %v3294_v51 }
  0x24   :  { %v2971_v23 = vpack.c.bf16 %v93_v21, %v91_v20  ;;  %v95_v26 = vld [vmem:[%s5186_s0 + $0x1e8] sm:$0xff]  ;;  %v97_v27 = vld [vmem:[%s5186_s0 + $0x1f8] sm:$0xff]  ;;  %v2973_v28 = vpack.c.bf16 %v92_v25, %v90_v24  ;;  %v94_v30 = vld [vmem:[%s5186_s0 + $0x1e0] sm:$0xff] }
  0x25   :  { %2950 = vmatpush1.bf16.msra.mxu0 %v2949_v56  ;;  %v2975_v29 = vpack.c.bf16 %v97_v27, %v95_v26  ;;  %v96_v31 = vld [vmem:[%s5186_s0 + $0x1f0] sm:$0xff]  ;;  %v18_v33 = vld [vmem:[%s5187_s1] sm:$0xff]  ;;  %v21_v34 = vld [vmem:[%s5187_s1 + $0x18] sm:$0xff] }
  0x26   :  { %2952 = vmatprep.subr.bf16.mxu0 %v2951_v57  ;;  %v2977_v32 = vpack.c.bf16 %v96_v31, %v94_v30  ;;  %v20_v35 = vld [vmem:[%s5187_s1 + $0x10] sm:$0xff]  ;;  %v23_v36 = vld [vmem:[%s5187_s1 + $0x28] sm:$0xff]  ;;  %v22_v37 = vld [vmem:[%s5187_s1 + $0x20] sm:$0xff] }
  0x27   :  { %v25_v38 = vld [vmem:[%s5187_s1 + $0x38] sm:$0xff]  ;;  %v24_v39 = vld [vmem:[%s5187_s1 + $0x30] sm:$0xff]  ;;  %v27_v40 = vld [vmem:[%s5187_s1 + $0x48] sm:$0xff] }
  0x28   :  { %v26_v41 = vld [vmem:[%s5187_s1 + $0x40] sm:$0xff]  ;;  %v29_v42 = vld [vmem:[%s5187_s1 + $0x58] sm:$0xff]  ;;  %v28_v43 = vld [vmem:[%s5187_s1 + $0x50] sm:$0xff] }
  0x29   :  { %2954 = vmatpush1.bf16.msra.mxu0 %v2953_v62  ;;  %v31_v44 = vld [vmem:[%s5187_s1 + $0x68] sm:$0xff]  ;;  %v30_v45 = vld [vmem:[%s5187_s1 + $0x60] sm:$0xff]  ;;  %v33_v46 = vld [vmem:[%s5187_s1 + $0x78] sm:$0xff] }
  0x2a   :  { %2956 = vmatprep.subr.bf16.mxu0 %v2955_v63  ;;  %v32_v47 = vld [vmem:[%s5187_s1 + $0x70] sm:$0xff]  ;;  %v812_v48 = vld [vmem:[%s5189_s3] sm:$0xff]  ;;  %v813_v49 = vld [vmem:[%s5189_s3 + $0x8] sm:$0xff] }
  0x2b   :  { %v814_v50 = vld [vmem:[%s5189_s3 + $0x10] sm:$0xff]  ;;  %v2980_v52 = vpack.c.bf16 %v813_v49, %v812_v48  ;;  %v815_v53 = vld [vmem:[%s5189_s3 + $0x18] sm:$0xff]  ;;  %v816_v55 = vld [vmem:[%s5189_s3 + $0x20] sm:$0xff] }
  0x2c   :  { %v2983_v54 = vpack.c.bf16 %v815_v53, %v814_v50  ;;  %v817_v56 = vld [vmem:[%s5189_s3 + $0x28] sm:$0xff]  ;;  %v818_v58 = vld [vmem:[%s5189_s3 + $0x30] sm:$0xff]  ;;  %v819_v59 = vld [vmem:[%s5189_s3 + $0x38] sm:$0xff] }
  0x2d   :  { %2958 = vmatpush1.bf16.msra.mxu0 %v2957_v4  ;;  %2981 = vmatpush1.bf16.msra.mxu1 %v2980_v52  ;;  %v2986_v57 = vpack.c.bf16 %v817_v56, %v816_v55  ;;  %v2989_v60 = vpack.c.bf16 %v819_v59, %v818_v58  ;;  %v820_v61 = vld [vmem:[%s5189_s3 + $0x40] sm:$0xff]  ;;  %v821_v62 = vld [vmem:[%s5189_s3 + $0x48] sm:$0xff]  ;;  %v822_v0 = vld [vmem:[%s5189_s3 + $0x50] sm:$0xff] }
  0x2e   :  { %2960 = vmatprep.subr.bf16.mxu0 %v2959_v5  ;;  %2982 = vmatprep.subr.bf16.mxu1 %v3294_v51  ;;  %v2992_v63 = vpack.c.bf16 %v821_v62, %v820_v61  ;;  %v823_v1 = vld [vmem:[%s5189_s3 + $0x58] sm:$0xff]  ;;  %v824_v3 = vld [vmem:[%s5189_s3 + $0x60] sm:$0xff]  ;;  %v825_v4 = vld [vmem:[%s5189_s3 + $0x68] sm:$0xff] }
  0x2f   :  { %v2995_v2 = vpack.c.bf16 %v823_v1, %v822_v0  ;;  %v2998_v5 = vpack.c.bf16 %v825_v4, %v824_v3  ;;  %v826_v6 = vld [vmem:[%s5189_s3 + $0x70] sm:$0xff]  ;;  %v827_v7 = vld [vmem:[%s5189_s3 + $0x78] sm:$0xff]  ;;  %v828_v9 = vld [vmem:[%s5189_s3 + $0x80] sm:$0xff] }
  0x30   :  { %v3001_v8 = vpack.c.bf16 %v827_v7, %v826_v6  ;;  %v830_v12 = vld [vmem:[%s5189_s3 + $0x90] sm:$0xff]  ;;  %v831_v13 = vld [vmem:[%s5189_s3 + $0x98] sm:$0xff] }
  0x31   :  { %2962 = vmatpush1.bf16.msra.mxu0 %v2961_v10  ;;  %2984 = vmatpush1.bf16.msra.mxu1 %v2983_v54  ;;  %v829_v10 = vld [vmem:[%s5189_s3 + $0x88] sm:$0xff]  ;;  %v3007_v14 = vpack.c.bf16 %v831_v13, %v830_v12 }
  0x32   :  { %2964 = vmatprep.subr.bf16.mxu0 %v2963_v11  ;;  %2985 = vmatprep.subr.bf16.mxu1 %v3294_v51  ;;  %v3004_v11 = vpack.c.bf16 %v829_v10, %v828_v9 }
  0x35   :  { %2966 = vmatpush1.bf16.msra.mxu0 %v2965_v16  ;;  %2987 = vmatpush1.bf16.msra.mxu1 %v2986_v57 }
  0x36   :  { %2968 = vmatprep.subr.bf16.mxu0 %v2967_v17  ;;  %2988 = vmatprep.subr.bf16.mxu1 %v3294_v51 }
  0x39   :  { %2970 = vmatpush1.bf16.msra.mxu0 %v2969_v22  ;;  %2990 = vmatpush1.bf16.msra.mxu1 %v2989_v60 }
  0x3a   :  { %2972 = vmatprep.subr.bf16.mxu0 %v2971_v23  ;;  %2991 = vmatprep.subr.bf16.mxu1 %v3294_v51 }
  0x3d   :  { %2974 = vmatpush1.bf16.msra.mxu0 %v2973_v28  ;;  %2993 = vmatpush1.bf16.msra.mxu1 %v2992_v63 }
  0x3e   :  { %2976 = vmatprep.subr.bf16.mxu0 %v2975_v29  ;;  %2994 = vmatprep.subr.bf16.mxu1 %v3294_v51 }
  0x41   :  { %2978 = vmatpush1.bf16.msra.mxu0 %v2977_v32  ;;  %2996 = vmatpush1.bf16.msra.mxu1 %v2995_v2 }
  0x42   :  { %3015 = vmatprep.subr.bf16.mxu0 %v3294_v51  ;;  %2997 = vmatprep.subr.bf16.mxu1 %v3294_v51 }
  0x44   :  { %163 = vmatmul.mubr.f32.vlgmr.msra.gmra.mrb[0].mxu0 %v18_v33 }
  0x45   :  { %168 = vmatprep.mubr.f32.mxu0 %v21_v34  ;;  %3017 = vmatpush1.bf16.msra.mxu0 %v2980_v52 }
  0x46   :  { %3018 = vmatprep.subr.bf16.mxu0 %v3294_v51  ;;  %2999 = vmatpush1.bf16.msra.mxu1 %v2998_v5 }
  0x47   :  { %3000 = vmatprep.subr.bf16.mxu1 %v3294_v51 }
  0x48   :  { %169 = vmatmul.mubr.f32.gmra.mrb[2].mxu0 %v20_v35 }
  0x49   :  { %174 = vmatprep.mubr.f32.mxu0 %v23_v36  ;;  %3020 = vmatpush1.bf16.msra.mxu0 %v2983_v54 }
  0x4a   :  { %3021 = vmatprep.subr.bf16.mxu0 %v3294_v51  ;;  %3002 = vmatpush1.bf16.msra.mxu1 %v3001_v8 }
  0x4b   :  { %3003 = vmatprep.subr.bf16.mxu1 %v3294_v51 }
  0x4c   :  { %175 = vmatmul.mubr.f32.gmra.mrb[4].mxu0 %v22_v37 }
  0x4d   :  { %180 = vmatprep.mubr.f32.mxu0 %v25_v38  ;;  %3023 = vmatpush1.bf16.msra.mxu0 %v2986_v57 }
  0x4e   :  { %3024 = vmatprep.subr.bf16.mxu0 %v3294_v51  ;;  %3005 = vmatpush1.bf16.msra.mxu1 %v3004_v11 }
  0x4f   :  { %3006 = vmatprep.subr.bf16.mxu1 %v3294_v51 }
  0x50   :  { %181 = vmatmul.mubr.f32.gmra.mrb[6].mxu0 %v24_v39 }
  0x51   :  { %186 = vmatprep.mubr.f32.mxu0 %v27_v40  ;;  %3026 = vmatpush1.bf16.msra.mxu0 %v2989_v60 }
  0x52   :  { %3027 = vmatprep.subr.bf16.mxu0 %v3294_v51  ;;  %3008 = vmatpush1.bf16.msra.mxu1 %v3007_v14 }
  0x54   :  { %187 = vmatmul.mubr.f32.gmra.mrb[8].mxu0 %v26_v41 }
  0x55   :  { %192 = vmatprep.mubr.f32.mxu0 %v29_v42  ;;  %3029 = vmatpush1.bf16.msra.mxu0 %v2992_v63 }
  0x56   :  { %3030 = vmatprep.subr.bf16.mxu0 %v3294_v51 }
  0x58   :  { %193 = vmatmul.mubr.f32.gmra.mrb[10].mxu0 %v28_v43 }
  0x59   :  { %198 = vmatprep.mubr.f32.mxu0 %v31_v44  ;;  %3032 = vmatpush1.bf16.msra.mxu0 %v2995_v2 }
  0x5a   :  { %3033 = vmatprep.subr.bf16.mxu0 %v3294_v51 }
  0x5c   :  { %199 = vmatmul.mubr.f32.gmra.mrb[12].mxu0 %v30_v45 }
  0x5d   :  { %204 = vmatprep.mubr.f32.mxu0 %v33_v46  ;;  %3035 = vmatpush1.bf16.msra.mxu0 %v2998_v5 }
  0x5e   :  { %3036 = vmatprep.subr.bf16.mxu0 %v3294_v51 }
  0x60   :  { %205 = vmatmul.mubr.f32.gmra.mrb[14].mxu0 %v32_v47 }
  0x61   :  { %3038 = vmatpush1.bf16.msra.mxu0 %v3001_v8 }
  0x62   :  { %3039 = vmatprep.subr.bf16.mxu0 %v3294_v51 }
  0x65   :  { %3041 = vmatpush1.bf16.msra.mxu0 %v3004_v11 }
  0x66   :  { %3042 = vmatprep.subr.bf16.mxu0 %v3294_v51 }
  0x69   :  { %3044 = vmatpush1.bf16.msra.mxu0 %v3007_v14 }
 0x117   :  { %v3650_v15 = vpop.f32.mrb[0].mxu0 }
 0x118   :  { %v3652_v16 = vpop.f32.mrb[1].mxu0 }
 0x119   :  { %v221_v20 = vsel %vm220_vm0, %v3652_v16, 0.0 }
 0x11b   :  { %v3654_v17 = vpop.f32.mrb[2].mxu0 }
 0x11c   :  { %v211_v18 = vadd.f32 %v3654_v17, %v3650_v15  ;;  %v3658_v19 = vpop.f32.mrb[3].mxu0 }
 0x11d   :  { %v222_v21 = vsel %vm220_vm0, %v3658_v19, 0.0 }
 0x11e   :  { %v223_v22 = vadd.f32 %v222_v21, %v221_v20 }
 0x11f   :  { %v3664_v23 = vpop.f32.mrb[4].mxu0 }
 0x120   :  { %v212_v24 = vadd.f32 %v211_v18, %v3664_v23  ;;  %v3667_v25 = vpop.f32.mrb[5].mxu0 }
 0x121   :  { %5221 = vst [vmem:[#allocation5_spill] sm:$0xff] %v3667_v25  ;;  %v224_v26 = vsel %vm220_vm0, %v3667_v25, 0.0 }
 0x122   :  { %v225_v27 = vadd.f32 %v224_v26, %v223_v22 }
 0x123   :  { %v3671_v28 = vpop.f32.mrb[6].mxu0 }
 0x124   :  { %v213_v29 = vadd.f32 %v212_v24, %v3671_v28  ;;  %v3674_v30 = vpop.f32.mrb[7].mxu0 }
 0x125   :  { %5222 = vst [vmem:[#allocation6_spill] sm:$0xff] %v3674_v30  ;;  %v226_v31 = vsel %vm220_vm0, %v3674_v30, 0.0 }
 0x126   :  { %v214_v32 = vrot.slane %v213_v29, 4  ;;  %v227_v33 = vadd.f32 %v226_v31, %v225_v27 }
 0x127   :  { %v3678_v34 = vpop.f32.mrb[8].mxu0 }
 0x128   :  { %v215_v35 = vadd.f32 %v214_v32, %v213_v29  ;;  %v228_v36 = vrot.slane %v227_v33, 4  ;;  %v3680_v37 = vpop.f32.mrb[9].mxu0 }
 0x129   :  { %v243_v45 = vsel %vm220_vm0, %v3680_v37, 0.0 }
 0x12a   :  { %v216_v38 = vrot.slane %v215_v35, 2  ;;  %v229_v39 = vadd.f32 %v228_v36, %v227_v33 }
 0x12b   :  { %v3682_v40 = vpop.f32.mrb[10].mxu0 }
 0x12c   :  { %v217_v41 = vadd.f32 %v216_v38, %v215_v35  ;;  %v230_v42 = vrot.slane %v229_v39, 2  ;;  %v234_v43 = vadd.f32 %v3682_v40, %v3678_v34  ;;  %v3686_v44 = vpop.f32.mrb[11].mxu0  ;;  %v5204_v35 = vmov 683565275  }
 0x12d   :  { %v244_v46 = vsel %vm220_vm0, %v3686_v44, 0.0  ;;  %v5202_v38 = vmov 2475754826  }
 0x12e   :  { %v218_v47 = vrot.slane %v217_v41, 1  ;;  %v231_v48 = vadd.f32 %v230_v42, %v229_v39  ;;  %v245_v49 = vadd.f32 %v244_v46, %v243_v45 }
 0x12f   :  { %v3692_v50 = vpop.f32.mrb[12].mxu0 }
 0x130   :  { %v219_v51 = vadd.f32 %v218_v47, %v217_v41  ;;  %v232_v52 = vrot.slane %v231_v48, 1  ;;  %v235_v53 = vadd.f32 %v234_v43, %v3692_v50  ;;  %v3695_v54 = vpop.f32.mrb[13].mxu0  ;;  %v5199_v41 = vmov 2131351028  }
 0x131   :  { %v246_v55 = vsel %vm220_vm0, %v3695_v54, 0.0  ;;  %v5192_v47 = vmov 2102212464  }
 0x132   :  { %v233_v56 = vadd.f32 %v232_v52, %v231_v48  ;;  %v247_v57 = vadd.f32 %v246_v55, %v245_v49  ;;  %v3699_v58 = vmul.f32 0.1, %v219_v51  ;;  %v5197_v51 = vmov 920167782  }
 0x133   :  { %v3701_v59 = vpop.f32.mrb[14].mxu0  ;;  %v5195_v55 = vmov 1326507024  }
 0x134   :  { %v3703_v60 = vmul.f32 0.1, %v233_v56  ;;  %v3706_v61 = vadd.f32 %v235_v53, %v3701_v59  ;;  %v3708_v62 = vpop.f32.mrb[15].mxu0  ;;  %v3718_v4 = vmul.f32 0.70710677, %v3699_v58  ;;  %v375_v43 = vand.u32 2139095040, %v3699_v58 }
 0x135   :  { %v248_v63 = vsel %vm220_vm0, %v3708_v62, 0.0 }
 0x136   :  { %v249_v0 = vadd.f32 %v248_v63, %v247_v57  ;;  %v3713_v1 = vmul.f32 0.70710677, %v3703_v60  ;;  %v475_v2 = vand.u32 2147483647, %v3703_v60  ;;  %v478_v3 = vand.u32 2139095040, %v3703_v60 }
 0x137   :  { %v3727_v12 = vand.u32 2147483647, %v3718_v4  ;;  %vm477_vm15 = vcmp.lt.s32.totalorder %v3703_v60, 0 }
 0x138   :  { %v250_v5 = vrot.slane %v249_v0, 4  ;;  %v3721_v6 = vand.u32 2147483647, %v3713_v1  ;;  %v479_v7 = vshrl.u32 %v478_v3, 23  ;;  %v482_v11 = vand.u32 8388607, %v475_v2 }
 0x139   :  { %v272_v18 = vmul.f32 0.3275911, %v3727_v12  ;;  %vm345_vm14 = vcmp.lt.f32.partialorder %v3713_v1, 0.0 }
 0x13a   :  { %v273_v8 = vmul.f32 0.3275911, %v3721_v6  ;;  %v251_v9 = vadd.f32 %v250_v5, %v249_v0  ;;  %v2827_v10 = vadd.s32 4294967169, %v479_v7  ;;  %v483_v21 = vor.u32 8388608, %v482_v11 }
 0x13b   :  { %v276_v22 = vadd.f32 1.0, %v272_v18  ;;  %v321_v31 = vsub.f32 0.0, %v3721_v6 }
 0x13c   :  { %v277_v13 = vadd.f32 1.0, %v273_v8  ;;  %v485_v14 = vadd.s32 1, %v2827_v10  ;;  %v252_v20 = vrot.slane %v251_v9, 2  ;;  %v3733_v33 = vshll.u32 %v483_v21, 8 }
 0x13e   :  { %3110 = vrcp.f32 %v277_v13  ;;  %vm486_vm1 = vcmp.gt.s32.totalorder %v485_v14, 0  ;;  %v3730_v29 = vadd.f32 %v252_v20, %v251_v9  ;;  %v376_v13 = vshrl.u32 %v375_v43, 23 }
 0x13f   :  { %v487_v24 = vsel %vm486_vm1, %v485_v14, 0  ;;  %3112 = vrcp.f32 %v276_v22 }
 0x140   :  { %v489_v26 = vand.u32 31, %v487_v24  ;;  %v488_v27 = vshrl.u32 %v487_v24, 5 }
 0x142   :  { %v490_v32 = vsub.s32 32, %v489_v26  ;;  %v492_v36 = vshll.u32 %v5204_v35, %v489_v26  ;;  %v495_v39 = vshll.u32 %v5202_v38, %v489_v26  ;;  %v498_v42 = vshll.u32 %v5199_v41, %v489_v26 }
 0x143   :  { %v501_v49 = vshll.u32 %v5192_v47, %v489_v26  ;;  %v504_v53 = vshll.u32 %v5197_v51, %v489_v26  ;;  %vm507_vm2 = vcmp.lt.s32.totalorder %v488_v27, 1  ;;  %vm508_vm3 = vcmp.lt.s32.totalorder %v488_v27, 2 }
 0x144   :  { %v493_v45 = vshrl.u32 %v5202_v38, %v490_v32  ;;  %v496_v46 = vshrl.u32 %v5199_v41, %v490_v32  ;;  %v499_v48 = vshrl.u32 %v5192_v47, %v490_v32  ;;  %v502_v52 = vshrl.u32 %v5197_v51, %v490_v32 }
 0x145   :  { %v505_v56 = vshrl.u32 %v5195_v55, %v490_v32  ;;  %v491_v57 = vshrl.u32 %v5204_v35, %v490_v32  ;;  %vm510_vm4 = vcmp.lt.s32.totalorder %v488_v27, 4  ;;  %vm509_vm5 = vcmp.lt.s32.totalorder %v488_v27, 3 }
 0x146   :  { %v494_v63 = vor.u32 %v493_v45, %v492_v36  ;;  %v497_v0 = vor.u32 %v496_v46, %v495_v39  ;;  %v500_v3 = vor.u32 %v499_v48, %v498_v42  ;;  %v503_v7 = vor.u32 %v502_v52, %v501_v49 }
 0x147   :  { %v506_v8 = vor.u32 %v505_v56, %v504_v53  ;;  %v2823_v49 = vadd.s32 4294967169, %v376_v13 }
 0x148   :  { %v3747_v5 = vpop.eup %3110  ;;  %v512_v10 = vsel %vm510_vm4, %v500_v3, 2102212464  ;;  %v515_v11 = vsel %vm507_vm2, %v494_v63, %v497_v0  ;;  %v516_v14 = vsel %vm510_vm4, %v503_v7, 920167782  ;;  %v519_v18 = vsel %vm507_vm2, %v497_v0, %v500_v3 }
 0x149   :  { %v285_v9 = vmul.f32 1.0614054, %v3747_v5  ;;  %v520_v20 = vsel %vm510_vm4, %v506_v8, 1326507024  ;;  %v3752_v21 = vpop.eup %3112  ;;  %v511_v24 = vsel %vm507_vm2, %v491_v57, %v494_v63  ;;  %v517_v26 = vsel %vm509_vm5, %v500_v3, %v516_v14 }
 0x14a   :  { %v521_v32 = vsel %vm509_vm5, %v503_v7, %v520_v20  ;;  %v513_v36 = vsel %vm509_vm5, %v497_v0, %v512_v10  ;;  %v518_v39 = vsel %vm508_vm3, %v515_v11, %v517_v26  ;;  %v284_v45 = vmul.f32 1.0614054, %v3752_v21 }
 0x14b   :  { %v289_v22 = vadd.f32 -1.4531521, %v285_v9  ;;  %v522_v42 = vsel %vm508_vm3, %v519_v18, %v521_v32  ;;  %v3764_v52 = vmul.u32.u64.low %v3733_v33, %v518_v39  ;;  %v3765_v53 = vmul.u32.u64.high %v3733_v33, %v518_v39, %v3764_v52 }
 0x14c   :  { %v3760_v46 = vmul.u32.u64.low %v3733_v33, %v522_v42  ;;  %v3761_v48 = vmul.u32.u64.high %v3733_v33, %v522_v42, %v3760_v46  ;;  %v288_v56 = vadd.f32 -1.4531521, %v284_v45  ;;  %v325_v63 = vmul.f32 %v321_v31, %v3721_v6 }
 0x14d   :  { %v293_v43 = vmul.f32 %v3747_v5, %v289_v22  ;;  %v382_v0 = vadd.s32 1, %v2823_v49  ;;  %v514_v3 = vsel %vm508_vm3, %v511_v24, %v513_v36  ;;  %v320_v8 = vsub.f32 0.0, %v3727_v12 }
 0x14e   :  { %v292_v7 = vmul.f32 %v3752_v21, %v288_v56  ;;  %v254_v9 = vrot.slane %v3730_v29, 1  ;;  %vm532_vm6 = vc.u32 %v3761_v48, %v3764_v52  ;;  %v533_v11 = vadd.s32 1, %v3765_v53 }
 0x14f   :  { %v297_v57 = vadd.f32 1.4214138, %v293_v43  ;;  %vm383_vm7 = vcmp.gt.s32.totalorder %v382_v0, 0  ;;  %v330_v14 = vmul.f32 1.442695, %v325_v63  ;;  %v530_v6 = vmul.u32 %v3733_v33, %v514_v3 }
 0x150   :  { %v384_v13 = vsel %vm383_vm7, %v382_v0, 0  ;;  %v534_v18 = vsel %vm532_vm6, %v533_v11, %v3765_v53  ;;  %v296_v20 = vadd.f32 1.4214138, %v292_v7  ;;  %v324_v22 = vmul.f32 %v320_v8, %v3727_v12 }
 0x151   :  { %v301_v10 = vmul.f32 %v3747_v5, %v297_v57  ;;  %v386_v27 = vand.u32 31, %v384_v13  ;;  %v255_v24 = vadd.f32 %v254_v9, %v3730_v29  ;;  %v535_v26 = vadd.s32 %v534_v18, %v530_v6 }
 0x152   :  { %v5191_v36 = vand.u32 2147483647, %v3699_v58  ;;  %v237_v39 = vrot.slane %v3706_v61, 4  ;;  %3114 = vpow2.f32 %v330_v14  ;;  %v300_v33 = vmul.f32 %v3752_v21, %v296_v20 }
 0x153   :  { %v305_v31 = vadd.f32 -0.28449672, %v301_v10  ;;  %v387_v32 = vsub.s32 32, %v386_v27  ;;  %v536_v42 = vadd.s32 536870912, %v535_v26  ;;  %v328_v43 = vmul.f32 1.442695, %v324_v22 }
 0x154   :  { %v3786_v49 = vmul.f32 0.1, %v255_v24  ;;  %v379_v56 = vand.u32 8388607, %v5191_v36  ;;  %v385_v57 = vshrl.u32 %v384_v13, 5  ;;  %v398_v0 = vshll.u32 %v5192_v47, %v386_v27 }
 0x155   :  { %v309_v45 = vmul.f32 %v3747_v5, %v305_v31  ;;  %v399_v46 = vshrl.u32 %v5197_v51, %v387_v32  ;;  %v3788_v12 = vshrl.u32 %v536_v42, 30  ;;  %v390_v29 = vshrl.u32 %v5202_v38, %v387_v32 }
 0x156   :  { %v393_v53 = vshrl.u32 %v5199_v41, %v387_v32  ;;  %v396_v63 = vshrl.u32 %v5192_v47, %v387_v32  ;;  %v389_v7 = vshll.u32 %v5204_v35, %v386_v27  ;;  %v392_v8 = vshll.u32 %v5202_v38, %v386_v27 }
 0x157   :  { %v538_v3 = vshll.u32 %v3788_v12, 30  ;;  %v402_v9 = vshrl.u32 %v5195_v55, %v387_v32  ;;  %v313_v10 = vadd.f32 0.2548296, %v309_v45  ;;  %v304_v11 = vadd.f32 -0.28449672, %v300_v33 }
 0x158   :  { %v395_v14 = vshll.u32 %v5199_v41, %v386_v27  ;;  %v400_v6 = vor.u32 %v399_v46, %v398_v0  ;;  %v391_v18 = vor.u32 %v390_v29, %v389_v7  ;;  %v394_v13 = vor.u32 %v393_v53, %v392_v8 }
 0x159   :  { %v539_v31 = vsub.s32 %v535_v26, %v538_v3  ;;  %v401_v20 = vshll.u32 %v5197_v51, %v386_v27  ;;  %v380_v22 = vor.u32 8388608, %v379_v56  ;;  %v238_v42 = vadd.f32 %v237_v39, %v3706_v61 }
 0x15a   :  { %v397_v24 = vor.u32 %v396_v63, %v395_v14  ;;  %vm407_vm8 = vcmp.lt.s32.totalorder %v385_v57, 4  ;;  %3116 = vpow2.f32 %v328_v43  ;;  %vm404_vm9 = vcmp.lt.s32.totalorder %v385_v57, 1 }
 0x15b   :  { %v541_v36 = vsub.s32 0, %v539_v31  ;;  %v403_v47 = vor.u32 %v402_v9, %v401_v20  ;;  %v413_v45 = vsel %vm407_vm8, %v400_v6, 920167782  ;;  %v3805_v33 = vmul.f32 0.70710677, %v3786_v49 }
 0x15c   :  { %v3115_v46 = vpop.eup %3114  ;;  %v317_v26 = vmul.f32 %v3747_v5, %v313_v10  ;;  %v308_v27 = vmul.f32 %v3752_v21, %v304_v11  ;;  %v412_v53 = vsel %vm404_vm9, %v391_v18, %v394_v13  ;;  %vm405_vm10 = vcmp.lt.s32.totalorder %v385_v57, 2 }
 0x15d   :  { %v2828_v29 = vmin.u32 %v541_v36, %v539_v31  ;;  %vm406_vm11 = vcmp.lt.s32.totalorder %v385_v57, 3  ;;  %v409_v61 = vsel %vm407_vm8, %v397_v24, 2102212464  ;;  %v420_v39 = vshll.u32 %v380_v22, 8 }
 0x15e   :  { %v414_v56 = vsel %vm406_vm11, %v397_v24, %v413_v45  ;;  %v416_v63 = vsel %vm404_vm9, %v394_v13, %v397_v24  ;;  %v417_v0 = vsel %vm407_vm8, %v403_v47, 1326507024  ;;  %v388_v3 = vshrl.u32 %v5204_v35, %v387_v32 }
 0x15f   :  { %v543_v43 = vclz %v2828_v29  ;;  %v415_v5 = vsel %vm405_vm10, %v412_v53, %v414_v56  ;;  %v418_v36 = vsel %vm406_vm11, %v400_v6, %v417_v0  ;;  %v3818_v7 = vand.u32 2147483647, %v3805_v33 }
 0x160   :  { %v337_v8 = vmul.f32 %v3115_v46, %v317_v26  ;;  %v312_v10 = vadd.f32 0.2548296, %v308_v27  ;;  %v419_v11 = vsel %vm405_vm10, %v416_v63, %v418_v36  ;;  %v408_v14 = vsel %vm404_vm9, %v388_v3, %v391_v18 }
 0x161   :  { %v2829_v9 = vadd.s32 4294967294, %v543_v43  ;;  %v410_v20 = vsel %vm406_vm11, %v394_v13, %v409_v61  ;;  %v3823_v22 = vmul.u32.u64.low %v420_v39, %v419_v11  ;;  %v3824_v47 = vmul.u32.u64.high %v420_v39, %v419_v11, %v3823_v22 }
 0x162   :  { %v3826_v32 = vmul.u32.u64.low %v420_v39, %v415_v5  ;;  %v3827_v24 = vmul.u32.u64.high %v420_v39, %v415_v5, %v3826_v32  ;;  %v531_v6 = vadd.s32 %v3764_v52, %v3761_v48  ;;  %v341_v46 = vsub.f32 1.0, %v337_v8 }
 0x163   :  { %vm2830_vm12 = vcmp.lt.s32.totalorder %v2829_v9, 0  ;;  %v411_v27 = vsel %vm405_vm10, %v408_v14, %v410_v20  ;;  %v239_v53 = vrot.slane %v238_v42, 2  ;;  %v316_v13 = vmul.f32 %v3752_v21, %v312_v10 }
 0x164   :  { %v546_v45 = vsel %vm2830_vm12, 0, %v2829_v9  ;;  %v3117_v18 = vpop.eup %3116  ;;  %vm429_vm13 = vc.u32 %v3824_v47, %v3826_v32  ;;  %v275_v61 = vmul.f32 0.3275911, %v3818_v7  ;;  %v430_v48 = vadd.s32 1, %v3827_v24 }
 0x165   :  { %v547_v26 = vsub.s32 32, %v546_v45  ;;  %v551_v29 = vsub.s32 4294967266, %v546_v45  ;;  %v548_v43 = vshll.u32 %v539_v31, %v546_v45  ;;  %v427_v52 = vmul.u32 %v420_v39, %v411_v27 }
 0x166   :  { %v684_v0 = vand.u32 2139095040, %v3786_v49  ;;  %v349_v3 = vsub.f32 0.0, %v341_v46  ;;  %v431_v36 = vsel %vm429_vm13, %v430_v48, %v3827_v24  ;;  %v240_v8 = vadd.f32 %v239_v53, %v238_v42 }
 0x167   :  { %v549_v56 = vshrl.u32 %v531_v6, %v547_v26  ;;  %v552_v63 = vadd.s32 127, %v551_v29  ;;  %v432_v21 = vadd.s32 %v431_v36, %v427_v52  ;;  %v561_v11 = vsub.s32 4, %v3788_v12 }
 0x168   :  { %v685_v9 = vshrl.u32 %v684_v0, 23  ;;  %v336_v14 = vmul.f32 %v3117_v18, %v316_v13  ;;  %v279_v31 = vadd.f32 1.0, %v275_v61  ;;  %v353_v39 = vsel %vm345_vm14, %v349_v3, %v341_v46 }
 0x169   :  { %v550_v57 = vor.u32 %v549_v56, %v548_v43  ;;  %v553_v5 = vshll.u32 %v552_v63, 23  ;;  %v433_v20 = vadd.s32 536870912, %v432_v21  ;;  %v241_v26 = vrot.slane %v240_v8, 1 }
 0x16a   :  { %v2835_v22 = vadd.s32 4294967169, %v685_v9  ;;  %v5194_v42 = vand.u32 2147483647, %v3786_v49  ;;  %v562_v18 = vsel %vm477_vm15, %v561_v11, %v3788_v12  ;;  %v340_v53 = vsub.f32 1.0, %v336_v14 }
 0x16b   :  { %v554_v10 = vor.u32 4788187, %v553_v5  ;;  %v557_v45 = vcvt.s32.f32 %v550_v57  ;;  %v3843_v29 = vshrl.u32 %v433_v20, 30  ;;  %3118 = vrcp.f32 %v279_v31 }
 0x16c   :  { %v691_v24 = vadd.s32 1, %v2835_v22  ;;  %v357_v1 = vadd.f32 1.0, %v353_v39  ;;  %v261_v13 = vmul.f32 0.5, %v3703_v60  ;;  %vm3853_vm2 = vcmp.le.f32.partialorder %v475_v2, 0.7853982 }
 0x16d   :  { %v555_v6 = vand.u32 2147483647, %v554_v10  ;;  %v435_v46 = vshll.u32 %v3843_v29, 30  ;;  %v564_v63 = vsel %vm3853_vm2, 0, %v562_v18  ;;  %v688_v48 = vand.u32 8388607, %v5194_v42 }
 0x16e   :  { %vm692_vm1 = vcmp.gt.s32.totalorder %v691_v24, 0  ;;  %v242_v0 = vadd.f32 %v241_v26, %v240_v8  ;;  %v348_v57 = vsub.f32 0.0, %v340_v53  ;;  %v3865_v2 = vmul.f32 %v357_v1, %v261_v13 }
 0x16f   :  { %v558_v27 = vmul.f32 %v557_v45, %v555_v6  ;;  %v693_v56 = vsel %vm692_vm1, %v691_v24, 0  ;;  %v3859_v12 = vsub.s32 %v432_v21, %v435_v46  ;;  %v3874_v21 = vadd.f32 -1.0, %v3703_v60 }
 0x170   :  { %v695_v52 = vand.u32 31, %v693_v56  ;;  %v3876_v10 = vand.u32 3, %v564_v63  ;;  %vm344_vm3 = vcmp.lt.f32.partialorder %v3718_v4, 0.0  ;;  %v689_v11 = vor.u32 8388608, %v688_v48 }
 0x171   :  { %v559_v43 = vxor.u32 2147483648, %v558_v27  ;;  %v438_v36 = vsub.s32 0, %v3859_v12  ;;  %v3880_v14 = vmul.f32 0.1, %v242_v0  ;;  %v789_v31 = vmax.f32 %v3703_v60, 0.0 }
 0x172   :  { %v3871_v9 = vsub.s32 32, %v695_v52  ;;  %v3883_v20 = vsel %vm344_vm3, %v348_v57, %v340_v53  ;;  %v369_v22 = vsub.f32 %v3874_v21, %v3865_v2  ;;  %v428_v39 = vadd.s32 %v3826_v32, %v3824_v47 }
 0x173   :  { %v560_v3 = vsel %vm477_vm15, %v559_v43, %v558_v27  ;;  %v2824_v8 = vmin.u32 %v438_v36, %v3859_v12  ;;  %vm573_vm4 = vcmp.eq.s32.totalorder %v3876_v10, 2  ;;  %v5225_v24 = vmov 2102212464  }
 0x174   :  { %v563_v5 = vsel %vm3853_vm2, %v3703_v60, %v560_v3  ;;  %v699_v45 = vshrl.u32 %v5202_v38, %v3871_v9  ;;  %v702_v26 = vshrl.u32 %v5199_v41, %v3871_v9  ;;  %v705_v27 = vshrl.u32 %v5225_v24, %v3871_v9 }
 0x175   :  { %3120 = vcosq.f32 %v563_v5  ;;  %v440_v6 = vclz %v2824_v8  ;;  %v3891_v4 = vpop.eup %3118  ;;  %v707_v18 = vshll.u32 %v5225_v24, %v695_v52  ;;  %v708_v53 = vshrl.u32 %v5197_v51, %v3871_v9 }
 0x176   :  { %3122 = vsinq.f32 %v563_v5  ;;  %vm570_vm5 = vcmp.eq.s32.totalorder %v3876_v10, 0  ;;  %v3902_v32 = vshrl.u32 %v693_v56, 5  ;;  %v698_v1 = vshll.u32 %v5204_v35, %v695_v52 }
 0x177   :  { %v2825_v47 = vadd.s32 4294967294, %v440_v6  ;;  %v3905_v46 = vshll.u32 %v689_v11, 8  ;;  %vm569_vm6 = vcmp.lt.s32.totalorder %v3876_v10, 2  ;;  %v701_v13 = vshll.u32 %v5202_v38, %v695_v52 }
 0x178   :  { %v704_v61 = vshll.u32 %v5199_v41, %v695_v52  ;;  %v709_v43 = vor.u32 %v708_v53, %v707_v18  ;;  %v711_v63 = vshrl.u32 %v5195_v55, %v3871_v9  ;;  %vm567_vm7 = vweird.f32 %v3703_v60 }
 0x179   :  { %vm2826_vm8 = vcmp.lt.s32.totalorder %v2825_v47, 0  ;;  %v287_v56 = vmul.f32 1.0614054, %v3891_v4  ;;  %v700_v48 = vor.u32 %v699_v45, %v698_v1  ;;  %v3915_v0 = vmul.f32 0.70710677, %v3880_v14 }
 0x17a   :  { %v443_v3 = vsel %vm2826_vm8, 0, %v2825_v47  ;;  %v703_v57 = vor.u32 %v702_v26, %v701_v13  ;;  %v706_v5 = vor.u32 %v705_v27, %v704_v61  ;;  %v710_v36 = vshll.u32 %v5197_v51, %v695_v52 }
 0x17b   :  { %v444_v8 = vsub.s32 32, %v443_v3  ;;  %v448_v11 = vsub.s32 4294967266, %v443_v3  ;;  %vm716_vm9 = vcmp.lt.s32.totalorder %v3902_v32, 4  ;;  %v581_v6 = vand.u32 2139095040, %v3880_v14 }
 0x17c   :  { %v712_v53 = vor.u32 %v711_v63, %v710_v36  ;;  %vm713_vm10 = vcmp.lt.s32.totalorder %v3902_v32, 1  ;;  %vm715_vm11 = vcmp.lt.s32.totalorder %v3902_v32, 3  ;;  %v722_v45 = vsel %vm716_vm9, %v709_v43, 920167782 }
 0x17d   :  { %v445_v27 = vshll.u32 %v3859_v12, %v443_v3  ;;  %v446_v52 = vshrl.u32 %v428_v39, %v444_v8  ;;  %v449_v1 = vadd.s32 127, %v448_v11  ;;  %v291_v61 = vadd.f32 -1.4531521, %v287_v56 }
 0x17e   :  { %v721_v42 = vsel %vm713_vm10, %v700_v48, %v703_v57  ;;  %v723_v63 = vsel %vm715_vm11, %v706_v5, %v722_v45  ;;  %v725_v41 = vsel %vm713_vm10, %v703_v57, %v706_v5  ;;  %vm714_vm12 = vcmp.lt.s32.totalorder %v3902_v32, 2 }
 0x17f   :  { %v3121_v18 = vpop.eup %3120  ;;  %v447_v55 = vor.u32 %v446_v52, %v445_v27  ;;  %v450_v51 = vshll.u32 %v449_v1, 23  ;;  %v718_v39 = vsel %vm716_vm9, %v706_v5, 2102212464  ;;  %v726_v56 = vsel %vm716_vm9, %v712_v53, 1326507024 }
 0x180   :  { %v3123_v47 = vpop.eup %3122  ;;  %v574_v26 = vxor.u32 2147483648, %v3121_v18  ;;  %v724_v11 = vsel %vm714_vm12, %v721_v42, %v723_v63  ;;  %v727_v45 = vsel %vm715_vm11, %v709_v43, %v726_v56  ;;  %v697_v5 = vshrl.u32 %v5204_v35, %v3871_v9 }
 0x181   :  { %v571_v13 = vxor.u32 2147483648, %v3123_v47  ;;  %v451_v8 = vor.u32 4788187, %v450_v51  ;;  %v728_v53 = vsel %vm714_vm12, %v725_v41, %v727_v45  ;;  %v323_v21 = vsub.f32 0.0, %v3818_v7 }
 0x182   :  { %v575_v36 = vsel %vm573_vm4, %v574_v26, %v3123_v47  ;;  %v454_v47 = vcvt.s32.f32 %v447_v55  ;;  %v3956_v42 = vmul.u32.u64.low %v3905_v46, %v728_v53  ;;  %v3957_v26 = vmul.u32.u64.high %v3905_v46, %v728_v53, %v3956_v42 }
 0x183   :  { %v572_v12 = vsel %vm570_vm5, %v3121_v18, %v571_v13  ;;  %v452_v10 = vand.u32 2147483647, %v451_v8  ;;  %v717_v43 = vsel %vm713_vm10, %v697_v5, %v700_v48  ;;  %v719_v55 = vsel %vm715_vm11, %v703_v57, %v718_v39 }
 0x184   :  { %v576_v3 = vsel %vm569_vm6, %v572_v12, %v575_v36  ;;  %v3964_v9 = vmul.u32.u64.low %v3905_v46, %v724_v11  ;;  %v3965_v27 = vmul.u32.u64.high %v3905_v46, %v724_v11, %v3964_v9  ;;  %v458_v52 = vsub.s32 4, %v3843_v29 }
 0x185   :  { %v577_v18 = vsel %vm567_vm7, nan, %v576_v3  ;;  %v455_v2 = vmul.f32 %v454_v47, %v452_v10  ;;  %v295_v48 = vmul.f32 %v3891_v4, %v291_v61  ;;  %v720_v13 = vsel %vm714_vm12, %v717_v43, %v719_v55 }
 0x186   :  { %v785_v51 = vadd.f32 %v577_v18, %v369_v22  ;;  %v582_v22 = vshrl.u32 %v581_v6, 23  ;;  %v3980_v63 = vand.u32 2147483647, %v3915_v0  ;;  %v356_v60 = vadd.f32 1.0, %v3883_v20 }
 0x187   :  { %v456_v1 = vxor.u32 2147483648, %v455_v2  ;;  %vm374_vm14 = vcmp.lt.s32.totalorder %v3699_v58, 0  ;;  %vm738_vm15 = vc.u32 %v3957_v26, %v3964_v9  ;;  %v327_v61 = vmul.f32 %v323_v21, %v3818_v7 }
 0x188   :  { %v3970_v41 = vsub.f32 %v785_v51, %v789_v31  ;;  %v5226_v31 = vand.u32 2147483647, %v3699_v58  ;;  %v739_v36 = vadd.s32 1, %v3965_v27  ;;  %v2831_v12 = vadd.s32 4294967169, %v582_v22 }
 0x189   :  { %v457_v32 = vsel %vm374_vm14, %v456_v1, %v455_v2  ;;  %v459_v20 = vsel %vm374_vm14, %v458_v52, %v3843_v29  ;;  %v299_v56 = vadd.f32 1.4214138, %v295_v48  ;;  %v736_v3 = vmul.u32 %v3905_v46, %v720_v13 }
 0x18a   :  { %v797_v57 = vmul.f32 %v3970_v41, %v3652_v16  ;;  %vm3985_vm13 = vcmp.le.f32.partialorder %v5226_v31, 0.7853982  ;;  %v740_v8 = vsel %vm738_vm15, %v739_v36, %v3965_v27  ;;  %v274_v11 = vmul.f32 0.3275911, %v3980_v63 }
 0x18b   :  { %v460_v39 = vsel %vm3985_vm13, %v3699_v58, %v457_v32  ;;  %v588_v45 = vadd.s32 1, %v2831_v12  ;;  %v741_v7 = vadd.s32 %v740_v8, %v736_v3  ;;  %v260_v18 = vmul.f32 0.5, %v3699_v58 }
 0x18c   :  { %2839 = vmatprep.mubr.msk.f32.mxu1 %vm220_vm0, %v797_v57  ;;  %3124 = vcosq.f32 %v460_v39  ;;  %v461_v29 = vsel %vm3985_vm13, 0, %v459_v20  ;;  %v303_v47 = vmul.f32 %v3891_v4, %v299_v56  ;;  %v334_v5 = vmul.f32 1.442695, %v327_v61 }
 0x18d   :  { %3126 = vsinq.f32 %v460_v39  ;;  %vm589_vm1 = vcmp.gt.s32.totalorder %v588_v45, 0  ;;  %v742_v53 = vadd.s32 536870912, %v741_v7  ;;  %v360_v46 = vmul.f32 %v356_v60, %v260_v18 }
 0x18e   :  { %v590_v51 = vsel %vm589_vm1, %v588_v45, 0  ;;  %v278_v10 = vadd.f32 1.0, %v274_v11  ;;  %v465_v43 = vand.u32 3, %v461_v29  ;;  %v5201_v27 = vand.u32 2147483647, %v3880_v14 }
 0x18f   :  { %v592_v42 = vand.u32 31, %v590_v51  ;;  %v4006_v55 = vshrl.u32 %v742_v53, 30  ;;  %v2819_v2 = vadd.f32 -1.0, %v3699_v58  ;;  %v307_v22 = vadd.f32 -0.28449672, %v303_v47 }
 0x190   :  { %3128 = vpow2.f32 %v334_v5  ;;  %vm464_vm2 = vweird.f32 %v3699_v58  ;;  %v788_v57 = vmax.f32 %v3699_v58, 0.0  ;;  %vm466_vm3 = vcmp.lt.s32.totalorder %v465_v43, 2 }
 0x191   :  { %v4010_v21 = vsub.s32 32, %v592_v42  ;;  %v744_v52 = vshll.u32 %v4006_v55, 30  ;;  %v368_v48 = vsub.f32 %v2819_v2, %v360_v46  ;;  %3130 = vrcp.f32 %v278_v10 }
 0x192   :  { %vm467_vm4 = vcmp.eq.s32.totalorder %v465_v43, 0  ;;  %v585_v13 = vand.u32 8388607, %v5201_v27  ;;  %vm470_vm5 = vcmp.eq.s32.totalorder %v465_v43, 2  ;;  %v5229_v6 = vmov 2131351028  }
 0x193   :  { %v4015_v1 = vsub.s32 %v741_v7, %v744_v52  ;;  %v596_v31 = vshrl.u32 %v5202_v38, %v4010_v21  ;;  %v599_v32 = vshrl.u32 %v5229_v6, %v4010_v21  ;;  %v5230_v61 = vmov 920167782  }
 0x194   :  { %v605_v36 = vshrl.u32 %v5230_v61, %v4010_v21  ;;  %v311_v39 = vmul.f32 %v3891_v4, %v307_v22  ;;  %v602_v3 = vshrl.u32 %v5225_v24, %v4010_v21  ;;  %v595_v11 = vshll.u32 %v5204_v35, %v592_v42 }
 0x195   :  { %v747_v56 = vsub.s32 0, %v4015_v1  ;;  %v598_v45 = vshll.u32 %v5202_v38, %v592_v42  ;;  %v604_v7 = vshll.u32 %v5225_v24, %v592_v42  ;;  %v4033_v47 = vshrl.u32 %v590_v51, 5 }
 0x196   :  { %v3125_v60 = vpop.eup %3124  ;;  %v601_v5 = vshll.u32 %v5229_v6, %v592_v42  ;;  %v597_v46 = vor.u32 %v596_v31, %v595_v11  ;;  %v5231_v38 = vmov 1326507024   ;;  %v586_v51 = vor.u32 8388608, %v585_v13 }
 0x197   :  { %v3127_v12 = vpop.eup %3126  ;;  %v471_v20 = vxor.u32 2147483648, %v3125_v60  ;;  %v2836_v29 = vmin.u32 %v747_v56, %v4015_v1  ;;  %v600_v10 = vor.u32 %v599_v32, %v598_v45  ;;  %v606_v2 = vor.u32 %v605_v36, %v604_v7 }
 0x198   :  { %v468_v8 = vxor.u32 2147483648, %v3127_v12  ;;  %v603_v27 = vor.u32 %v602_v3, %v601_v5  ;;  %v608_v35 = vshrl.u32 %v5231_v38, %v4010_v21  ;;  %v607_v56 = vshll.u32 %v5230_v61, %v592_v42 }
 0x199   :  { %v472_v18 = vsel %vm470_vm5, %v471_v20, %v3127_v12  ;;  %v749_v52 = vclz %v2836_v29  ;;  %v315_v20 = vadd.f32 0.2548296, %v311_v39  ;;  %vm610_vm6 = vcmp.lt.s32.totalorder %v4033_v47, 1 }
 0x19a   :  { %v469_v53 = vsel %vm467_vm4, %v3125_v60, %v468_v8  ;;  %v3129_v24 = vpop.eup %3128  ;;  %vm613_vm7 = vcmp.lt.s32.totalorder %v4033_v47, 4  ;;  %vm611_vm8 = vcmp.lt.s32.totalorder %v4033_v47, 2  ;;  %vm612_vm9 = vcmp.lt.s32.totalorder %v4033_v47, 3 }
 0x19b   :  { %v473_v22 = vsel %vm466_vm3, %v469_v53, %v472_v18  ;;  %v2837_v60 = vadd.s32 4294967294, %v749_v52  ;;  %v4045_v43 = vpop.eup %3130  ;;  %v618_v58 = vsel %vm610_vm6, %v597_v46, %v600_v10  ;;  %v619_v13 = vsel %vm613_vm7, %v606_v2, 920167782 }
 0x19c   :  { %v474_v12 = vsel %vm464_vm2, nan, %v473_v22  ;;  %v620_v31 = vsel %vm612_vm9, %v603_v27, %v619_v13  ;;  %v799_v32 = vmul.f32 %v3970_v41, %v3658_v19  ;;  %v319_v36 = vmul.f32 %v3891_v4, %v315_v20 }
 0x19d   :  { %v784_v6 = vadd.f32 %v474_v12, %v368_v48  ;;  %vm2838_vm10 = vcmp.lt.s32.totalorder %v2837_v60, 0  ;;  %v609_v48 = vor.u32 %v608_v35, %v607_v56  ;;  %v621_v3 = vsel %vm611_vm8, %v618_v58, %v620_v31 }
 0x19e   :  { %v752_v39 = vsel %vm2838_vm10, 0, %v2837_v60  ;;  %v737_v11 = vadd.s32 %v3964_v9, %v3957_v26  ;;  %v626_v35 = vshll.u32 %v586_v51, 8  ;;  %v5232_v7 = vmov 683565275  }
 0x19f   :  { %v792_v42 = vsub.f32 %v784_v6, %v788_v57  ;;  %v286_v57 = vmul.f32 1.0614054, %v4045_v43  ;;  %v753_v6 = vsub.s32 32, %v752_v39  ;;  %v757_v45 = vsub.s32 4294967266, %v752_v39 }
 0x1a0   :  { %v594_v18 = vshrl.u32 %v5232_v7, %v4010_v21  ;;  %v615_v4 = vsel %vm613_vm7, %v603_v27, 2102212464  ;;  %v622_v29 = vsel %vm610_vm6, %v600_v10, %v603_v27  ;;  %v623_v5 = vsel %vm613_vm7, %v609_v48, 1326507024 }
 0x1a1   :  { %v796_v8 = vmul.f32 %v792_v42, %v3650_v15  ;;  %v4072_v53 = vmul.u32.u64.low %v626_v35, %v621_v3  ;;  %v4073_v26 = vmul.u32.u64.high %v626_v35, %v621_v3, %v4072_v53  ;;  %v754_v9 = vshll.u32 %v4015_v1, %v752_v39 }
 0x1a2   :  { %v755_v22 = vshrl.u32 %v737_v11, %v753_v6  ;;  %v758_v21 = vadd.s32 127, %v757_v45  ;;  %v624_v52 = vsel %vm612_vm9, %v606_v2, %v623_v5  ;;  %v798_v12 = vmul.f32 %v792_v42, %v3654_v17 }
 0x1a3   :  { %921 = vmatmul.mubr.f32.vlgmr.msra.gmra.mrb[0].mxu1 %v796_v8  ;;  %v614_v27 = vsel %vm610_vm6, %v594_v18, %v597_v46  ;;  %v616_v20 = vsel %vm612_vm9, %v600_v10, %v615_v4  ;;  %v625_v51 = vsel %vm611_vm8, %v622_v29, %v624_v52  ;;  %v801_v56 = vmul.f32 %v3970_v41, %v3667_v25 }
 0x1a4   :  { %2840 = vmatprep.mubr.msk.f32.mxu1 %vm220_vm0, %v799_v32  ;;  %v756_v1 = vor.u32 %v755_v22, %v754_v9  ;;  %v759_v60 = vshll.u32 %v758_v21, 23  ;;  %v339_v58 = vmul.f32 %v3129_v24, %v319_v36  ;;  %v290_v46 = vadd.f32 -1.4531521, %v286_v57 }
 0x1a5   :  { %v4089_v13 = vmul.u32.u64.low %v626_v35, %v625_v51  ;;  %v4090_v2 = vmul.u32.u64.high %v626_v35, %v625_v51, %v4089_v13  ;;  %v617_v10 = vsel %vm611_vm8, %v614_v27, %v616_v20  ;;  %v636_v31 = vadd.s32 1, %v4073_v26 }
 0x1a6   :  { %v760_v48 = vor.u32 4788187, %v759_v60  ;;  %v800_v32 = vmul.f32 %v792_v42, %v3664_v23  ;;  %v803_v39 = vmul.f32 %v3970_v41, %v3674_v30  ;;  %v763_v8 = vcvt.s32.f32 %v756_v1 }
 0x1a7   :  { %926 = vmatmul.mubr.f32.gmra.mrb[2].mxu1 %v798_v12  ;;  %v633_v24 = vmul.u32 %v626_v35, %v617_v10  ;;  %vm635_vm11 = vc.u32 %v4090_v2, %v4072_v53  ;;  %v343_v36 = vsub.f32 1.0, %v339_v58  ;;  %v294_v47 = vmul.f32 %v4045_v43, %v290_v46 }
 0x1a8   :  { %2841 = vmatprep.mubr.msk.f32.mxu1 %vm220_vm0, %v801_v56  ;;  %v761_v3 = vand.u32 2147483647, %v760_v48  ;;  %v637_v57 = vsel %vm635_vm11, %v636_v31, %v4073_v26  ;;  %v802_v6 = vmul.f32 %v792_v42, %v3671_v28  ;;  %v5233_v41 = vand.u32 2147483647, %v3786_v49 }
 0x1a9   :  { %v638_v45 = vadd.s32 %v637_v57, %v633_v24  ;;  %vm683_vm13 = vcmp.lt.s32.totalorder %v3786_v49, 0  ;;  %v351_v29 = vsub.f32 0.0, %v343_v36  ;;  %v767_v9 = vsub.s32 4, %v4006_v55 }
 0x1aa   :  { %v764_v11 = vmul.f32 %v763_v8, %v761_v3  ;;  %vm4107_vm12 = vcmp.le.f32.partialorder %v5233_v41, 0.7853982  ;;  %v298_v22 = vadd.f32 1.4214138, %v294_v47  ;;  %v322_v21 = vsub.f32 0.0, %v3980_v63 }
 0x1ab   :  { %931 = vmatmul.mubr.f32.gmra.mrb[4].mxu1 %v800_v32  ;;  %v639_v4 = vadd.s32 536870912, %v638_v45  ;;  %vm347_vm14 = vcmp.lt.f32.partialorder %v3805_v33, 0.0  ;;  %v768_v27 = vsel %vm683_vm13, %v767_v9, %v4006_v55  ;;  %v263_v48 = vmul.f32 0.5, %v3786_v49 }
 0x1ac   :  { %2842 = vmatprep.mubr.msk.f32.mxu1 %vm220_vm0, %v803_v39  ;;  %v765_v18 = vxor.u32 2147483648, %v764_v11  ;;  %v355_v12 = vsel %vm347_vm14, %v351_v29, %v343_v36  ;;  %v302_v20 = vmul.f32 %v4045_v43, %v298_v22  ;;  %v326_v56 = vmul.f32 %v322_v21, %v3980_v63 }
 0x1ad   :  { %v4116_v26 = vshrl.u32 %v639_v4, 30  ;;  %v359_v1 = vadd.f32 1.0, %v355_v12  ;;  %v770_v60 = vsel %vm4107_vm12, 0, %v768_v27  ;;  %v2822_v8 = vadd.f32 -1.0, %v3786_v49 }
 0x1ae   :  { %v766_v5 = vsel %vm683_vm13, %v765_v18, %v764_v11  ;;  %v306_v13 = vadd.f32 -0.28449672, %v302_v20  ;;  %v774_v46 = vand.u32 3, %v770_v60  ;;  %v332_v10 = vmul.f32 1.442695, %v326_v56 }
 0x1af   :  { %936 = vmatmul.mubr.f32.gmra.mrb[6].mxu1 %v802_v6  ;;  %v769_v42 = vsel %vm4107_vm12, %v3786_v49, %v766_v5  ;;  %v641_v52 = vshll.u32 %v4116_v26, 30  ;;  %v363_v31 = vmul.f32 %v359_v1, %v263_v48  ;;  %vm773_vm15 = vweird.f32 %v3786_v49 }
 0x1b0   :  { %3132 = vcosq.f32 %v769_v42  ;;  %v310_v55 = vmul.f32 %v4045_v43, %v306_v13  ;;  %vm779_vm1 = vcmp.eq.s32.totalorder %v774_v46, 2  ;;  %vm776_vm2 = vcmp.eq.s32.totalorder %v774_v46, 0 }
 0x1b1   :  { %3134 = vsinq.f32 %v769_v42  ;;  %v642_v51 = vsub.s32 %v638_v45, %v641_v52  ;;  %v371_v11 = vsub.f32 %v2822_v8, %v363_v31  ;;  %vm775_vm4 = vcmp.lt.s32.totalorder %v774_v46, 2 }
 0x1b2   :  { %3136 = vpow2.f32 %v332_v10  ;;  %v314_v6 = vadd.f32 0.2548296, %v310_v55  ;;  %v634_v41 = vadd.s32 %v4072_v53, %v4090_v2  ;;  %v791_v5 = vmax.f32 %v3786_v49, 0.0 }
 0x1b3   :  { %v644_v58 = vsub.s32 0, %v642_v51  ;;  %vm580_vm5 = vcmp.lt.s32.totalorder %v3880_v14, 0  ;;  %vm346_vm7 = vcmp.lt.f32.partialorder %v3915_v0, 0.0  ;;  %v262_v8 = vmul.f32 0.5, %v3880_v14 }
 0x1b4   :  { %v318_v12 = vmul.f32 %v4045_v43, %v314_v6  ;;  %vm670_vm11 = vweird.f32 %v3880_v14  ;;  %vm961_vm12 = vcmask 80896   ;;  %vm1078_vm13 = vcmask 1041408  }
 0x1b5   :  { %v2832_v33 = vmin.u32 %v644_v58, %v642_v51  ;;  %vm3301_vm14 = vmmov 1  }
 0x1b7   :  { %v646_v32 = vclz %v2832_v33  ;;  %v664_v33 = vsub.s32 4, %v4116_v26 }
 0x1b9   :  { %v2833_v24 = vadd.s32 4294967294, %v646_v32  ;;  %v665_v31 = vsel %vm580_vm5, %v664_v33, %v4116_v26 }
 0x1ba   :  { %v3133_v39 = vpop.eup %3132 }
 0x1bb   :  { %v3135_v3 = vpop.eup %3134  ;;  %v780_v63 = vxor.u32 2147483648, %v3133_v39  ;;  %vm2834_vm3 = vcmp.lt.s32.totalorder %v2833_v24, 0 }
 0x1bc   :  { %v777_v36 = vxor.u32 2147483648, %v3135_v3  ;;  %v649_v45 = vsel %vm2834_vm3, 0, %v2833_v24  ;;  %v3137_v53 = vpop.eup %3136 }
 0x1bd   :  { %v781_v47 = vsel %vm779_vm1, %v780_v63, %v3135_v3  ;;  %v650_v35 = vsub.s32 32, %v649_v45  ;;  %v654_v4 = vsub.s32 4294967266, %v649_v45  ;;  %v651_v22 = vshll.u32 %v642_v51, %v649_v45 }
 0x1be   :  { %v778_v57 = vsel %vm776_vm2, %v3133_v39, %v777_v36  ;;  %v338_v2 = vmul.f32 %v3137_v53, %v318_v12  ;;  %v5236_v51 = vand.u32 2147483647, %v3880_v14 }
 0x1bf   :  { %v782_v18 = vsel %vm775_vm4, %v778_v57, %v781_v47  ;;  %v652_v42 = vshrl.u32 %v634_v41, %v650_v35  ;;  %v655_v21 = vadd.s32 127, %v654_v4  ;;  %v2821_v57 = vadd.f32 -1.0, %v3880_v14 }
 0x1c0   :  { %v783_v29 = vsel %vm773_vm15, nan, %v782_v18  ;;  %v342_v49 = vsub.f32 1.0, %v338_v2  ;;  %vm579_vm6 = vcmp.le.f32.partialorder %v5236_v51, 0.7853982  ;;  %v790_v35 = vmax.f32 %v3880_v14, 0.0  ;;  %vm4201_vm15 = vmpackc.low %vm1078_vm13, %vm3301_vm14 }
 0x1c1   :  { %v787_v9 = vadd.f32 %v783_v29, %v371_v11  ;;  %v653_v27 = vor.u32 %v652_v42, %v651_v22  ;;  %v656_v20 = vshll.u32 %v655_v21, 23  ;;  %v667_v39 = vsel %vm579_vm6, 0, %v665_v31 }
 0x1c2   :  { %v350_v10 = vsub.f32 0.0, %v342_v49  ;;  %v671_v3 = vand.u32 3, %v667_v39 }
 0x1c3   :  { %v795_v52 = vsub.f32 %v787_v9, %v791_v5  ;;  %v657_v1 = vor.u32 4788187, %v656_v20  ;;  %v660_v58 = vcvt.s32.f32 %v653_v27 }
 0x1c4   :  { %v354_v32 = vsel %vm346_vm7, %v350_v10, %v342_v49  ;;  %vm676_vm8 = vcmp.eq.s32.totalorder %v671_v3, 2  ;;  %vm673_vm9 = vcmp.eq.s32.totalorder %v671_v3, 0  ;;  %vm672_vm10 = vcmp.lt.s32.totalorder %v671_v3, 2 }
 0x1c5   :  { %v805_v56 = vmul.f32 %v795_v52, %v3680_v37  ;;  %v658_v60 = vand.u32 2147483647, %v657_v1  ;;  %v358_v55 = vadd.f32 1.0, %v354_v32  ;;  %v807_v5 = vmul.f32 %v795_v52, %v3686_v44 }
 0x1c6   :  { %v809_v22 = vmul.f32 %v795_v52, %v3695_v54  ;;  %v811_v21 = vmul.f32 %v795_v52, %v3708_v62 }
 0x1c7   :  { %2843 = vmatprep.mubr.msk.f32.mxu1 %vm220_vm0, %v805_v56  ;;  %v661_v13 = vmul.f32 %v660_v58, %v658_v60  ;;  %v362_v36 = vmul.f32 %v358_v55, %v262_v8 }
 0x1c9   :  { %v662_v48 = vxor.u32 2147483648, %v661_v13  ;;  %v370_v45 = vsub.f32 %v2821_v57, %v362_v36  ;;  %v1050_v36 = vld [vmem:[%s5188_s2] sm:$0xff]  ;;  %v1052_v57 = vld [vmem:[%s5188_s2 + $0x10] sm:$0x3] }
 0x1cb   :  { %v663_v43 = vsel %vm580_vm5, %v662_v48, %v661_v13 }
 0x1cc   :  { %v666_v46 = vsel %vm579_vm6, %v3880_v14, %v663_v43 }
 0x1cd   :  { %3138 = vcosq.f32 %v666_v46 }
 0x1ce   :  { %3140 = vsinq.f32 %v666_v46 }
 0x1d7   :  { %v3139_v63 = vpop.eup %3138 }
 0x1d8   :  { %v3141_v24 = vpop.eup %3140  ;;  %v677_v11 = vxor.u32 2147483648, %v3139_v63 }
 0x1d9   :  { %v674_v47 = vxor.u32 2147483648, %v3141_v24 }
 0x1da   :  { %v678_v6 = vsel %vm676_vm8, %v677_v11, %v3141_v24  ;;  %v1053_v24 = vld [vmem:[%s5188_s2 + $0x18] sm:$0x3] }
 0x1db   :  { %v675_v26 = vsel %vm673_vm9, %v3139_v63, %v674_v47  ;;  %v1051_v63 = vld [vmem:[%s5188_s2 + $0x8] sm:$0xff]  ;;  %s3304_s2 = smov [#allocation2]  }
 0x1dc   :  { %v679_v0 = vsel %vm672_vm10, %v675_v26, %v678_v6  ;;  %v3009_v11 = vpack.c.bf16 %v1053_v24, %v1051_v63  ;;  %v4208_v6 = vpack.c.bf16 %v1052_v57, %v1050_v36  ;;  %s2811_s9 = sshll.u32 %s3304_s2, 4  ;;  %s2812_s9 = int_to_ptr.vmem [resolvable:$true] %s2811_s9 }
 0x1dd   :  { %v680_v18 = vsel %vm670_vm11, nan, %v679_v0  ;;  %s3270_s10 = scalar_lea.vmem %s2812_s9, 64  ;;  %p3275_p1 = scmp.lt.s32.totalorder %s2812_s9, %s2812_s9 }
 0x1de   :  { %v786_v41 = vadd.f32 %v680_v18, %v370_v45  ;;  %3011 = vmatprep.subr.msk.bf16.mxu1 %vm4201_vm15, %v3009_v11  ;;  %p3271_p0 = scmp.ne.s32.totalorder %s2812_s9, %s3270_s10  ;;  %p3276_p2 = scmp.lt.s32.totalorder %s3270_s10, %s3270_s10 }
 0x1df   :  { %3014 = vmatpush1.bf16.msk.msra.mxu1 %vm4201_vm15, %v4208_v6 }
 0x1e0   :  { %v794_v4 = vsub.f32 %v786_v41, %v790_v35  ;;  %3047 = vmatprep.subr.msk.bf16.mxu1 %vm4201_vm15, %v3009_v11  ;;  %p3277_p3 = por %p3276_p2, %p3275_p1 }
 0x1e2   :  { %v804_v29 = vmul.f32 %v794_v4, %v3678_v34  ;;  %v806_v9 = vmul.f32 %v794_v4, %v3682_v40  ;;  %v808_v42 = vmul.f32 %v794_v4, %v3692_v50  ;;  %v810_v14 = vmul.f32 %v794_v4, %v3701_v59  ;;  %p3278_p4 = pnand %p3277_p3, %p3271_p0 }
 0x1e4   :  { %941 = vmatmul.mubr.f32.gmra.mrb[8].mxu1 %v804_v29 }
 0x1e5   :  { %2844 = vmatprep.mubr.msk.f32.mxu1 %vm220_vm0, %v807_v5 }
 0x1e8   :  { %946 = vmatmul.mubr.f32.gmra.mrb[10].mxu1 %v806_v9 }
 0x1e9   :  { %2845 = vmatprep.mubr.msk.f32.mxu1 %vm220_vm0, %v809_v22 }
 0x1ec   :  { %951 = vmatmul.mubr.f32.gmra.mrb[12].mxu1 %v808_v42 }
 0x1ed   :  { %2846 = vmatprep.mubr.msk.f32.mxu1 %vm220_vm0, %v811_v21 }
 0x1f0   :  { %956 = vmatmul.mubr.f32.gmra.mrb[14].mxu1 %v810_v14 }
 0x276   :  { %v4159_v12 = vpop.f32.mrb[0].mxu1 }
 0x277   :  { %v924_v27 = vpop.f32.mrb[1].mxu1  ;;  %v962_v20 = vsel %vm961_vm12, %v4159_v12, -inf }
 0x278   :  { %963 = vmax.xlane.f32.xlu0 %v962_v20 }
 0x27a   :  { %v4163_v56 = vpop.f32.mrb[2].mxu1 }
 0x27b   :  { %v929_v1 = vpop.f32.mrb[3].mxu1  ;;  %v965_v52 = vsel %vm961_vm12, %v4163_v56, -inf }
 0x27c   :  { %966 = vmax.xlane.f32.xlu0 %v965_v52 }
 0x27e   :  { %v4167_v53 = vpop.f32.mrb[4].mxu1 }
 0x27f   :  { %v934_v2 = vpop.f32.mrb[5].mxu1  ;;  %v968_v60 = vsel %vm961_vm12, %v4167_v53, -inf }
 0x280   :  { %969 = vmax.xlane.f32.xlu1 %v968_v60 }
 0x282   :  { %v4171_v58 = vpop.f32.mrb[6].mxu1 }
 0x283   :  { %5237 = vst [vmem:[#allocation7_spill] sm:$0xff] %v4171_v58  ;;  %v939_v13 = vpop.f32.mrb[7].mxu1  ;;  %v971_v49 = vsel %vm961_vm12, %v4171_v58, -inf }
 0x284   :  { %972 = vmax.xlane.f32.xlu1 %v971_v49  ;;  %v5208_v13 = vmov 0.0  }
 0x285   :  { %1149 = vmatprep.mubr.f32.mxu1 %v5208_v13 }
 0x2b7   :  { %v4175_v48 = vpop.f32.mrb[8].mxu1 }
 0x2b8   :  { %5238 = vst [vmem:[#allocation8_spill] sm:$0xff] %v4175_v48  ;;  %v944_v51 = vpop.f32.mrb[9].mxu1  ;;  %v974_v43 = vsel %vm961_vm12, %v4175_v48, -inf }
 0x2b9   :  { %975 = vmax.xlane.f32.xlu0 %v974_v43 }
 0x2bb   :  { %v4179_v33 = vpop.f32.mrb[10].mxu1 }
 0x2bc   :  { %5239 = vst [vmem:[#allocation9_spill] sm:$0xff] %v4179_v33  ;;  %v949_v46 = vpop.f32.mrb[11].mxu1  ;;  %v977_v10 = vsel %vm961_vm12, %v4179_v33, -inf }
 0x2bd   :  { %978 = vmax.xlane.f32.xlu1 %v977_v10 }
 0x2bf   :  { %v4183_v31 = vpop.f32.mrb[12].mxu1 }
 0x2c0   :  { %5240 = vst [vmem:[#allocation10_spill] sm:$0xff] %v4183_v31  ;;  %v954_v32 = vpop.f32.mrb[13].mxu1  ;;  %v980_v39 = vsel %vm961_vm12, %v4183_v31, -inf }
 0x2c1   :  { %981 = vmax.xlane.f32.xlu0 %v980_v39 }
 0x2c3   :  { %v4187_v55 = vpop.f32.mrb[14].mxu1 }
 0x2c4   :  { %5241 = vst [vmem:[#allocation11_spill] sm:$0xff] %v4187_v55  ;;  %v959_v3 = vpop.f32.mrb[15].mxu1  ;;  %v983_v8 = vsel %vm961_vm12, %v4187_v55, -inf }
 0x2c5   :  { %984 = vmax.xlane.f32.xlu1 %v983_v8 }
 0x305   :  { %v964_v26 = vpop.xlane.xlu0 %963 }
 0x306   :  { %v986_v45 = vsub.f32 %v4159_v12, %v964_v26 }
 0x308   :  { %v994_v0 = vmul.f32 1.442695, %v986_v45 }
 0x309   :  { %v967_v18 = vpop.xlane.xlu0 %966 }
 0x30a   :  { %3142 = vpow2.f32 %v994_v0  ;;  %v987_v41 = vsub.f32 %v4163_v56, %v967_v18 }
 0x30c   :  { %v996_v35 = vmul.f32 1.442695, %v987_v41 }
 0x30d   :  { %v970_v4 = vpop.xlane.xlu1 %969 }
 0x30e   :  { %3144 = vpow2.f32 %v996_v35  ;;  %v988_v29 = vsub.f32 %v4167_v53, %v970_v4 }
 0x310   :  { %v998_v5 = vmul.f32 1.442695, %v988_v29 }
 0x311   :  { %v973_v9 = vpop.xlane.xlu1 %972 }
 0x312   :  { %3146 = vpow2.f32 %v998_v5  ;;  %v989_v22 = vsub.f32 %v4171_v58, %v973_v9 }
 0x314   :  { %v3143_v42 = vpop.eup %3142  ;;  %v1000_v21 = vmul.f32 1.442695, %v989_v22 }
 0x315   :  { %v1010_v14 = vsel %vm961_vm12, %v3143_v42, 0.0 }
 0x316   :  { %3148 = vpow2.f32 %v1000_v21  ;;  %1011 = vadd.xlane.f32.xlu0 %v1010_v14 }
 0x318   :  { %v3145_v27 = vpop.eup %3144 }
 0x319   :  { %v1013_v20 = vsel %vm961_vm12, %v3145_v27, 0.0 }
 0x31a   :  { %1014 = vadd.xlane.f32.xlu1 %v1013_v20 }
 0x31c   :  { %v3147_v1 = vpop.eup %3146 }
 0x31d   :  { %v1016_v52 = vsel %vm961_vm12, %v3147_v1, 0.0 }
 0x31e   :  { %1017 = vadd.xlane.f32.xlu0 %v1016_v52 }
 0x320   :  { %v3149_v2 = vpop.eup %3148 }
 0x321   :  { %v1019_v60 = vsel %vm961_vm12, %v3149_v2, 0.0 }
 0x322   :  { %1020 = vadd.xlane.f32.xlu1 %v1019_v60 }
 0x346   :  { %v976_v49 = vpop.xlane.xlu0 %975 }
 0x347   :  { %v990_v51 = vsub.f32 %v4175_v48, %v976_v49 }
 0x349   :  { %v1002_v43 = vmul.f32 1.442695, %v990_v51 }
 0x34a   :  { %v979_v46 = vpop.xlane.xlu1 %978 }
 0x34b   :  { %3150 = vpow2.f32 %v1002_v43  ;;  %v991_v10 = vsub.f32 %v4179_v33, %v979_v46 }
 0x34d   :  { %v1004_v32 = vmul.f32 1.442695, %v991_v10 }
 0x34e   :  { %v982_v39 = vpop.xlane.xlu0 %981 }
 0x34f   :  { %3152 = vpow2.f32 %v1004_v32  ;;  %v992_v3 = vsub.f32 %v4183_v31, %v982_v39 }
 0x351   :  { %v1006_v8 = vmul.f32 1.442695, %v992_v3 }
 0x352   :  { %v985_v63 = vpop.xlane.xlu1 %984 }
 0x353   :  { %3154 = vpow2.f32 %v1006_v8  ;;  %v993_v24 = vsub.f32 %v4187_v55, %v985_v63 }
 0x355   :  { %v3151_v36 = vpop.eup %3150  ;;  %v1008_v11 = vmul.f32 1.442695, %v993_v24 }
 0x356   :  { %v1022_v57 = vsel %vm961_vm12, %v3151_v36, 0.0 }
 0x357   :  { %3156 = vpow2.f32 %v1008_v11  ;;  %1023 = vadd.xlane.f32.xlu0 %v1022_v57 }
 0x359   :  { %v3153_v26 = vpop.eup %3152 }
 0x35a   :  { %v1025_v45 = vsel %vm961_vm12, %v3153_v26, 0.0 }
 0x35b   :  { %1026 = vadd.xlane.f32.xlu1 %v1025_v45 }
 0x35d   :  { %v3155_v0 = vpop.eup %3154 }
 0x35e   :  { %v1028_v18 = vsel %vm961_vm12, %v3155_v0, 0.0 }
 0x35f   :  { %1029 = vadd.xlane.f32.xlu0 %v1028_v18 }
 0x361   :  { %v3157_v41 = vpop.eup %3156 }
 0x362   :  { %v1031_v35 = vsel %vm961_vm12, %v3157_v41, 0.0 }
 0x363   :  { %1032 = vadd.xlane.f32.xlu1 %v1031_v35 }
 0x3a3   :  { %v1012_v4 = vpop.xlane.xlu0 %1011 }
 0x3a4   :  { %3158 = vrcp.f32 %v1012_v4 }
 0x3a7   :  { %v1015_v29 = vpop.xlane.xlu1 %1014 }
 0x3a8   :  { %3160 = vrcp.f32 %v1015_v29 }
 0x3ab   :  { %v1018_v5 = vpop.xlane.xlu0 %1017 }
 0x3ac   :  { %3162 = vrcp.f32 %v1018_v5 }
 0x3ae   :  { %v3159_v9 = vpop.eup %3158 }
 0x3af   :  { %v1042_v22 = vmul.f32 %v3159_v9, %v3143_v42  ;;  %v1021_v21 = vpop.xlane.xlu1 %1020 }
 0x3b0   :  { %3164 = vrcp.f32 %v1021_v21 }
 0x3b1   :  { %2849 = vmatmul.mubr.msk.f32.vlgmr.msra.gmra.mrb[16].mxu1 %vm961_vm12, %v1042_v22 }
 0x3b2   :  { %v3161_v14 = vpop.eup %3160  ;;  %1155 = vmatprep.mubr.f32.mxu1 %v5208_v13  ;;  %3050 = vmatpush1.bf16.msk.msra.mxu1 %vm4201_vm15, %v4208_v6 }
 0x3b3   :  { %v1043_v20 = vmul.f32 %v3161_v14, %v3145_v27 }
 0x3b5   :  { %2850 = vmatmul.mubr.msk.f32.gmra.mrb[18].mxu1 %vm961_vm12, %v1043_v20 }
 0x3b6   :  { %v3163_v52 = vpop.eup %3162  ;;  %1161 = vmatprep.mubr.f32.mxu1 %v5208_v13 }
 0x3b7   :  { %v1044_v60 = vmul.f32 %v3163_v52, %v3147_v1 }
 0x3b9   :  { %2851 = vmatmul.mubr.msk.f32.gmra.mrb[20].mxu1 %vm961_vm12, %v1044_v60 }
 0x3ba   :  { %v3165_v42 = vpop.eup %3164  ;;  %1167 = vmatprep.mubr.f32.mxu1 %v5208_v13 }
 0x3bb   :  { %v1045_v49 = vmul.f32 %v3165_v42, %v3149_v2 }
 0x3bd   :  { %2852 = vmatmul.mubr.msk.f32.gmra.mrb[22].mxu1 %vm961_vm12, %v1045_v49 }
 0x3be   :  { %1173 = vmatprep.mubr.f32.mxu1 %v5208_v13 }
 0x3e4   :  { %v1024_v51 = vpop.xlane.xlu0 %1023 }
 0x3e5   :  { %3166 = vrcp.f32 %v1024_v51 }
 0x3e8   :  { %v1027_v47 = vpop.xlane.xlu1 %1026 }
 0x3e9   :  { %3168 = vrcp.f32 %v1027_v47 }
 0x3ec   :  { %v1030_v6 = vpop.xlane.xlu0 %1029 }
 0x3ed   :  { %3170 = vrcp.f32 %v1030_v6 }
 0x3ef   :  { %v3167_v27 = vpop.eup %3166 }
 0x3f0   :  { %v1033_v43 = vpop.xlane.xlu1 %1032  ;;  %v1046_v46 = vmul.f32 %v3167_v27, %v3151_v36 }
 0x3f1   :  { %3172 = vrcp.f32 %v1033_v43 }
 0x3f2   :  { %2853 = vmatmul.mubr.msk.f32.gmra.mrb[24].mxu1 %vm961_vm12, %v1046_v46 }
 0x3f3   :  { %v3169_v1 = vpop.eup %3168  ;;  %1179 = vmatprep.mubr.f32.mxu1 %v5208_v13 }
 0x3f4   :  { %v1047_v2 = vmul.f32 %v3169_v1, %v3153_v26 }
 0x3f6   :  { %2854 = vmatmul.mubr.msk.f32.gmra.mrb[26].mxu1 %vm961_vm12, %v1047_v2 }
 0x3f7   :  { %v3171_v10 = vpop.eup %3170  ;;  %1185 = vmatprep.mubr.f32.mxu1 %v5208_v13 }
 0x3f8   :  { %v1048_v32 = vmul.f32 %v3171_v10, %v3155_v0 }
 0x3fa   :  { %2855 = vmatmul.mubr.msk.f32.gmra.mrb[28].mxu1 %vm961_vm12, %v1048_v32 }
 0x3fb   :  { %v3173_v39 = vpop.eup %3172  ;;  %1191 = vmatprep.mubr.f32.mxu1 %v5208_v13 }
 0x3fc   :  { %v1049_v3 = vmul.f32 %v3173_v39, %v3157_v41 }
 0x3fe   :  { %2856 = vmatmul.mubr.msk.f32.gmra.mrb[30].mxu1 %vm961_vm12, %v1049_v3 }
 0x3ff   :  { %2123 = vmatprep.mubr.f32.mxu1 %v5208_v13 }
 0x484   :  { %v1151_v8 = vpop.f32.mrb[16].mxu1 }
 0x485   :  { %v1198_v63 = vmul.f32 %v1151_v8, %v3650_v15  ;;  %v1153_v24 = vpop.f32.mrb[17].mxu1 }
 0x486   :  { %v1199_v36 = vmul.f32 %v1153_v24, %v3652_v16 }
 0x488   :  { %v1157_v11 = vpop.f32.mrb[18].mxu1  ;;  %v1223_v18 = vsel %vm220_vm0, %v1199_v36, 0.0 }
 0x489   :  { %v1200_v57 = vmul.f32 %v1157_v11, %v3654_v17  ;;  %v1159_v26 = vpop.f32.mrb[19].mxu1 }
 0x48a   :  { %v1201_v45 = vmul.f32 %v1159_v26, %v3658_v19 }
 0x48b   :  { %v1214_v0 = vadd.f32 %v1200_v57, %v1198_v63 }
 0x48c   :  { %v1224_v41 = vsel %vm220_vm0, %v1201_v45, 0.0  ;;  %v1163_v35 = vpop.f32.mrb[20].mxu1 }
 0x48d   :  { %v1225_v4 = vadd.f32 %v1224_v41, %v1223_v18  ;;  %v1202_v29 = vmul.f32 %v1163_v35, %v3664_v23  ;;  %v1165_v5 = vpop.f32.mrb[21].mxu1 }
 0x48e   :  { %v1203_v9 = vmul.f32 %v1165_v5, %v3667_v25 }
 0x48f   :  { %v1215_v22 = vadd.f32 %v1214_v0, %v1202_v29 }
 0x490   :  { %v1226_v21 = vsel %vm220_vm0, %v1203_v9, 0.0  ;;  %v1169_v14 = vpop.f32.mrb[22].mxu1 }
 0x491   :  { %v1227_v20 = vadd.f32 %v1226_v21, %v1225_v4  ;;  %v1204_v52 = vmul.f32 %v1169_v14, %v3671_v28  ;;  %v1171_v60 = vpop.f32.mrb[23].mxu1 }
 0x492   :  { %v1205_v42 = vmul.f32 %v1171_v60, %v3674_v30 }
 0x493   :  { %v1216_v49 = vadd.f32 %v1215_v22, %v1204_v52 }
 0x494   :  { %v1228_v51 = vsel %vm220_vm0, %v1205_v42, 0.0 }
 0x495   :  { %v1217_v47 = vrot.slane %v1216_v49, 4  ;;  %v1229_v6 = vadd.f32 %v1228_v51, %v1227_v20 }
 0x497   :  { %v1218_v27 = vadd.f32 %v1217_v47, %v1216_v49  ;;  %v1230_v43 = vrot.slane %v1229_v6, 4 }
 0x499   :  { %v1219_v46 = vrot.slane %v1218_v27, 2  ;;  %v1231_v1 = vadd.f32 %v1230_v43, %v1229_v6 }
 0x49b   :  { %v1220_v2 = vadd.f32 %v1219_v46, %v1218_v27  ;;  %v1232_v10 = vrot.slane %v1231_v1, 2 }
 0x49d   :  { %v1221_v32 = vrot.slane %v1220_v2, 1  ;;  %v1233_v39 = vadd.f32 %v1232_v10, %v1231_v1 }
 0x49f   :  { %v4265_v3 = vadd.f32 %v1221_v32, %v1220_v2  ;;  %v1234_v8 = vrot.slane %v1233_v39, 1  ;;  %v5244_v32 = vmov 2475754826  }
 0x4a1   :  { %v1373_v63 = vand.u32 2139095040, %v4265_v3  ;;  %v4268_v24 = vadd.f32 %v1234_v8, %v1233_v39  ;;  %v4276_v45 = vmul.f32 0.70710677, %v4265_v3  ;;  %v5245_v8 = vmov 2131351028  }
 0x4a3   :  { %v1374_v36 = vshrl.u32 %v1373_v63, 23  ;;  %v1476_v11 = vand.u32 2139095040, %v4268_v24  ;;  %v4272_v57 = vmul.f32 0.70710677, %v4268_v24  ;;  %v5210_v26 = vand.u32 2147483647, %v4268_v24 }
 0x4a4   :  { %v4282_v22 = vand.u32 2147483647, %v4276_v45 }
 0x4a5   :  { %v2861_v0 = vadd.s32 4294967169, %v1374_v36  ;;  %v1477_v18 = vshrl.u32 %v1476_v11, 23  ;;  %v1267_v41 = vand.u32 2147483647, %v4272_v57  ;;  %v1480_v35 = vand.u32 8388607, %v5210_v26 }
 0x4a6   :  { %v1270_v52 = vmul.f32 0.3275911, %v4282_v22  ;;  %vm1343_vm14 = vcmp.lt.f32.partialorder %v4272_v57, 0.0 }
 0x4a7   :  { %v1380_v4 = vadd.s32 1, %v2861_v0  ;;  %v2865_v29 = vadd.s32 4294967169, %v1477_v18  ;;  %v1271_v5 = vmul.f32 0.3275911, %v1267_v41  ;;  %v1319_v9 = vsub.f32 0.0, %v1267_v41 }
 0x4a8   :  { %v1481_v42 = vor.u32 8388608, %v1480_v35  ;;  %v1274_v47 = vadd.f32 1.0, %v1270_v52  ;;  %v5246_v18 = vmov 2102212464  }
 0x4a9   :  { %vm1381_vm1 = vcmp.gt.s32.totalorder %v1380_v4, 0  ;;  %v1275_v21 = vadd.f32 1.0, %v1271_v5  ;;  %v1483_v14 = vadd.s32 1, %v2865_v29  ;;  %v1323_v60 = vmul.f32 %v1319_v9, %v1267_v41 }
 0x4aa   :  { %v1382_v20 = vsel %vm1381_vm1, %v1380_v4, 0  ;;  %v4287_v1 = vshll.u32 %v1481_v42, 8 }
 0x4ab   :  { %3174 = vrcp.f32 %v1275_v21  ;;  %vm1484_vm2 = vcmp.gt.s32.totalorder %v1483_v14, 0  ;;  %v4285_v49 = vand.u32 31, %v1382_v20  ;;  %v1328_v43 = vmul.f32 1.442695, %v1323_v60 }
 0x4ac   :  { %v1485_v51 = vsel %vm1484_vm2, %v1483_v14, 0  ;;  %3176 = vrcp.f32 %v1274_v47 }
 0x4ad   :  { %v1487_v6 = vand.u32 31, %v1485_v51  ;;  %v1486_v27 = vshrl.u32 %v1485_v51, 5  ;;  %v4294_v36 = vsub.s32 32, %v4285_v49  ;;  %3178 = vpow2.f32 %v1328_v43 }
 0x4af   :  { %v1488_v46 = vsub.s32 32, %v1487_v6  ;;  %v1490_v10 = vshll.u32 %v5232_v7, %v1487_v6  ;;  %v1493_v39 = vshll.u32 %v5244_v32, %v1487_v6  ;;  %v1496_v63 = vshll.u32 %v5245_v8, %v1487_v6 }
 0x4b0   :  { %v1499_v35 = vshll.u32 %v5246_v18, %v1487_v6  ;;  %v1502_v29 = vshll.u32 %v5230_v61, %v1487_v6  ;;  %vm1505_vm3 = vcmp.lt.s32.totalorder %v1486_v27, 1  ;;  %vm1506_vm4 = vcmp.lt.s32.totalorder %v1486_v27, 2 }
 0x4b1   :  { %v1491_v11 = vshrl.u32 %v5244_v32, %v1488_v46  ;;  %v1494_v0 = vshrl.u32 %v5245_v8, %v1488_v46  ;;  %v1497_v41 = vshrl.u32 %v5246_v18, %v1488_v46  ;;  %v1500_v4 = vshrl.u32 %v5230_v61, %v1488_v46 }
 0x4b2   :  { %v1503_v5 = vshrl.u32 %v5231_v38, %v1488_v46  ;;  %v1489_v52 = vshrl.u32 %v5232_v7, %v1488_v46  ;;  %vm1508_vm5 = vcmp.lt.s32.totalorder %v1486_v27, 4  ;;  %vm1507_vm6 = vcmp.lt.s32.totalorder %v1486_v27, 3 }
 0x4b3   :  { %v1492_v9 = vor.u32 %v1491_v11, %v1490_v10  ;;  %v1495_v21 = vor.u32 %v1494_v0, %v1493_v39  ;;  %v1498_v14 = vor.u32 %v1497_v41, %v1496_v63  ;;  %v1501_v60 = vor.u32 %v1500_v4, %v1499_v35 }
 0x4b4   :  { %v1504_v42 = vor.u32 %v1503_v5, %v1502_v29  ;;  %v1394_v27 = vshrl.u32 %v5246_v18, %v4294_v36 }
 0x4b5   :  { %v4304_v51 = vpop.eup %3174  ;;  %v1510_v47 = vsel %vm1508_vm5, %v1498_v14, 2102212464  ;;  %v1513_v13 = vsel %vm1505_vm3, %v1492_v9, %v1495_v21  ;;  %v1517_v6 = vsel %vm1505_vm3, %v1495_v21, %v1498_v14  ;;  %v1514_v2 = vsel %vm1508_vm5, %v1501_v60, 920167782 }
 0x4b6   :  { %v1283_v26 = vmul.f32 1.0614054, %v4304_v51  ;;  %v1518_v10 = vsel %vm1508_vm5, %v1504_v42, 1326507024  ;;  %v1509_v39 = vsel %vm1505_vm3, %v1489_v52, %v1492_v9  ;;  %v1511_v63 = vsel %vm1507_vm6, %v1495_v21, %v1510_v47  ;;  %v4310_v0 = vpop.eup %3176 }
 0x4b7   :  { %v1515_v11 = vsel %vm1507_vm6, %v1498_v14, %v1514_v2  ;;  %v1519_v46 = vsel %vm1507_vm6, %v1501_v60, %v1518_v10  ;;  %v1512_v2 = vsel %vm1506_vm4, %v1509_v39, %v1511_v63  ;;  %v1282_v21 = vmul.f32 1.0614054, %v4310_v0 }
 0x4b8   :  { %v1287_v41 = vadd.f32 -1.4531521, %v1283_v26  ;;  %v1516_v35 = vsel %vm1506_vm4, %v1513_v13, %v1515_v11  ;;  %v1520_v4 = vsel %vm1506_vm4, %v1517_v6, %v1519_v46  ;;  %v5247_v26 = vand.u32 2147483647, %v4265_v3 }
 0x4b9   :  { %v4315_v29 = vmul.u32.u64.low %v4287_v1, %v1520_v4  ;;  %v4316_v5 = vmul.u32.u64.high %v4287_v1, %v1520_v4, %v4315_v29  ;;  %v4319_v55 = vmul.u32.u64.low %v4287_v1, %v1516_v35  ;;  %v4320_v31 = vmul.u32.u64.high %v4287_v1, %v1516_v35, %v4319_v55 }
 0x4ba   :  { %v1291_v9 = vmul.f32 %v4304_v51, %v1287_v41  ;;  %v1377_v13 = vand.u32 8388607, %v5247_v26  ;;  %v4328_v14 = vshrl.u32 %v1382_v20, 5  ;;  %v1387_v52 = vshll.u32 %v5232_v7, %v4285_v49 }
 0x4bb   :  { %v1388_v60 = vshrl.u32 %v5244_v32, %v4294_v36  ;;  %v1391_v47 = vshrl.u32 %v5245_v8, %v4294_v36  ;;  %v1397_v6 = vshrl.u32 %v5230_v61, %v4294_v36  ;;  %v1528_v43 = vmul.u32 %v4287_v1, %v1512_v2 }
 0x4bc   :  { %v1295_v42 = vadd.f32 1.4214138, %v1291_v9  ;;  %vm1530_vm7 = vc.u32 %v4316_v5, %v4319_v55  ;;  %v1531_v20 = vadd.s32 1, %v4320_v31  ;;  %v1396_v10 = vshll.u32 %v5246_v18, %v4285_v49 }
 0x4bd   :  { %v1286_v63 = vadd.f32 -1.4531521, %v1282_v21  ;;  %v1390_v11 = vshll.u32 %v5244_v32, %v4285_v49  ;;  %v1393_v46 = vshll.u32 %v5245_v8, %v4285_v49  ;;  %v1399_v35 = vshll.u32 %v5230_v61, %v4285_v49 }
 0x4be   :  { %v1299_v39 = vmul.f32 %v4304_v51, %v1295_v42  ;;  %v1532_v41 = vsel %vm1530_vm7, %v1531_v20, %v4320_v31  ;;  %v1398_v1 = vor.u32 %v1397_v6, %v1396_v10  ;;  %v1400_v4 = vshrl.u32 %v5231_v38, %v4294_v36 }
 0x4bf   :  { %v1533_v9 = vadd.s32 %v1532_v41, %v1528_v43  ;;  %v1392_v2 = vor.u32 %v1391_v47, %v1390_v11  ;;  %v1395_v26 = vor.u32 %v1394_v27, %v1393_v46  ;;  %v1389_v21 = vor.u32 %v1388_v60, %v1387_v52  ;;  %v3179_v52 = vpop.eup %3178 }
 0x4c0   :  { %v1303_v29 = vadd.f32 -0.28449672, %v1299_v39  ;;  %v1401_v42 = vor.u32 %v1400_v4, %v1399_v35  ;;  %v1378_v58 = vor.u32 8388608, %v1377_v13  ;;  %vm1405_vm8 = vcmp.lt.s32.totalorder %v4328_v14, 4 }
 0x4c1   :  { %v1534_v48 = vadd.s32 536870912, %v1533_v9  ;;  %v1290_v31 = vmul.f32 %v4310_v0, %v1286_v63  ;;  %vm1402_vm9 = vcmp.lt.s32.totalorder %v4328_v14, 1  ;;  %v1411_v49 = vsel %vm1405_vm8, %v1398_v1, 920167782 }
 0x4c2   :  { %v1307_v33 = vmul.f32 %v4304_v51, %v1303_v29  ;;  %v1415_v6 = vsel %vm1405_vm8, %v1401_v42, 1326507024  ;;  %vm1404_vm10 = vcmp.lt.s32.totalorder %v4328_v14, 3  ;;  %v1414_v13 = vsel %vm1402_vm9, %v1392_v2, %v1395_v26 }
 0x4c3   :  { %v4364_v27 = vshrl.u32 %v1534_v48, 30  ;;  %v1410_v60 = vsel %vm1402_vm9, %v1389_v21, %v1392_v2  ;;  %v1412_v43 = vsel %vm1404_vm10, %v1395_v26, %v1411_v49  ;;  %v1416_v20 = vsel %vm1404_vm10, %v1398_v1, %v1415_v6 }
 0x4c4   :  { %v1311_v47 = vadd.f32 0.2548296, %v1307_v33  ;;  %vm1403_vm11 = vcmp.lt.s32.totalorder %v4328_v14, 2  ;;  %v1386_v33 = vshrl.u32 %v5232_v7, %v4294_v36  ;;  %v1407_v39 = vsel %vm1405_vm8, %v1395_v26, 2102212464 }
 0x4c5   :  { %v1536_v48 = vshll.u32 %v4364_v27, 30  ;;  %v1417_v63 = vsel %vm1403_vm11, %v1414_v13, %v1416_v20  ;;  %v1418_v11 = vshll.u32 %v1378_v58, 8  ;;  %v1294_v1 = vadd.f32 1.4214138, %v1290_v31  ;;  %v1175_v35 = vpop.f32.mrb[24].mxu1 }
 0x4c6   :  { %v1315_v10 = vmul.f32 %v4304_v51, %v1311_v47  ;;  %v1413_v51 = vsel %vm1403_vm11, %v1410_v60, %v1412_v43  ;;  %v1406_v4 = vsel %vm1402_vm9, %v1386_v33, %v1389_v21  ;;  %v1206_v26 = vmul.f32 %v1175_v35, %v3678_v34  ;;  %v1177_v42 = vpop.f32.mrb[25].mxu1 }
 0x4c7   :  { %v4384_v41 = vsub.s32 %v1533_v9, %v1536_v48  ;;  %v4390_v29 = vmul.u32.u64.low %v1418_v11, %v1417_v63  ;;  %v4391_v36 = vmul.u32.u64.high %v1418_v11, %v1417_v63, %v4390_v29  ;;  %v1408_v9 = vsel %vm1404_vm10, %v1392_v2, %v1407_v39 }
 0x4c8   :  { %v1335_v46 = vmul.f32 %v3179_v52, %v1315_v10  ;;  %v1207_v31 = vmul.f32 %v1177_v42, %v3680_v37  ;;  %v1318_v6 = vsub.f32 0.0, %v4282_v22  ;;  %v1298_v60 = vmul.f32 %v4310_v0, %v1294_v1 }
 0x4c9   :  { %v1539_v58 = vsub.s32 0, %v4384_v41  ;;  %v4399_v47 = vmul.u32.u64.low %v1418_v11, %v1413_v51  ;;  %v4400_v13 = vmul.u32.u64.high %v1418_v11, %v1413_v51, %v4399_v47  ;;  %v1181_v43 = vpop.f32.mrb[26].mxu1  ;;  %v1259_v20 = vmul.f32 0.5, %v4268_v24 }
 0x4ca   :  { %v1339_v49 = vsub.f32 1.0, %v1335_v46  ;;  %v4408_v2 = vadd.f32 -1.0, %v4268_v24  ;;  %v1409_v10 = vsel %vm1403_vm11, %v1406_v4, %v1408_v9  ;;  %v1208_v48 = vmul.f32 %v1181_v43, %v3682_v40  ;;  %v1183_v33 = vpop.f32.mrb[27].mxu1 }
 0x4cb   :  { %v2866_v52 = vmin.u32 %v1539_v58, %v4384_v41  ;;  %vm1427_vm15 = vc.u32 %v4391_v36, %v4399_v47  ;;  %v1209_v46 = vmul.f32 %v1183_v33, %v3686_v44  ;;  %v1322_v51 = vmul.f32 %v1318_v6, %v4282_v22 }
 0x4cc   :  { %v1347_v21 = vsub.f32 0.0, %v1339_v49  ;;  %v1428_v57 = vadd.s32 1, %v4400_v13  ;;  %v1236_v35 = vadd.f32 %v1208_v48, %v1206_v26  ;;  %v1302_v42 = vadd.f32 -0.28449672, %v1298_v60 }
 0x4cd   :  { %v1541_v63 = vclz %v2866_v52  ;;  %v1425_v14 = vmul.u32 %v1418_v11, %v1409_v10  ;;  %v1245_v4 = vsel %vm220_vm0, %v1207_v31, 0.0  ;;  %v1246_v58 = vsel %vm220_vm0, %v1209_v46, 0.0 }
 0x4ce   :  { %v1351_v39 = vsel %vm1343_vm14, %v1347_v21, %v1339_v49  ;;  %v1187_v49 = vpop.f32.mrb[28].mxu1  ;;  %v1429_v21 = vsel %vm1427_vm15, %v1428_v57, %v4400_v13  ;;  %v1247_v52 = vadd.f32 %v1246_v58, %v1245_v4  ;;  %v1326_v31 = vmul.f32 1.442695, %v1322_v51 }
 0x4cf   :  { %v1355_v1 = vadd.f32 1.0, %v1351_v39  ;;  %v2867_v29 = vadd.s32 4294967294, %v1541_v63  ;;  %v1210_v43 = vmul.f32 %v1187_v49, %v3692_v50  ;;  %v1189_v33 = vpop.f32.mrb[29].mxu1  ;;  %v1430_v22 = vadd.s32 %v1429_v21, %v1425_v14 }
 0x4d0   :  { %v1211_v26 = vmul.f32 %v1189_v33, %v3695_v54  ;;  %v1306_v46 = vmul.f32 %v4310_v0, %v1302_v42  ;;  %3180 = vpow2.f32 %v1326_v31  ;;  %vm1475_vm3 = vcmp.lt.s32.totalorder %v4268_v24, 0 }
 0x4d1   :  { %v4420_v9 = vmul.f32 %v1355_v1, %v1259_v20  ;;  %vm2868_vm1 = vcmp.lt.s32.totalorder %v2867_v29, 0  ;;  %v1237_v60 = vadd.f32 %v1236_v35, %v1210_v43  ;;  %v1529_v20 = vadd.s32 %v4319_v55, %v4316_v5  ;;  %v1193_v39 = vpop.f32.mrb[30].mxu1 }
 0x4d2   :  { %v1544_v6 = vsel %vm2868_vm1, 0, %v2867_v29  ;;  %v1248_v13 = vsel %vm220_vm0, %v1211_v26, 0.0  ;;  %v1431_v1 = vadd.s32 536870912, %v1430_v22  ;;  %v1212_v14 = vmul.f32 %v1193_v39, %v3701_v59  ;;  %v1195_v4 = vpop.f32.mrb[31].mxu1 }
 0x4d3   :  { %v1367_v11 = vsub.f32 %v4408_v2, %v4420_v9  ;;  %v1545_v10 = vsub.s32 32, %v1544_v6  ;;  %v1549_v48 = vsub.s32 4294967266, %v1544_v6  ;;  %v1546_v63 = vshll.u32 %v4384_v41, %v1544_v6 }
 0x4d4   :  { %v1249_v57 = vadd.f32 %v1248_v13, %v1247_v52  ;;  %v1213_v35 = vmul.f32 %v1195_v4, %v3708_v62  ;;  %v4434_v55 = vshrl.u32 %v1431_v1, 30  ;;  %v1238_v5 = vadd.f32 %v1237_v60, %v1212_v14 }
 0x4d5   :  { %v1547_v29 = vshrl.u32 %v1529_v20, %v1545_v10  ;;  %v1550_v51 = vadd.s32 127, %v1549_v48  ;;  %v1310_v52 = vadd.f32 0.2548296, %v1306_v46  ;;  %v1559_v39 = vsub.s32 4, %v4364_v27 }
 0x4d6   :  { %v1250_v21 = vsel %vm220_vm0, %v1213_v35, 0.0  ;;  %v1433_v41 = vshll.u32 %v4434_v55, 30  ;;  %v1239_v33 = vrot.slane %v1238_v5, 4  ;;  %vm1372_vm5 = vcmp.lt.s32.totalorder %v4265_v3, 0 }
 0x4d7   :  { %v1548_v58 = vor.u32 %v1547_v29, %v1546_v63  ;;  %v1551_v49 = vshll.u32 %v1550_v51, 23  ;;  %v1251_v42 = vadd.f32 %v1250_v21, %v1249_v57  ;;  %v1314_v60 = vmul.f32 %v4310_v0, %v1310_v52 }
 0x4d8   :  { %v1434_v26 = vsub.s32 %v1430_v22, %v1433_v41  ;;  %v1240_v63 = vadd.f32 %v1239_v33, %v1238_v5  ;;  %v5248_v57 = vand.u32 2147483647, %v4268_v24  ;;  %vm1565_vm6 = vweird.f32 %v4268_v24 }
 0x4d9   :  { %v1552_v43 = vor.u32 4788187, %v1551_v49  ;;  %v1252_v6 = vrot.slane %v1251_v42, 4  ;;  %v1555_v10 = vcvt.s32.f32 %v1548_v58  ;;  %v1560_v58 = vsel %vm1475_vm3, %v1559_v39, %v4364_v27 }
 0x4da   :  { %v1436_v48 = vsub.s32 0, %v1434_v26  ;;  %v3181_v29 = vpop.eup %3180  ;;  %vm4442_vm2 = vcmp.le.f32.partialorder %v5248_v57, 0.7853982  ;;  %v1241_v0 = vrot.slane %v1240_v63, 2  ;;  %v1426_v27 = vadd.s32 %v4399_v47, %v4391_v36 }
 0x4db   :  { %v1553_v20 = vand.u32 2147483647, %v1552_v43  ;;  %v1253_v13 = vadd.f32 %v1252_v6, %v1251_v42  ;;  %v1334_v49 = vmul.f32 %v3181_v29, %v1314_v60  ;;  %v1562_v42 = vsel %vm4442_vm2, 0, %v1560_v58 }
 0x4dc   :  { %v2862_v1 = vmin.u32 %v1436_v48, %v1434_v26  ;;  %v1242_v6 = vadd.f32 %v1241_v0, %v1240_v63  ;;  %v1456_v48 = vsub.s32 4, %v4434_v55  ;;  %v1566_v60 = vand.u32 3, %v1562_v42 }
 0x4dd   :  { %v1556_v31 = vmul.f32 %v1555_v10, %v1553_v20  ;;  %v1254_v14 = vrot.slane %v1253_v13, 2  ;;  %v1338_v52 = vsub.f32 1.0, %v1334_v49  ;;  %vm1342_vm8 = vcmp.lt.f32.partialorder %v4276_v45, 0.0 }
 0x4de   :  { %v1438_v22 = vclz %v2862_v1  ;;  %v1243_v63 = vrot.slane %v1242_v6, 1  ;;  %vm1571_vm7 = vcmp.eq.s32.totalorder %v1566_v60, 2  ;;  %v5251_v49 = vand.u32 2147483647, %v4265_v3 }
 0x4df   :  { %v1557_v4 = vxor.u32 2147483648, %v1556_v31  ;;  %v1255_v51 = vadd.f32 %v1254_v14, %v1253_v13  ;;  %v1346_v36 = vsub.f32 0.0, %v1338_v52  ;;  %vm1568_vm11 = vcmp.eq.s32.totalorder %v1566_v60, 0 }
 0x4e0   :  { %v2863_v21 = vadd.s32 4294967294, %v1438_v22  ;;  %v1457_v22 = vsel %vm1372_vm5, %v1456_v48, %v4434_v55  ;;  %vm4479_vm9 = vcmp.le.f32.partialorder %v5251_v49, 0.7853982  ;;  %vm1567_vm14 = vcmp.lt.s32.totalorder %v1566_v60, 2 }
 0x4e1   :  { %v1558_v35 = vsel %vm1475_vm3, %v1557_v4, %v1556_v31  ;;  %v1256_v41 = vrot.slane %v1255_v51, 1  ;;  %v4460_v31 = vmul.f32 0.5, %v4265_v3  ;;  %v1459_v55 = vsel %vm4479_vm9, 0, %v1457_v22 }
 0x4e2   :  { %v1561_v5 = vsel %vm4442_vm2, %v4268_v24, %v1558_v35  ;;  %vm2864_vm4 = vcmp.lt.s32.totalorder %v2863_v21, 0  ;;  %v4492_v22 = vand.u32 3, %v1459_v55 }
 0x4e3   :  { %3182 = vcosq.f32 %v1561_v5  ;;  %v4453_v43 = vadd.f32 %v1256_v41, %v1255_v51  ;;  %v1441_v33 = vsel %vm2864_vm4, 0, %v2863_v21  ;;  %v1350_v41 = vsel %vm1342_vm8, %v1346_v36, %v1338_v52 }
 0x4e4   :  { %3184 = vsinq.f32 %v1561_v5  ;;  %v1442_v20 = vsub.s32 32, %v1441_v33  ;;  %v1446_v10 = vsub.s32 4294967266, %v1441_v33  ;;  %v1443_v1 = vshll.u32 %v1434_v26, %v1441_v33 }
 0x4e5   :  { %v1682_v13 = vand.u32 2139095040, %v4453_v43  ;;  %v4463_v39 = vmul.f32 0.70710677, %v4453_v43  ;;  %v1787_v26 = vmax.f32 %v4268_v24, 0.0  ;;  %v5216_v58 = vand.u32 2147483647, %v4453_v43 }
 0x4e6   :  { %v1444_v14 = vshrl.u32 %v1426_v27, %v1442_v20  ;;  %v1447_v4 = vadd.s32 127, %v1446_v10  ;;  %v4485_v20 = vadd.f32 %v1243_v63, %v1242_v6  ;;  %v4490_v36 = vadd.f32 1.0, %v1350_v41 }
 0x4e7   :  { %v1683_v29 = vshrl.u32 %v1682_v13, 23  ;;  %v4467_v47 = vand.u32 2147483647, %v4463_v39  ;;  %vm1462_vm4 = vweird.f32 %v4265_v3 }
 0x4e8   :  { %v1445_v57 = vor.u32 %v1444_v14, %v1443_v1  ;;  %v1448_v46 = vshll.u32 %v1447_v4, 23  ;;  %v1686_v1 = vand.u32 8388607, %v5216_v58 }
 0x4e9   :  { %v2873_v51 = vadd.s32 4294967169, %v1683_v29  ;;  %v1273_v35 = vmul.f32 0.3275911, %v4467_v47 }
 0x4ea   :  { %v1449_v5 = vor.u32 4788187, %v1448_v46  ;;  %v1452_v45 = vcvt.s32.f32 %v1445_v57  ;;  %v4495_v57 = vmul.f32 0.70710677, %v4485_v20 }
 0x4eb   :  { %v1277_v42 = vadd.f32 1.0, %v1273_v35  ;;  %v1689_v27 = vadd.s32 1, %v2873_v51  ;;  %v1687_v35 = vor.u32 8388608, %v1686_v1 }
 0x4ec   :  { %v1450_v48 = vand.u32 2147483647, %v1449_v5 }
 0x4ed   :  { %v3183_v21 = vpop.eup %3182  ;;  %3186 = vrcp.f32 %v1277_v42  ;;  %vm1690_vm10 = vcmp.gt.s32.totalorder %v1689_v27, 0 }
 0x4ee   :  { %v3185_v33 = vpop.eup %3184  ;;  %v1572_v10 = vxor.u32 2147483648, %v3183_v21  ;;  %v1453_v14 = vmul.f32 %v1452_v45, %v1450_v48  ;;  %v1691_v4 = vsel %vm1690_vm10, %v1689_v27, 0 }
 0x4ef   :  { %v1569_v13 = vxor.u32 2147483648, %v3185_v33  ;;  %v1693_v6 = vand.u32 31, %v1691_v4  ;;  %v1692_v49 = vshrl.u32 %v1691_v4, 5 }
 0x4f0   :  { %v1573_v52 = vsel %vm1571_vm7, %v1572_v10, %v3185_v33  ;;  %v1454_v46 = vxor.u32 2147483648, %v1453_v14  ;;  %vm1464_vm7 = vcmp.lt.s32.totalorder %v4492_v22, 2 }
 0x4f1   :  { %v1570_v29 = vsel %vm1568_vm11, %v3183_v21, %v1569_v13  ;;  %v1694_v5 = vsub.s32 32, %v1693_v6  ;;  %v1696_v41 = vshll.u32 %v5232_v7, %v1693_v6  ;;  %v1699_v55 = vshll.u32 %v5244_v32, %v1693_v6 }
 0x4f2   :  { %v1574_v63 = vsel %vm1567_vm14, %v1570_v29, %v1573_v52  ;;  %v1455_v21 = vsel %vm1372_vm5, %v1454_v46, %v1453_v14  ;;  %v1702_v33 = vshll.u32 %v5245_v8, %v1693_v6  ;;  %v1705_v45 = vshll.u32 %v5246_v18, %v1693_v6 }
 0x4f3   :  { %v1575_v51 = vsel %vm1565_vm6, nan, %v1574_v63  ;;  %v1458_v42 = vsel %vm4479_vm9, %v4265_v3, %v1455_v21  ;;  %v1697_v24 = vshrl.u32 %v5244_v32, %v1694_v5  ;;  %v1700_v27 = vshrl.u32 %v5245_v8, %v1694_v5 }
 0x4f4   :  { %v1783_v60 = vadd.f32 %v1575_v51, %v1367_v11  ;;  %3188 = vcosq.f32 %v1458_v42  ;;  %v1703_v2 = vshrl.u32 %v5246_v18, %v1694_v5  ;;  %v1706_v9 = vshrl.u32 %v5230_v61, %v1694_v5 }
 0x4f5   :  { %3190 = vsinq.f32 %v1458_v42  ;;  %v1698_v11 = vor.u32 %v1697_v24, %v1696_v41  ;;  %v1701_v48 = vor.u32 %v1700_v27, %v1699_v55  ;;  %v1708_v29 = vshll.u32 %v5230_v61, %v1693_v6 }
 0x4f6   :  { %v1791_v10 = vsub.f32 %v1783_v60, %v1787_v26  ;;  %v1704_v14 = vor.u32 %v1703_v2, %v1702_v33  ;;  %v1707_v4 = vor.u32 %v1706_v9, %v1705_v45  ;;  %v1709_v63 = vshrl.u32 %v5231_v38, %v1694_v5 }
 0x4f7   :  { %v4525_v52 = vpop.eup %3186  ;;  %vm1711_vm15 = vcmp.lt.s32.totalorder %v1692_v49, 1  ;;  %vm1714_vm1 = vcmp.lt.s32.totalorder %v1692_v49, 4  ;;  %v4532_v51 = vand.u32 2147483647, %v4495_v57  ;;  %v1727_v55 = vshll.u32 %v1687_v35, 8 }
 0x4f8   :  { %v1795_v0 = vmul.f32 %v1791_v10, %v3652_v16  ;;  %v4517_v13 = vmul.f32 %v1791_v10, %v3658_v19  ;;  %v4520_v1 = vmul.f32 %v1791_v10, %v3667_v25  ;;  %v4523_v26 = vmul.f32 %v1791_v10, %v3674_v30 }
 0x4f9   :  { %v1285_v46 = vmul.f32 1.0614054, %v4525_v52  ;;  %v1710_v60 = vor.u32 %v1709_v63, %v1708_v29  ;;  %v1716_v21 = vsel %vm1714_vm1, %v1704_v14, 2102212464  ;;  %v1719_v41 = vsel %vm1711_vm15, %v1698_v11, %v1701_v48 }
 0x4fa   :  { %2877 = vmatprep.mubr.msk.f32.mxu0 %vm220_vm0, %v1795_v0  ;;  %v1695_v42 = vshrl.u32 %v5232_v7, %v1694_v5  ;;  %vm1713_vm2 = vcmp.lt.s32.totalorder %v1692_v49, 3  ;;  %v1720_v24 = vsel %vm1714_vm1, %v1707_v4, 920167782  ;;  %v1723_v6 = vsel %vm1711_vm15, %v1701_v48, %v1704_v14 }
 0x4fb   :  { %v1289_v27 = vadd.f32 -1.4531521, %v1285_v46  ;;  %vm1712_vm3 = vcmp.lt.s32.totalorder %v1692_v49, 2  ;;  %v1721_v33 = vsel %vm1713_vm2, %v1704_v14, %v1720_v24  ;;  %v1724_v10 = vsel %vm1714_vm1, %v1710_v60, 1326507024 }
 0x4fc   :  { %v1715_v2 = vsel %vm1711_vm15, %v1695_v42, %v1698_v11  ;;  %v1717_v9 = vsel %vm1713_vm2, %v1701_v48, %v1716_v21  ;;  %v1722_v45 = vsel %vm1712_vm3, %v1719_v41, %v1721_v33  ;;  %v1725_v0 = vsel %vm1713_vm2, %v1707_v4, %v1724_v10 }
 0x4fd   :  { %v1726_v58 = vsel %vm1712_vm3, %v1723_v6, %v1725_v0  ;;  %v4537_v29 = vmul.u32.u64.low %v1727_v55, %v1722_v45  ;;  %v4538_v63 = vmul.u32.u64.high %v1727_v55, %v1722_v45, %v4537_v29  ;;  %v1272_v35 = vmul.f32 0.3275911, %v4532_v51 }
 0x4fe   :  { %v3189_v5 = vpop.eup %3188  ;;  %v2857_v30 = vadd.f32 -1.0, %v4265_v3  ;;  %v4543_v46 = vmul.u32.u64.low %v1727_v55, %v1726_v58  ;;  %v4544_v25 = vmul.u32.u64.high %v1727_v55, %v1726_v58, %v4543_v46  ;;  %v1358_v11 = vmul.f32 %v4490_v36, %v4460_v31 }
 0x4ff   :  { %v3191_v14 = vpop.eup %3190  ;;  %v1469_v48 = vxor.u32 2147483648, %v3189_v5  ;;  %v1293_v4 = vmul.f32 %v4525_v52, %v1289_v27  ;;  %v1718_v60 = vsel %vm1712_vm3, %v1715_v2, %v1717_v9  ;;  %vm1468_vm5 = vcmp.eq.s32.totalorder %v4492_v22, 2 }
 0x500   :  { %v1466_v21 = vxor.u32 2147483648, %v3191_v14  ;;  %v1579_v41 = vand.u32 2139095040, %v4485_v20  ;;  %vm1465_vm6 = vcmp.eq.s32.totalorder %v4492_v22, 0  ;;  %v1737_v42 = vadd.s32 1, %v4538_v63 }
 0x501   :  { %v1470_v58 = vsel %vm1468_vm5, %v1469_v48, %v3191_v14  ;;  %v1276_v24 = vadd.f32 1.0, %v1272_v35  ;;  %v1734_v36 = vmul.u32 %v1727_v55, %v1718_v60  ;;  %vm1736_vm8 = vc.u32 %v4544_v25, %v4537_v29 }
 0x502   :  { %v1467_v31 = vsel %vm1465_vm6, %v3189_v5, %v1466_v21  ;;  %v1366_v49 = vsub.f32 %v2857_v30, %v1358_v11  ;;  %v1297_v27 = vadd.f32 1.4214138, %v1293_v4  ;;  %v1738_v33 = vsel %vm1736_vm8, %v1737_v42, %v4538_v63 }
 0x503   :  { %v1471_v6 = vsel %vm1464_vm7, %v1467_v31, %v1470_v58  ;;  %v1739_v2 = vadd.s32 %v1738_v33, %v1734_v36  ;;  %v1580_v9 = vshrl.u32 %v1579_v41, 23  ;;  %v1786_v0 = vmax.f32 %v4265_v3, 0.0 }
 0x504   :  { %v1472_v10 = vsel %vm1462_vm4, nan, %v1471_v6  ;;  %3192 = vrcp.f32 %v1276_v24  ;;  %v1321_v22 = vsub.f32 0.0, %v4467_v47  ;;  %v1301_v30 = vmul.f32 %v4525_v52, %v1297_v27 }
 0x505   :  { %v1782_v45 = vadd.f32 %v1472_v10, %v1366_v49  ;;  %v1740_v55 = vadd.s32 536870912, %v1739_v2  ;;  %v2869_v35 = vadd.s32 4294967169, %v1580_v9  ;;  %v1576_v42 = vand.u32 2147483647, %v4485_v20 }
 0x506   :  { %v1325_v11 = vmul.f32 %v1321_v22, %v4467_v47  ;;  %v1305_v4 = vadd.f32 -0.28449672, %v1301_v30  ;;  %vm1681_vm4 = vcmp.lt.s32.totalorder %v4453_v43, 0  ;;  %vm1345_vm5 = vcmp.lt.f32.partialorder %v4463_v39, 0.0 }
 0x507   :  { %v1790_v5 = vsub.f32 %v1782_v45, %v1786_v0  ;;  %v4564_v46 = vshrl.u32 %v1740_v55, 30  ;;  %v1586_v14 = vadd.s32 1, %v2869_v35  ;;  %v1583_v33 = vand.u32 8388607, %v1576_v42 }
 0x508   :  { %v1332_v41 = vmul.f32 1.442695, %v1325_v11  ;;  %v1309_v47 = vmul.f32 %v4525_v52, %v1305_v4 }
 0x509   :  { %v1794_v63 = vmul.f32 %v1790_v5, %v3650_v15  ;;  %v1742_v48 = vshll.u32 %v4564_v46, 30  ;;  %vm1587_vm9 = vcmp.gt.s32.totalorder %v1586_v14, 0  ;;  %v1796_v60 = vmul.f32 %v1790_v5, %v3654_v17 }
 0x50a   :  { %v1588_v21 = vsel %vm1587_vm9, %v1586_v14, 0  ;;  %3194 = vpow2.f32 %v1332_v41  ;;  %v1313_v10 = vadd.f32 0.2548296, %v1309_v47  ;;  %v1800_v35 = vmul.f32 %v1790_v5, %v3671_v28 }
 0x50b   :  { %1899 = vmatmul.mubr.f32.vlgmr.msra.gmra.mrb[16].mxu0 %v1794_v63  ;;  %v1743_v3 = vsub.s32 %v1739_v2, %v1742_v48  ;;  %v1590_v31 = vand.u32 31, %v1588_v21  ;;  %v1589_v30 = vshrl.u32 %v1588_v21, 5  ;;  %v1735_v47 = vadd.s32 %v4537_v29, %v4544_v25 }
 0x50c   :  { %2878 = vmatprep.mubr.msk.f32.mxu0 %vm220_vm0, %v4517_v13  ;;  %v1798_v13 = vmul.f32 %v1790_v5, %v3664_v23  ;;  %vm1771_vm9 = vweird.f32 %v4453_v43 }
 0x50d   :  { %v1745_v58 = vsub.s32 0, %v1743_v3  ;;  %v1591_v49 = vsub.s32 32, %v1590_v31  ;;  %v1593_v2 = vshll.u32 %v5232_v7, %v1590_v31  ;;  %v1599_v22 = vshll.u32 %v5245_v8, %v1590_v31 }
 0x50e   :  { %v4573_v24 = vpop.eup %3192  ;;  %v1602_v14 = vshll.u32 %v5246_v18, %v1590_v31  ;;  %v1605_v41 = vshll.u32 %v5230_v61, %v1590_v31  ;;  %vm1608_vm11 = vcmp.lt.s32.totalorder %v1589_v30, 1  ;;  %vm1611_vm14 = vcmp.lt.s32.totalorder %v1589_v30, 4 }
 0x50f   :  { %1904 = vmatmul.mubr.f32.gmra.mrb[18].mxu0 %v1796_v60  ;;  %v2874_v36 = vmin.u32 %v1745_v58, %v1743_v3  ;;  %v4580_v27 = vmul.f32 1.0614054, %v4573_v24  ;;  %v1594_v9 = vshrl.u32 %v5244_v32, %v1591_v49  ;;  %v1597_v0 = vshrl.u32 %v5245_v8, %v1591_v49 }
 0x510   :  { %2879 = vmatprep.mubr.msk.f32.mxu0 %vm220_vm0, %v4520_v1  ;;  %v1596_v1 = vshll.u32 %v5244_v32, %v1590_v31  ;;  %v1600_v55 = vshrl.u32 %v5246_v18, %v1591_v49  ;;  %v1603_v63 = vshrl.u32 %v5230_v61, %v1591_v49  ;;  %v1606_v58 = vshrl.u32 %v5231_v38, %v1591_v49 }
 0x511   :  { %v1747_v6 = vclz %v2874_v36  ;;  %v1595_v11 = vor.u32 %v1594_v9, %v1593_v2  ;;  %v1584_v36 = vor.u32 8388608, %v1583_v33  ;;  %v1592_v2 = vshrl.u32 %v5232_v7, %v1591_v49 }
 0x512   :  { %v1598_v48 = vor.u32 %v1597_v0, %v1596_v1  ;;  %v1601_v4 = vor.u32 %v1600_v55, %v1599_v22  ;;  %v1604_v60 = vor.u32 %v1603_v63, %v1602_v14  ;;  %v1607_v9 = vor.u32 %v1606_v58, %v1605_v41 }
 0x513   :  { %1909 = vmatmul.mubr.f32.gmra.mrb[20].mxu0 %v1798_v13  ;;  %v2875_v45 = vadd.s32 4294967294, %v1747_v6  ;;  %v1317_v13 = vmul.f32 %v4525_v52, %v1313_v10  ;;  %vm1610_vm15 = vcmp.lt.s32.totalorder %v1589_v30, 3  ;;  %vm1609_vm1 = vcmp.lt.s32.totalorder %v1589_v30, 2 }
 0x514   :  { %2880 = vmatprep.mubr.msk.f32.mxu0 %vm220_vm0, %v4523_v26  ;;  %v1613_v31 = vsel %vm1611_vm14, %v1601_v4, 2102212464  ;;  %v1617_v22 = vsel %vm1611_vm14, %v1604_v60, 920167782  ;;  %v3195_v55 = vpop.eup %3194  ;;  %v1621_v49 = vsel %vm1611_vm14, %v1607_v9, 1326507024  ;;  %v1612_v14 = vsel %vm1608_vm11, %v1592_v2, %v1595_v11 }
 0x515   :  { %vm2876_vm10 = vcmp.lt.s32.totalorder %v2875_v45, 0  ;;  %v1618_v33 = vsel %vm1610_vm15, %v1601_v4, %v1617_v22  ;;  %v1624_v10 = vshll.u32 %v1584_v36, 8  ;;  %v1614_v63 = vsel %vm1610_vm15, %v1598_v48, %v1613_v31 }
 0x516   :  { %v1750_v26 = vsel %vm2876_vm10, 0, %v2875_v45  ;;  %v1616_v45 = vsel %vm1608_vm11, %v1595_v11, %v1598_v48  ;;  %v1337_v41 = vmul.f32 %v3195_v55, %v1317_v13  ;;  %v1615_v36 = vsel %vm1609_vm1, %v1612_v14, %v1614_v63 }
 0x517   :  { %1914 = vmatmul.mubr.f32.gmra.mrb[22].mxu0 %v1800_v35  ;;  %v1751_v5 = vsub.s32 32, %v1750_v26  ;;  %v1755_v21 = vsub.s32 4294967266, %v1750_v26  ;;  %v1752_v6 = vshll.u32 %v1743_v3, %v1750_v26  ;;  %v1619_v52 = vsel %vm1609_vm1, %v1616_v45, %v1618_v33 }
 0x518   :  { %v1620_v3 = vsel %vm1608_vm11, %v1598_v48, %v1601_v4  ;;  %v1622_v26 = vsel %vm1610_vm15, %v1604_v60, %v1621_v49  ;;  %v1288_v11 = vadd.f32 -1.4531521, %v4580_v27  ;;  %v1341_v60 = vsub.f32 1.0, %v1337_v41 }
 0x519   :  { %v1753_v1 = vshrl.u32 %v1735_v47, %v1751_v5  ;;  %v1756_v0 = vadd.s32 127, %v1755_v21  ;;  %v1623_v58 = vsel %vm1609_vm1, %v1620_v3, %v1622_v26  ;;  %v1631_v2 = vmul.u32 %v1624_v10, %v1615_v36 }
 0x51a   :  { %v4609_v47 = vmul.u32.u64.low %v1624_v10, %v1619_v52  ;;  %v4610_v5 = vmul.u32.u64.high %v1624_v10, %v1619_v52, %v4609_v47  ;;  %v1765_v27 = vsub.s32 4, %v4564_v46  ;;  %v1292_v22 = vmul.f32 %v4573_v24, %v1288_v11 }
 0x51b   :  { %v1754_v25 = vor.u32 %v1753_v1, %v1752_v6  ;;  %v1757_v29 = vshll.u32 %v1756_v0, 23  ;;  %v4613_v1 = vmul.u32.u64.low %v1624_v10, %v1623_v58  ;;  %v4614_v4 = vmul.u32.u64.high %v1624_v10, %v1623_v58, %v4613_v1 }
 0x51c   :  { %v1634_v48 = vadd.s32 1, %v4610_v5  ;;  %v5254_v0 = vand.u32 2147483647, %v4453_v43  ;;  %v1766_v52 = vsel %vm1681_vm4, %v1765_v27, %v4564_v46  ;;  %v1296_v3 = vadd.f32 1.4214138, %v1292_v22 }
 0x51d   :  { %v1758_v35 = vor.u32 4788187, %v1757_v29  ;;  %v1761_v6 = vcvt.s32.f32 %v1754_v25  ;;  %vm1633_vm2 = vc.u32 %v4614_v4, %v4609_v47  ;;  %v1349_v29 = vsub.f32 0.0, %v1341_v60 }
 0x51e   :  { %vm4623_vm3 = vcmp.le.f32.partialorder %v5254_v0, 0.7853982  ;;  %v1635_v30 = vsel %vm1633_vm2, %v1634_v48, %v4610_v5  ;;  %v1320_v10 = vsub.f32 0.0, %v4532_v51  ;;  %v1300_v26 = vmul.f32 %v4573_v24, %v1296_v3 }
 0x51f   :  { %v1759_v21 = vand.u32 2147483647, %v1758_v35  ;;  %v1636_v55 = vadd.s32 %v1635_v30, %v1631_v2  ;;  %v1353_v35 = vsel %vm1345_vm5, %v1349_v29, %v1341_v60  ;;  %v1768_v63 = vsel %vm4623_vm3, 0, %v1766_v52 }
 0x520   :  { %v1357_v58 = vadd.f32 1.0, %v1353_v35  ;;  %v1324_v5 = vmul.f32 %v1320_v10, %v4532_v51  ;;  %v1772_v46 = vand.u32 3, %v1768_v63  ;;  %v1304_v39 = vadd.f32 -0.28449672, %v1300_v26 }
 0x521   :  { %v1762_v9 = vmul.f32 %v1761_v6, %v1759_v21  ;;  %v1637_v33 = vadd.s32 536870912, %v1636_v55  ;;  %v1261_v6 = vmul.f32 0.5, %v4453_v43  ;;  %v2860_v0 = vadd.f32 -1.0, %v4453_v43 }
 0x522   :  { %v1330_v60 = vmul.f32 1.442695, %v1324_v5  ;;  %vm1777_vm6 = vcmp.eq.s32.totalorder %v1772_v46, 2  ;;  %vm1774_vm7 = vcmp.eq.s32.totalorder %v1772_v46, 0  ;;  %vm1773_vm8 = vcmp.lt.s32.totalorder %v1772_v46, 2 }
 0x523   :  { %v1763_v13 = vxor.u32 2147483648, %v1762_v9  ;;  %v4635_v49 = vshrl.u32 %v1637_v33, 30  ;;  %v1361_v11 = vmul.f32 %v1357_v58, %v1261_v6  ;;  %v1308_v30 = vmul.f32 %v4573_v24, %v1304_v39 }
 0x524   :  { %v1789_v29 = vmax.f32 %v4453_v43, 0.0  ;;  %v1632_v3 = vadd.s32 %v4609_v47, %v4614_v4  ;;  %vm1578_vm11 = vcmp.lt.s32.totalorder %v4485_v20, 0  ;;  %vm1577_vm14 = vcmp.le.f32.partialorder %v1576_v42, 0.7853982 }
 0x525   :  { %v1764_v45 = vsel %vm1681_vm4, %v1763_v13, %v1762_v9  ;;  %v1639_v14 = vshll.u32 %v4635_v49, 30  ;;  %v1369_v27 = vsub.f32 %v2860_v0, %v1361_v11  ;;  %v1312_v52 = vadd.f32 0.2548296, %v1308_v30 }
 0x526   :  { %v1767_v25 = vsel %vm4623_vm3, %v4453_v43, %v1764_v45  ;;  %vm1344_vm15 = vcmp.lt.f32.partialorder %v4495_v57, 0.0  ;;  %v1260_v30 = vmul.f32 0.5, %v4485_v20  ;;  %vm1668_vm4 = vweird.f32 %v4485_v20 }
 0x527   :  { %3196 = vcosq.f32 %v1767_v25  ;;  %v1640_v41 = vsub.s32 %v1636_v55, %v1639_v14  ;;  %v1316_v46 = vmul.f32 %v4573_v24, %v1312_v52  ;;  %v1662_v24 = vsub.s32 4, %v4635_v49 }
 0x528   :  { %3198 = vsinq.f32 %v1767_v25 }
 0x529   :  { %v1642_v21 = vsub.s32 0, %v1640_v41  ;;  %3200 = vpow2.f32 %v1330_v60 }
 0x52b   :  { %v2870_v36 = vmin.u32 %v1642_v21, %v1640_v41 }
 0x52d   :  { %v1644_v2 = vclz %v2870_v36 }
 0x52f   :  { %v2871_v45 = vadd.s32 4294967294, %v1644_v2 }
 0x531   :  { %v3197_v1 = vpop.eup %3196  ;;  %vm2872_vm10 = vcmp.lt.s32.totalorder %v2871_v45, 0 }
 0x532   :  { %v3199_v9 = vpop.eup %3198  ;;  %v1778_v48 = vxor.u32 2147483648, %v3197_v1  ;;  %v1647_v33 = vsel %vm2872_vm10, 0, %v2871_v45 }
 0x533   :  { %v1775_v13 = vxor.u32 2147483648, %v3199_v9  ;;  %v1648_v10 = vsub.s32 32, %v1647_v33  ;;  %v1652_v35 = vsub.s32 4294967266, %v1647_v33  ;;  %v1649_v63 = vshll.u32 %v1640_v41, %v1647_v33 }
 0x534   :  { %v1779_v31 = vsel %vm1777_vm6, %v1778_v48, %v3199_v9 }
 0x535   :  { %v1776_v51 = vsel %vm1774_vm7, %v3197_v1, %v1775_v13  ;;  %v1650_v26 = vshrl.u32 %v1632_v3, %v1648_v10  ;;  %v1653_v58 = vadd.s32 127, %v1652_v35  ;;  %v3201_v1 = vpop.eup %3200  ;;  %v1663_v13 = vsel %vm1578_vm11, %v1662_v24, %v4635_v49 }
 0x536   :  { %v1780_v22 = vsel %vm1773_vm8, %v1776_v51, %v1779_v31  ;;  %v1336_v39 = vmul.f32 %v3201_v1, %v1316_v46  ;;  %v1665_v0 = vsel %vm1577_vm14, 0, %v1663_v13  ;;  %v1788_v10 = vmax.f32 %v4485_v20, 0.0 }
 0x537   :  { %v1781_v55 = vsel %vm1771_vm9, nan, %v1780_v22  ;;  %v1651_v21 = vor.u32 %v1650_v26, %v1649_v63  ;;  %v1654_v6 = vshll.u32 %v1653_v58, 23  ;;  %v1669_v51 = vand.u32 3, %v1665_v0 }
 0x538   :  { %v1785_v25 = vadd.f32 %v1781_v55, %v1369_v27  ;;  %v1340_v4 = vsub.f32 1.0, %v1336_v39 }
 0x539   :  { %v1655_v43 = vor.u32 4788187, %v1654_v6  ;;  %v1658_v9 = vcvt.s32.f32 %v1651_v21  ;;  %vm1674_vm1 = vcmp.eq.s32.totalorder %v1669_v51, 2  ;;  %vm1671_vm2 = vcmp.eq.s32.totalorder %v1669_v51, 0 }
 0x53a   :  { %v1793_v14 = vsub.f32 %v1785_v25, %v1789_v29  ;;  %v1348_v60 = vsub.f32 0.0, %v1340_v4  ;;  %v2859_v25 = vadd.f32 -1.0, %v4485_v20  ;;  %vm1670_vm3 = vcmp.lt.s32.totalorder %v1669_v51, 2 }
 0x53b   :  { %v1656_v36 = vand.u32 2147483647, %v1655_v43 }
 0x53c   :  { %v1803_v5 = vmul.f32 %v1793_v14, %v3680_v37  ;;  %v1352_v2 = vsel %vm1344_vm15, %v1348_v60, %v1340_v4  ;;  %v1805_v26 = vmul.f32 %v1793_v14, %v3686_v44  ;;  %v1809_v21 = vmul.f32 %v1793_v14, %v3708_v62 }
 0x53d   :  { %v1659_v47 = vmul.f32 %v1658_v9, %v1656_v36  ;;  %v1356_v31 = vadd.f32 1.0, %v1352_v2 }
 0x53e   :  { %2881 = vmatprep.mubr.msk.f32.mxu0 %vm220_vm0, %v1803_v5  ;;  %v1807_v5 = vmul.f32 %v1793_v14, %v3695_v54 }
 0x53f   :  { %v1660_v11 = vxor.u32 2147483648, %v1659_v47  ;;  %v1360_v27 = vmul.f32 %v1356_v31, %v1260_v30 }
 0x541   :  { %v1661_v41 = vsel %vm1578_vm11, %v1660_v11, %v1659_v47  ;;  %v1368_v33 = vsub.f32 %v2859_v25, %v1360_v27  ;;  %v5260_v25 = vld [vmem:[#allocation10_spill] sm:$0xff] }
 0x542   :  { %v1664_v48 = vsel %vm1577_vm14, %v4485_v20, %v1661_v41 }
 0x543   :  { %3202 = vcosq.f32 %v1664_v48 }
 0x544   :  { %3204 = vsinq.f32 %v1664_v48 }
 0x54d   :  { %v3203_v45 = vpop.eup %3202 }
 0x54e   :  { %v3205_v42 = vpop.eup %3204  ;;  %v1675_v22 = vxor.u32 2147483648, %v3203_v45 }
 0x54f   :  { %v1672_v55 = vxor.u32 2147483648, %v3205_v42 }
 0x550   :  { %v1676_v29 = vsel %vm1674_vm1, %v1675_v22, %v3205_v42 }
 0x551   :  { %v1673_v49 = vsel %vm1671_vm2, %v3203_v45, %v1672_v55 }
 0x552   :  { %v1677_v57 = vsel %vm1670_vm3, %v1673_v49, %v1676_v29 }
 0x553   :  { %v1678_v52 = vsel %vm1668_vm4, nan, %v1677_v57 }
 0x554   :  { %v1784_v3 = vadd.f32 %v1678_v52, %v1368_v33  ;;  %v5261_v52 = vld [vmem:[#allocation11_spill] sm:$0xff] }
 0x556   :  { %v1792_v35 = vsub.f32 %v1784_v3, %v1788_v10 }
 0x558   :  { %v1802_v63 = vmul.f32 %v1792_v35, %v3678_v34  ;;  %v1804_v58 = vmul.f32 %v1792_v35, %v3682_v40  ;;  %v1806_v46 = vmul.f32 %v1792_v35, %v3692_v50  ;;  %v1808_v20 = vmul.f32 %v1792_v35, %v3701_v59 }
 0x55a   :  { %1919 = vmatmul.mubr.f32.gmra.mrb[24].mxu0 %v1802_v63 }
 0x55b   :  { %2882 = vmatprep.mubr.msk.f32.mxu0 %vm220_vm0, %v1805_v26 }
 0x55e   :  { %1924 = vmatmul.mubr.f32.gmra.mrb[26].mxu0 %v1804_v58 }
 0x55f   :  { %2883 = vmatprep.mubr.msk.f32.mxu0 %vm220_vm0, %v1807_v5 }
 0x562   :  { %1929 = vmatmul.mubr.f32.gmra.mrb[28].mxu0 %v1806_v46 }
 0x563   :  { %2884 = vmatprep.mubr.msk.f32.mxu0 %vm220_vm0, %v1809_v21 }
 0x566   :  { %1934 = vmatmul.mubr.f32.gmra.mrb[30].mxu0 %v1808_v20 }
 0x5de   :  { %v1900_v6 = vpop.f32.mrb[16].mxu0 }
 0x5df   :  { %v1939_v43 = vadd.f32 %v1900_v6, %v4159_v12  ;;  %v1902_v1 = vpop.f32.mrb[17].mxu0  ;;  %v5257_v12 = vld [vmem:[#allocation7_spill] sm:$0xff] }
 0x5e1   :  { %v1947_v39 = vsel %vm961_vm12, %v1939_v43, -inf }
 0x5e2   :  { %1948 = vmax.xlane.f32.xlu0 %v1947_v39  ;;  %v1905_v36 = vpop.f32.mrb[18].mxu0 }
 0x5e3   :  { %v1940_v9 = vadd.f32 %v1905_v36, %v4163_v56  ;;  %v1907_v47 = vpop.f32.mrb[19].mxu0  ;;  %v5258_v56 = vld [vmem:[#allocation8_spill] sm:$0xff] }
 0x5e5   :  { %v1950_v4 = vsel %vm961_vm12, %v1940_v9, -inf }
 0x5e6   :  { %1951 = vmax.xlane.f32.xlu1 %v1950_v4  ;;  %v1910_v14 = vpop.f32.mrb[20].mxu0 }
 0x5e7   :  { %v1941_v11 = vadd.f32 %v1910_v14, %v4167_v53  ;;  %v1912_v41 = vpop.f32.mrb[21].mxu0  ;;  %v5259_v53 = vld [vmem:[#allocation9_spill] sm:$0xff] }
 0x5e9   :  { %v1953_v24 = vsel %vm961_vm12, %v1941_v11, -inf }
 0x5ea   :  { %1954 = vmax.xlane.f32.xlu0 %v1953_v24  ;;  %v1915_v48 = vpop.f32.mrb[22].mxu0 }
 0x5eb   :  { %v1942_v60 = vadd.f32 %v1915_v48, %v5257_v12  ;;  %v1917_v13 = vpop.f32.mrb[23].mxu0 }
 0x5ed   :  { %v1956_v2 = vsel %vm961_vm12, %v1942_v60, -inf }
 0x5ee   :  { %1957 = vmax.xlane.f32.xlu1 %v1956_v2 }
 0x62d   :  { %v1920_v0 = vpop.f32.mrb[24].mxu0 }
 0x62e   :  { %v1943_v31 = vadd.f32 %v1920_v0, %v5258_v56  ;;  %v1922_v51 = vpop.f32.mrb[25].mxu0 }
 0x630   :  { %v1959_v30 = vsel %vm961_vm12, %v1943_v31, -inf }
 0x631   :  { %1960 = vmax.xlane.f32.xlu0 %v1959_v30  ;;  %v1925_v45 = vpop.f32.mrb[26].mxu0 }
 0x632   :  { %v1944_v42 = vadd.f32 %v1925_v45, %v5259_v53  ;;  %v1927_v27 = vpop.f32.mrb[27].mxu0 }
 0x634   :  { %v1962_v22 = vsel %vm961_vm12, %v1944_v42, -inf }
 0x635   :  { %1963 = vmax.xlane.f32.xlu1 %v1962_v22  ;;  %v1930_v55 = vpop.f32.mrb[28].mxu0 }
 0x636   :  { %v1945_v29 = vadd.f32 %v1930_v55, %v5260_v25  ;;  %v1932_v49 = vpop.f32.mrb[29].mxu0 }
 0x638   :  { %v1965_v33 = vsel %vm961_vm12, %v1945_v29, -inf }
 0x639   :  { %1966 = vmax.xlane.f32.xlu0 %v1965_v33  ;;  %v1935_v57 = vpop.f32.mrb[30].mxu0 }
 0x63a   :  { %v1946_v3 = vadd.f32 %v1935_v57, %v5261_v52  ;;  %v1937_v10 = vpop.f32.mrb[31].mxu0 }
 0x63c   :  { %v1968_v35 = vsel %vm961_vm12, %v1946_v3, -inf }
 0x63d   :  { %1969 = vmax.xlane.f32.xlu1 %v1968_v35 }
 0x66f   :  { %v1949_v63 = vpop.xlane.xlu0 %1948 }
 0x670   :  { %v1971_v26 = vsub.f32 %v1939_v43, %v1949_v63 }
 0x672   :  { %v1979_v58 = vmul.f32 1.442695, %v1971_v26 }
 0x673   :  { %v1952_v5 = vpop.xlane.xlu1 %1951 }
 0x674   :  { %3206 = vpow2.f32 %v1979_v58  ;;  %v1972_v46 = vsub.f32 %v1940_v9, %v1952_v5  ;;  %v5262_v5 = vmov 0.0  }
 0x676   :  { %v1981_v21 = vmul.f32 1.442695, %v1972_v46 }
 0x677   :  { %v1955_v20 = vpop.xlane.xlu0 %1954 }
 0x678   :  { %3208 = vpow2.f32 %v1981_v21  ;;  %v1973_v6 = vsub.f32 %v1941_v11, %v1955_v20 }
 0x67a   :  { %v1983_v1 = vmul.f32 1.442695, %v1973_v6 }
 0x67b   :  { %v1958_v39 = vpop.xlane.xlu1 %1957 }
 0x67c   :  { %3210 = vpow2.f32 %v1983_v1  ;;  %v1974_v36 = vsub.f32 %v1942_v60, %v1958_v39 }
 0x67e   :  { %v3207_v47 = vpop.eup %3206  ;;  %v1985_v4 = vmul.f32 1.442695, %v1974_v36 }
 0x67f   :  { %v1995_v14 = vsel %vm961_vm12, %v3207_v47, 0.0 }
 0x680   :  { %3212 = vpow2.f32 %v1985_v4  ;;  %1996 = vadd.xlane.f32.xlu0 %v1995_v14 }
 0x682   :  { %v3209_v41 = vpop.eup %3208 }
 0x683   :  { %v1998_v43 = vsel %vm961_vm12, %v3209_v41, 0.0 }
 0x684   :  { %1999 = vadd.xlane.f32.xlu1 %v1998_v43 }
 0x686   :  { %v3211_v24 = vpop.eup %3210 }
 0x687   :  { %v2001_v9 = vsel %vm961_vm12, %v3211_v24, 0.0 }
 0x688   :  { %2002 = vadd.xlane.f32.xlu0 %v2001_v9 }
 0x68a   :  { %v3213_v48 = vpop.eup %3212 }
 0x68b   :  { %v2004_v11 = vsel %vm961_vm12, %v3213_v48, 0.0 }
 0x68c   :  { %2005 = vadd.xlane.f32.xlu1 %v2004_v11 }
 0x6be   :  { %v1961_v12 = vpop.xlane.xlu0 %1960 }
 0x6bf   :  { %v1975_v60 = vsub.f32 %v1943_v31, %v1961_v12 }
 0x6c1   :  { %v1987_v13 = vmul.f32 1.442695, %v1975_v60 }
 0x6c2   :  { %v1964_v2 = vpop.xlane.xlu1 %1963 }
 0x6c3   :  { %3214 = vpow2.f32 %v1987_v13  ;;  %v1976_v0 = vsub.f32 %v1944_v42, %v1964_v2 }
 0x6c5   :  { %v1989_v56 = vmul.f32 1.442695, %v1976_v0 }
 0x6c6   :  { %v1967_v51 = vpop.xlane.xlu0 %1966 }
 0x6c7   :  { %3216 = vpow2.f32 %v1989_v56  ;;  %v1977_v30 = vsub.f32 %v1945_v29, %v1967_v51 }
 0x6c9   :  { %v1991_v45 = vmul.f32 1.442695, %v1977_v30 }
 0x6ca   :  { %v1970_v53 = vpop.xlane.xlu1 %1969 }
 0x6cb   :  { %3218 = vpow2.f32 %v1991_v45  ;;  %v1978_v27 = vsub.f32 %v1946_v3, %v1970_v53 }
 0x6cd   :  { %v3215_v22 = vpop.eup %3214  ;;  %v1993_v55 = vmul.f32 1.442695, %v1978_v27 }
 0x6ce   :  { %v2007_v25 = vsel %vm961_vm12, %v3215_v22, 0.0 }
 0x6cf   :  { %3220 = vpow2.f32 %v1993_v55  ;;  %2008 = vadd.xlane.f32.xlu0 %v2007_v25 }
 0x6d1   :  { %v3217_v49 = vpop.eup %3216 }
 0x6d2   :  { %v2010_v31 = vsel %vm961_vm12, %v3217_v49, 0.0 }
 0x6d3   :  { %2011 = vadd.xlane.f32.xlu1 %v2010_v31 }
 0x6d5   :  { %v3219_v33 = vpop.eup %3218 }
 0x6d6   :  { %v2013_v42 = vsel %vm961_vm12, %v3219_v33, 0.0 }
 0x6d7   :  { %2014 = vadd.xlane.f32.xlu0 %v2013_v42 }
 0x6d9   :  { %v3221_v57 = vpop.eup %3220 }
 0x6da   :  { %v2016_v29 = vsel %vm961_vm12, %v3221_v57, 0.0 }
 0x6db   :  { %2017 = vadd.xlane.f32.xlu1 %v2016_v29 }
 0x70d   :  { %v1997_v52 = vpop.xlane.xlu0 %1996 }
 0x70e   :  { %3222 = vrcp.f32 %v1997_v52  ;;  %v5264_v52 = vld [vmem:[#allocation6_spill] sm:$0xff] }
 0x711   :  { %v2000_v3 = vpop.xlane.xlu1 %1999 }
 0x712   :  { %3224 = vrcp.f32 %v2000_v3 }
 0x715   :  { %v2003_v10 = vpop.xlane.xlu0 %2002 }
 0x716   :  { %3226 = vrcp.f32 %v2003_v10 }
 0x718   :  { %v3223_v35 = vpop.eup %3222 }
 0x719   :  { %v2027_v63 = vmul.f32 %v3223_v35, %v3207_v47  ;;  %v2006_v26 = vpop.xlane.xlu1 %2005 }
 0x71a   :  { %3228 = vrcp.f32 %v2006_v26 }
 0x71b   :  { %2887 = vmatmul.mubr.msk.f32.vlgmr.msra.gmra.mrb[32].mxu1 %vm961_vm12, %v2027_v63 }
 0x71c   :  { %v3225_v58 = vpop.eup %3224  ;;  %2129 = vmatprep.mubr.f32.mxu1 %v5262_v5 }
 0x71d   :  { %v2028_v46 = vmul.f32 %v3225_v58, %v3209_v41 }
 0x71f   :  { %2888 = vmatmul.mubr.msk.f32.gmra.mrb[34].mxu1 %vm961_vm12, %v2028_v46 }
 0x720   :  { %v3227_v21 = vpop.eup %3226  ;;  %2135 = vmatprep.mubr.f32.mxu1 %v5262_v5 }
 0x721   :  { %v2029_v20 = vmul.f32 %v3227_v21, %v3211_v24 }
 0x723   :  { %2889 = vmatmul.mubr.msk.f32.gmra.mrb[36].mxu1 %vm961_vm12, %v2029_v20 }
 0x724   :  { %v3229_v6 = vpop.eup %3228  ;;  %2141 = vmatprep.mubr.f32.mxu1 %v5262_v5 }
 0x725   :  { %v2030_v1 = vmul.f32 %v3229_v6, %v3213_v48 }
 0x727   :  { %2890 = vmatmul.mubr.msk.f32.gmra.mrb[38].mxu1 %vm961_vm12, %v2030_v1 }
 0x728   :  { %2147 = vmatprep.mubr.f32.mxu1 %v5262_v5 }
 0x75c   :  { %v2009_v39 = vpop.xlane.xlu0 %2008 }
 0x75d   :  { %3230 = vrcp.f32 %v2009_v39 }
 0x760   :  { %v2012_v36 = vpop.xlane.xlu1 %2011 }
 0x761   :  { %3232 = vrcp.f32 %v2012_v36 }
 0x764   :  { %v2015_v47 = vpop.xlane.xlu0 %2014 }
 0x765   :  { %3234 = vrcp.f32 %v2015_v47 }
 0x767   :  { %v3231_v4 = vpop.eup %3230 }
 0x768   :  { %v2018_v14 = vpop.xlane.xlu1 %2017  ;;  %v2031_v41 = vmul.f32 %v3231_v4, %v3215_v22 }
 0x769   :  { %3236 = vrcp.f32 %v2018_v14 }
 0x76a   :  { %2891 = vmatmul.mubr.msk.f32.gmra.mrb[40].mxu1 %vm961_vm12, %v2031_v41 }
 0x76b   :  { %v3233_v43 = vpop.eup %3232  ;;  %2153 = vmatprep.mubr.f32.mxu1 %v5262_v5 }
 0x76c   :  { %v2032_v24 = vmul.f32 %v3233_v43, %v3217_v49 }
 0x76e   :  { %2892 = vmatmul.mubr.msk.f32.gmra.mrb[42].mxu1 %vm961_vm12, %v2032_v24 }
 0x76f   :  { %v3235_v9 = vpop.eup %3234  ;;  %2159 = vmatprep.mubr.f32.mxu1 %v5262_v5 }
 0x770   :  { %v2033_v48 = vmul.f32 %v3235_v9, %v3219_v33 }
 0x772   :  { %2893 = vmatmul.mubr.msk.f32.gmra.mrb[44].mxu1 %vm961_vm12, %v2033_v48 }
 0x773   :  { %v3237_v11 = vpop.eup %3236  ;;  %2165 = vmatprep.mubr.f32.mxu1 %v5262_v5 }
 0x774   :  { %v2034_v12 = vmul.f32 %v3237_v11, %v3221_v57 }
 0x776   :  { %2894 = vmatmul.mubr.msk.f32.gmra.mrb[46].mxu1 %vm961_vm12, %v2034_v12 }
 0x7ee   :  { %v2125_v60 = vpop.f32.mrb[32].mxu1 }
 0x7ef   :  { %v2172_v13 = vmul.f32 %v2125_v60, %v3650_v15  ;;  %v2127_v2 = vpop.f32.mrb[33].mxu1  ;;  %v5263_v15 = vld [vmem:[#allocation5_spill] sm:$0xff] }
 0x7f0   :  { %v2173_v0 = vmul.f32 %v2127_v2, %v3652_v16 }
 0x7f2   :  { %v2131_v56 = vpop.f32.mrb[34].mxu1  ;;  %v2197_v27 = vsel %vm220_vm0, %v2173_v0, 0.0 }
 0x7f3   :  { %v2174_v51 = vmul.f32 %v2131_v56, %v3654_v17  ;;  %v2133_v30 = vpop.f32.mrb[35].mxu1 }
 0x7f4   :  { %v2175_v45 = vmul.f32 %v2133_v30, %v3658_v19 }
 0x7f5   :  { %v2188_v53 = vadd.f32 %v2174_v51, %v2172_v13 }
 0x7f6   :  { %v2198_v22 = vsel %vm220_vm0, %v2175_v45, 0.0  ;;  %v2137_v55 = vpop.f32.mrb[36].mxu1 }
 0x7f7   :  { %v2199_v25 = vadd.f32 %v2198_v22, %v2197_v27  ;;  %v2176_v49 = vmul.f32 %v2137_v55, %v3664_v23  ;;  %v2139_v31 = vpop.f32.mrb[37].mxu1 }
 0x7f8   :  { %v2177_v33 = vmul.f32 %v2139_v31, %v5263_v15 }
 0x7f9   :  { %v2189_v42 = vadd.f32 %v2188_v53, %v2176_v49 }
 0x7fa   :  { %v2200_v16 = vsel %vm220_vm0, %v2177_v33, 0.0  ;;  %v2143_v57 = vpop.f32.mrb[38].mxu1 }
 0x7fb   :  { %v2201_v17 = vadd.f32 %v2200_v16, %v2199_v25  ;;  %v2178_v29 = vmul.f32 %v2143_v57, %v3671_v28  ;;  %v2145_v19 = vpop.f32.mrb[39].mxu1 }
 0x7fc   :  { %v2179_v3 = vmul.f32 %v2145_v19, %v5264_v52 }
 0x7fd   :  { %v2190_v10 = vadd.f32 %v2189_v42, %v2178_v29 }
 0x7fe   :  { %v2202_v35 = vsel %vm220_vm0, %v2179_v3, 0.0 }
 0x7ff   :  { %v2191_v63 = vrot.slane %v2190_v10, 4  ;;  %v2203_v26 = vadd.f32 %v2202_v35, %v2201_v17 }
 0x801   :  { %v2192_v58 = vadd.f32 %v2191_v63, %v2190_v10  ;;  %v2204_v23 = vrot.slane %v2203_v26, 4 }
 0x803   :  { %v2193_v5 = vrot.slane %v2192_v58, 2  ;;  %v2205_v46 = vadd.f32 %v2204_v23, %v2203_v26 }
 0x805   :  { %v2194_v21 = vadd.f32 %v2193_v5, %v2192_v58  ;;  %v2206_v6 = vrot.slane %v2205_v46, 2 }
 0x807   :  { %v2195_v20 = vrot.slane %v2194_v21, 1  ;;  %v2207_v39 = vadd.f32 %v2206_v6, %v2205_v46 }
 0x809   :  { %v4726_v1 = vadd.f32 %v2195_v20, %v2194_v21  ;;  %v2208_v36 = vrot.slane %v2207_v39, 1 }
 0x80b   :  { %v2347_v28 = vand.u32 2139095040, %v4726_v1  ;;  %v4729_v4 = vadd.f32 %v2208_v36, %v2207_v39  ;;  %v2344_v2 = vand.u32 2147483647, %v4726_v1 }
 0x80d   :  { %v2348_v47 = vshrl.u32 %v2347_v28, 23  ;;  %v2450_v41 = vand.u32 2139095040, %v4729_v4  ;;  %v2351_v25 = vand.u32 8388607, %v2344_v2  ;;  %v5220_v10 = vand.u32 2147483647, %v4729_v4 }
 0x80f   :  { %v2899_v14 = vadd.s32 4294967169, %v2348_v47  ;;  %v2451_v24 = vshrl.u32 %v2450_v41, 23  ;;  %v2352_v52 = vor.u32 8388608, %v2351_v25 }
 0x811   :  { %v2354_v43 = vadd.s32 1, %v2899_v14  ;;  %v2903_v9 = vadd.s32 4294967169, %v2451_v24 }
 0x813   :  { %vm2355_vm12 = vcmp.gt.s32.totalorder %v2354_v43, 0  ;;  %v2457_v11 = vadd.s32 1, %v2903_v9 }
 0x814   :  { %v2356_v48 = vsel %vm2355_vm12, %v2354_v43, 0 }
 0x815   :  { %v2358_v12 = vand.u32 31, %v2356_v48  ;;  %vm2458_vm5 = vcmp.gt.s32.totalorder %v2457_v11, 0  ;;  %v4739_v51 = vshrl.u32 %v2356_v48, 5  ;;  %v2392_v48 = vshll.u32 %v2352_v52, 8 }
 0x816   :  { %v2459_v13 = vsel %vm2458_vm5, %v2457_v11, 0  ;;  %v2454_v11 = vand.u32 8388607, %v5220_v10 }
 0x817   :  { %v4732_v60 = vsub.s32 32, %v2358_v12  ;;  %v2370_v30 = vshll.u32 %v5246_v18, %v2358_v12  ;;  %v2461_v45 = vand.u32 31, %v2459_v13  ;;  %v2373_v55 = vshll.u32 %v5230_v61, %v2358_v12 }
 0x818   :  { %v2361_v31 = vshll.u32 %v5232_v7, %v2358_v12  ;;  %v2364_v15 = vshll.u32 %v5244_v32, %v2358_v12  ;;  %v2367_v33 = vshll.u32 %v5245_v8, %v2358_v12  ;;  %vm2379_vm6 = vcmp.lt.s32.totalorder %v4739_v51, 4 }
 0x819   :  { %v2371_v0 = vshrl.u32 %v5230_v61, %v4732_v60  ;;  %v2374_v56 = vshrl.u32 %v5231_v38, %v4732_v60  ;;  %v2362_v53 = vshrl.u32 %v5244_v32, %v4732_v60  ;;  %v2365_v27 = vshrl.u32 %v5245_v8, %v4732_v60 }
 0x81a   :  { %v2368_v22 = vshrl.u32 %v5246_v18, %v4732_v60  ;;  %v4754_v16 = vsub.s32 32, %v2461_v45  ;;  %vm2376_vm7 = vcmp.lt.s32.totalorder %v4739_v51, 1  ;;  %vm2378_vm8 = vcmp.lt.s32.totalorder %v4739_v51, 3 }
 0x81b   :  { %v2372_v49 = vor.u32 %v2371_v0, %v2370_v30  ;;  %v2375_v42 = vor.u32 %v2374_v56, %v2373_v55  ;;  %v2363_v57 = vor.u32 %v2362_v53, %v2361_v31  ;;  %v2366_v17 = vor.u32 %v2365_v27, %v2364_v15 }
 0x81c   :  { %v2369_v29 = vor.u32 %v2368_v22, %v2367_v33  ;;  %v2474_v35 = vshrl.u32 %v5230_v61, %v4754_v16  ;;  %vm2377_vm9 = vcmp.lt.s32.totalorder %v4739_v51, 2  ;;  %v2477_v58 = vshrl.u32 %v5231_v38, %v4754_v16 }
 0x81d   :  { %v2385_v19 = vsel %vm2379_vm6, %v2372_v49, 920167782  ;;  %v2389_v3 = vsel %vm2379_vm6, %v2375_v42, 1326507024  ;;  %v2384_v63 = vsel %vm2376_vm7, %v2363_v57, %v2366_v17  ;;  %v4777_v46 = vshrl.u32 %v2459_v13, 5 }
 0x81e   :  { %v2386_v26 = vsel %vm2378_vm8, %v2369_v29, %v2385_v19  ;;  %v2388_v23 = vsel %vm2376_vm7, %v2366_v17, %v2369_v29  ;;  %v2390_v5 = vsel %vm2378_vm8, %v2372_v49, %v2389_v3  ;;  %v2473_v21 = vshll.u32 %v5246_v18, %v2461_v45 }
 0x81f   :  { %v2465_v20 = vshrl.u32 %v5244_v32, %v4754_v16  ;;  %v2468_v6 = vshrl.u32 %v5245_v8, %v4754_v16  ;;  %v2471_v39 = vshrl.u32 %v5246_v18, %v4754_v16  ;;  %v2476_v28 = vshll.u32 %v5230_v61, %v2461_v45 }
 0x820   :  { %v2387_v36 = vsel %vm2377_vm9, %v2384_v63, %v2386_v26  ;;  %v2475_v47 = vor.u32 %v2474_v35, %v2473_v21  ;;  %v2464_v14 = vshll.u32 %v5232_v7, %v2461_v45  ;;  %v2467_v41 = vshll.u32 %v5244_v32, %v2461_v45 }
 0x821   :  { %v2470_v43 = vshll.u32 %v5245_v8, %v2461_v45  ;;  %v2478_v24 = vor.u32 %v2477_v58, %v2476_v28  ;;  %v2391_v9 = vsel %vm2377_vm9, %v2388_v23, %v2390_v5  ;;  %vm2482_vm10 = vcmp.lt.s32.totalorder %v4777_v46, 4 }
 0x822   :  { %v2466_v12 = vor.u32 %v2465_v20, %v2464_v14  ;;  %v2469_v13 = vor.u32 %v2468_v6, %v2467_v41  ;;  %v4797_v56 = vmul.u32.u64.low %v2392_v48, %v2387_v36  ;;  %v4798_v30 = vmul.u32.u64.high %v2392_v48, %v2387_v36, %v4797_v56 }
 0x823   :  { %v2472_v0 = vor.u32 %v2471_v39, %v2470_v43  ;;  %v2488_v45 = vsel %vm2482_vm10, %v2475_v47, 920167782  ;;  %v4803_v53 = vmul.u32.u64.low %v2392_v48, %v2391_v9  ;;  %v4804_v27 = vmul.u32.u64.high %v2392_v48, %v2391_v9, %v4803_v53 }
 0x824   :  { %v2492_v22 = vsel %vm2482_vm10, %v2478_v24, 1326507024  ;;  %vm2479_vm11 = vcmp.lt.s32.totalorder %v4777_v46, 1  ;;  %vm2481_vm14 = vcmp.lt.s32.totalorder %v4777_v46, 3  ;;  %v2455_v55 = vor.u32 8388608, %v2454_v11 }
 0x825   :  { %v2487_v25 = vsel %vm2479_vm11, %v2466_v12, %v2469_v13  ;;  %v2489_v49 = vsel %vm2481_vm14, %v2472_v0, %v2488_v45  ;;  %v2381_v31 = vsel %vm2379_vm6, %v2369_v29, 2102212464  ;;  %v2491_v15 = vsel %vm2479_vm11, %v2469_v13, %v2472_v0 }
 0x826   :  { %v2493_v33 = vsel %vm2481_vm14, %v2475_v47, %v2492_v22  ;;  %v2360_v42 = vshrl.u32 %v5232_v7, %v4732_v60  ;;  %vm2480_vm15 = vcmp.lt.s32.totalorder %v4777_v46, 2  ;;  %v2382_v29 = vsel %vm2378_vm8, %v2366_v17, %v2381_v31 }
 0x827   :  { %v2490_v19 = vsel %vm2480_vm15, %v2487_v25, %v2489_v49  ;;  %v2494_v35 = vsel %vm2480_vm15, %v2491_v15, %v2493_v33  ;;  %v2495_v63 = vshll.u32 %v2455_v55, 8  ;;  %v2402_v60 = vadd.s32 1, %v4798_v30 }
 0x828   :  { %v2380_v3 = vsel %vm2376_vm7, %v2360_v42, %v2363_v57  ;;  %vm2401_vm1 = vc.u32 %v4804_v27, %v4797_v56  ;;  %v2484_v47 = vsel %vm2482_vm10, %v2472_v0, 2102212464  ;;  %v4851_v41 = vmul.f32 0.70710677, %v4726_v1 }
 0x829   :  { %v4836_v5 = vmul.u32.u64.low %v2495_v63, %v2490_v19  ;;  %v4837_v21 = vmul.u32.u64.high %v2495_v63, %v2490_v19, %v4836_v5  ;;  %v2383_v57 = vsel %vm2377_vm9, %v2380_v3, %v2382_v29  ;;  %v2403_v28 = vsel %vm2401_vm1, %v2402_v60, %v4798_v30 }
 0x82a   :  { %v4842_v17 = vmul.u32.u64.low %v2495_v63, %v2494_v35  ;;  %v4843_v20 = vmul.u32.u64.high %v2495_v63, %v2494_v35, %v4842_v17  ;;  %v2399_v36 = vmul.u32 %v2392_v48, %v2383_v57  ;;  %v2463_v51 = vshrl.u32 %v5232_v7, %v4754_v16 }
 0x82b   :  { %v4858_v9 = vmul.f32 0.70710677, %v4729_v4  ;;  %v2485_v45 = vsel %vm2481_vm14, %v2469_v13, %v2484_v47  ;;  %v2505_v53 = vadd.s32 1, %v4837_v21  ;;  %v4868_v55 = vand.u32 2147483647, %v4851_v41 }
 0x82c   :  { %v2483_v30 = vsel %vm2479_vm11, %v2463_v51, %v2466_v12  ;;  %vm2504_vm2 = vc.u32 %v4843_v20, %v4836_v5 }
 0x82d   :  { %v4874_v49 = vand.u32 2147483647, %v4858_v9  ;;  %v2486_v12 = vsel %vm2480_vm15, %v2483_v30, %v2485_v45  ;;  %v2506_v42 = vsel %vm2504_vm2, %v2505_v53, %v4837_v21 }
 0x82e   :  { %v2502_v3 = vmul.u32 %v2495_v63, %v2486_v12 }
 0x82f   :  { %v2245_v35 = vmul.f32 0.3275911, %v4874_v49 }
 0x830   :  { %v2507_v60 = vadd.s32 %v2506_v42, %v2502_v3 }
 0x831   :  { %v2249_v17 = vadd.f32 1.0, %v2245_v35 }
 0x83d   :  { %v2149_v52 = vpop.f32.mrb[40].mxu1 }
 0x83e   :  { %v2180_v26 = vmul.f32 %v2149_v52, %v3678_v34  ;;  %v2151_v58 = vpop.f32.mrb[41].mxu1  ;;  %v2244_v52 = vmul.f32 0.3275911, %v4868_v55 }
 0x83f   :  { %v2181_v23 = vmul.f32 %v2151_v58, %v3680_v37 }
 0x840   :  { %v2248_v57 = vadd.f32 1.0, %v2244_v52  ;;  %v2293_v52 = vsub.f32 0.0, %v4874_v49 }
 0x841   :  { %v2155_v6 = vpop.f32.mrb[42].mxu1  ;;  %v2219_v43 = vsel %vm220_vm0, %v2181_v23, 0.0 }
 0x842   :  { %v2182_v34 = vmul.f32 %v2155_v6, %v3682_v40  ;;  %v2157_v39 = vpop.f32.mrb[43].mxu1  ;;  %3238 = vrcp.f32 %v2248_v57 }
 0x843   :  { %v2183_v37 = vmul.f32 %v2157_v39, %v3686_v44  ;;  %v2404_v44 = vadd.s32 %v2403_v28, %v2399_v36  ;;  %3240 = vrcp.f32 %v2249_v17 }
 0x844   :  { %v2210_v14 = vadd.f32 %v2182_v34, %v2180_v26  ;;  %v2508_v34 = vadd.s32 536870912, %v2507_v60 }
 0x845   :  { %v2220_v40 = vsel %vm220_vm0, %v2183_v37, 0.0  ;;  %v2161_v24 = vpop.f32.mrb[44].mxu1  ;;  %v2405_v15 = vadd.s32 536870912, %v2404_v44 }
 0x846   :  { %v2221_v48 = vadd.f32 %v2220_v40, %v2219_v43  ;;  %v2184_v11 = vmul.f32 %v2161_v24, %v3692_v50  ;;  %v2163_v0 = vpop.f32.mrb[45].mxu1  ;;  %v4889_v36 = vshrl.u32 %v2508_v34, 30 }
 0x847   :  { %v2185_v16 = vmul.f32 %v2163_v0, %v3695_v54  ;;  %v4884_v58 = vshrl.u32 %v2405_v15, 30 }
 0x848   :  { %v2211_v22 = vadd.f32 %v2210_v14, %v2184_v11  ;;  %v2510_v40 = vshll.u32 %v4889_v36, 30 }
 0x849   :  { %v2222_v50 = vsel %vm220_vm0, %v2185_v16, 0.0  ;;  %v2167_v25 = vpop.f32.mrb[46].mxu1  ;;  %v2407_v21 = vshll.u32 %v4884_v58, 30 }
 0x84a   :  { %v2223_v13 = vadd.f32 %v2222_v50, %v2221_v48  ;;  %v2186_v54 = vmul.f32 %v2167_v25, %v3701_v59  ;;  %v2169_v31 = vpop.f32.mrb[47].mxu1  ;;  %v2292_v25 = vsub.f32 0.0, %v4868_v55 }
 0x84b   :  { %v2187_v33 = vmul.f32 %v2169_v31, %v3708_v62  ;;  %v4887_v37 = vsub.s32 %v2404_v44, %v2407_v21  ;;  %v4899_v44 = vsub.s32 %v2507_v60, %v2510_v40 }
 0x84c   :  { %v2212_v19 = vadd.f32 %v2211_v22, %v2186_v54  ;;  %v4896_v11 = vpop.eup %3238  ;;  %v2296_v3 = vmul.f32 %v2292_v25, %v4868_v55 }
 0x84d   :  { %v2224_v29 = vsel %vm220_vm0, %v2187_v33, 0.0  ;;  %v2410_v43 = vsub.s32 0, %v4887_v37  ;;  %v4901_v45 = vpop.eup %3240  ;;  %v2256_v50 = vmul.f32 1.0614054, %v4896_v11  ;;  %v2513_v54 = vsub.s32 0, %v4899_v44 }
 0x84e   :  { %v2213_v26 = vrot.slane %v2212_v19, 4  ;;  %v2225_v46 = vadd.f32 %v2224_v29, %v2223_v13  ;;  %v2257_v12 = vmul.f32 1.0614054, %v4901_v45 }
 0x84f   :  { %v2900_v30 = vmin.u32 %v2410_v43, %v4887_v37  ;;  %v2260_v35 = vadd.f32 -1.4531521, %v2256_v50  ;;  %v4922_v60 = vmin.u32 %v2513_v54, %v4899_v44 }
 0x850   :  { %v2214_v59 = vadd.f32 %v2213_v26, %v2212_v19  ;;  %v2226_v23 = vrot.slane %v2225_v46, 4  ;;  %v2261_v26 = vadd.f32 -1.4531521, %v2257_v12 }
 0x851   :  { %v2412_v13 = vclz %v2900_v30 }
 0x852   :  { %v2215_v62 = vrot.slane %v2214_v59, 2  ;;  %v2227_v6 = vadd.f32 %v2226_v23, %v2225_v46 }
 0x853   :  { %v2901_v46 = vadd.s32 4294967294, %v2412_v13 }
 0x854   :  { %v2216_v39 = vadd.f32 %v2215_v62, %v2214_v59  ;;  %v2228_v63 = vrot.slane %v2227_v6, 2 }
 0x855   :  { %vm2902_vm6 = vcmp.lt.s32.totalorder %v2901_v46, 0 }
 0x856   :  { %v2217_v28 = vrot.slane %v2216_v39, 1  ;;  %v2229_v47 = vadd.f32 %v2228_v63, %v2227_v6 }
 0x858   :  { %v4891_v14 = vadd.f32 %v2217_v28, %v2216_v39  ;;  %v2230_v24 = vrot.slane %v2229_v47, 1 }
 0x85a   :  { %v2553_v51 = vand.u32 2139095040, %v4891_v14  ;;  %v4903_v16 = vadd.f32 %v2230_v24, %v2229_v47  ;;  %v5219_v53 = vand.u32 2147483647, %v4891_v14  ;;  %v4912_v15 = vmul.f32 0.70710677, %v4891_v14 }
 0x85c   :  { %v2554_v48 = vshrl.u32 %v2553_v51, 23  ;;  %v2656_v31 = vand.u32 2139095040, %v4903_v16  ;;  %v4915_v33 = vmul.f32 0.70710677, %v4903_v16  ;;  %v2557_v19 = vand.u32 8388607, %v5219_v53 }
 0x85d   :  { %v4925_v23 = vand.u32 2147483647, %v4912_v15 }
 0x85e   :  { %v2907_v0 = vadd.s32 4294967169, %v2554_v48  ;;  %v2657_v59 = vshrl.u32 %v2656_v31, 23  ;;  %v4928_v57 = vand.u32 2147483647, %v4915_v33  ;;  %v2558_v62 = vor.u32 8388608, %v2557_v19 }
 0x85f   :  { %v2246_v24 = vmul.f32 0.3275911, %v4925_v23 }
 0x860   :  { %v2560_v22 = vadd.s32 1, %v2907_v0  ;;  %v2911_v30 = vadd.s32 4294967169, %v2657_v59  ;;  %v2598_v54 = vshll.u32 %v2558_v62, 8 }
 0x861   :  { %v2250_v62 = vadd.f32 1.0, %v2246_v24 }
 0x862   :  { %vm2561_vm0 = vcmp.gt.s32.totalorder %v2560_v22, 0  ;;  %v2663_v10 = vadd.s32 1, %v2911_v30  ;;  %v2265_v30 = vmul.f32 %v4901_v45, %v2261_v26 }
 0x863   :  { %v2562_v42 = vsel %vm2561_vm0, %v2560_v22, 0  ;;  %3242 = vrcp.f32 %v2250_v62  ;;  %vm2346_vm0 = vcmp.lt.s32.totalorder %v4726_v1, 0 }
 0x864   :  { %v2564_v29 = vand.u32 31, %v2562_v42  ;;  %v2563_v6 = vshrl.u32 %v2562_v42, 5  ;;  %vm2664_vm7 = vcmp.gt.s32.totalorder %v2663_v10, 0 }
 0x866   :  { %v2565_v17 = vsub.s32 32, %v2564_v29  ;;  %v2567_v21 = vshll.u32 %v5232_v7, %v2564_v29  ;;  %v2570_v55 = vshll.u32 %v5244_v32, %v2564_v29  ;;  %v2573_v63 = vshll.u32 %v5245_v8, %v2564_v29 }
 0x867   :  { %v2576_v28 = vshll.u32 %v5246_v18, %v2564_v29  ;;  %v2579_v43 = vshll.u32 %v5230_v61, %v2564_v29  ;;  %vm2582_vm3 = vcmp.lt.s32.totalorder %v2563_v6, 1  ;;  %vm2585_vm4 = vcmp.lt.s32.totalorder %v2563_v6, 4 }
 0x868   :  { %v2568_v34 = vshrl.u32 %v5244_v32, %v2565_v17  ;;  %v2571_v39 = vshrl.u32 %v5245_v8, %v2565_v17  ;;  %v2574_v47 = vshrl.u32 %v5246_v18, %v2565_v17  ;;  %v2577_v51 = vshrl.u32 %v5230_v61, %v2565_v17 }
 0x869   :  { %v2580_v40 = vshrl.u32 %v5231_v38, %v2565_v17  ;;  %v2566_v12 = vshrl.u32 %v5232_v7, %v2565_v17  ;;  %vm2584_vm12 = vcmp.lt.s32.totalorder %v2563_v6, 3  ;;  %vm2583_vm5 = vcmp.lt.s32.totalorder %v2563_v6, 2 }
 0x86a   :  { %v2569_v48 = vor.u32 %v2568_v34, %v2567_v21  ;;  %v2572_v0 = vor.u32 %v2571_v39, %v2570_v55  ;;  %v2575_v22 = vor.u32 %v2574_v47, %v2573_v63  ;;  %v2578_v50 = vor.u32 %v2577_v51, %v2576_v28 }
 0x86b   :  { %v2581_v25 = vor.u32 %v2580_v40, %v2579_v43  ;;  %v2247_v17 = vmul.f32 0.3275911, %v4928_v57  ;;  %v2297_v6 = vmul.f32 %v2293_v52, %v4874_v49  ;;  %v2264_v40 = vmul.f32 %v4896_v11, %v2260_v35 }
 0x86c   :  { %v2590_v13 = vsel %vm2582_vm3, %v2569_v48, %v2572_v0  ;;  %v2587_v31 = vsel %vm2585_vm4, %v2575_v22, 2102212464  ;;  %v2591_v42 = vsel %vm2585_vm4, %v2578_v50, 920167782  ;;  %v2594_v19 = vsel %vm2582_vm3, %v2572_v0, %v2575_v22 }
 0x86d   :  { %v2592_v29 = vsel %vm2584_vm12, %v2575_v22, %v2591_v42  ;;  %v2595_v53 = vsel %vm2585_vm4, %v2581_v25, 1326507024  ;;  %v2586_v21 = vsel %vm2582_vm3, %v2566_v12, %v2569_v48  ;;  %v2588_v55 = vsel %vm2584_vm12, %v2572_v0, %v2587_v31 }
 0x86e   :  { %v2593_v59 = vsel %vm2583_vm5, %v2590_v13, %v2592_v29  ;;  %v2596_v34 = vsel %vm2584_vm12, %v2578_v50, %v2595_v53  ;;  %v2589_v43 = vsel %vm2583_vm5, %v2586_v21, %v2588_v55  ;;  %v2300_v48 = vmul.f32 1.442695, %v2296_v3 }
 0x86f   :  { %v2597_v39 = vsel %vm2583_vm5, %v2594_v19, %v2596_v34  ;;  %v4942_v63 = vmul.u32.u64.low %v2598_v54, %v2593_v59  ;;  %v4943_v28 = vmul.u32.u64.high %v2598_v54, %v2593_v59, %v4942_v63  ;;  %v2515_v53 = vclz %v4922_v60 }
 0x870   :  { %v4947_v47 = vmul.u32.u64.low %v2598_v54, %v2597_v39  ;;  %v4948_v51 = vmul.u32.u64.high %v2598_v54, %v2597_v39, %v4947_v47  ;;  %v2665_v0 = vsel %vm2664_vm7, %v2663_v10, 0  ;;  %v4955_v22 = vsel %vm2902_vm6, 0, %v2901_v46 }
 0x871   :  { %v2608_v24 = vadd.s32 1, %v4943_v28  ;;  %v2667_v50 = vand.u32 31, %v2665_v0  ;;  %v2251_v25 = vadd.f32 1.0, %v2247_v17  ;;  %v2605_v12 = vmul.u32 %v2598_v54, %v2589_v43 }
 0x872   :  { %vm2607_vm8 = vc.u32 %v4948_v51, %v4942_v63  ;;  %v2420_v3 = vsub.s32 4294967266, %v4955_v22  ;;  %v2905_v10 = vadd.s32 4294967294, %v2515_v53  ;;  %v2268_v26 = vadd.f32 1.4214138, %v2264_v40 }
 0x873   :  { %v2609_v49 = vsel %vm2607_vm8, %v2608_v24, %v4943_v28  ;;  %v2668_v52 = vsub.s32 32, %v2667_v50  ;;  %3244 = vpow2.f32 %v2300_v48  ;;  %v4962_v46 = vmul.f32 1.442695, %v2297_v6 }
 0x874   :  { %v2610_v35 = vadd.s32 %v2609_v49, %v2605_v12  ;;  %v2400_v60 = vadd.s32 %v4797_v56, %v4804_v27  ;;  %3246 = vrcp.f32 %v2251_v25  ;;  %v4966_v13 = vadd.f32 1.4214138, %v2265_v30  ;;  %v4985_v30 = vpop.eup %3242 }
 0x875   :  { %v2653_v31 = vand.u32 2147483647, %v4903_v16  ;;  %v2416_v42 = vsub.s32 32, %v4955_v22  ;;  %v2671_v19 = vshrl.u32 %v5244_v32, %v2668_v52  ;;  %v2674_v29 = vshrl.u32 %v5245_v8, %v2668_v52 }
 0x876   :  { %v2611_v54 = vadd.s32 536870912, %v2610_v35  ;;  %v2680_v21 = vshrl.u32 %v5230_v61, %v2668_v52  ;;  %v2421_v55 = vadd.s32 127, %v2420_v3  ;;  %vm2906_vm9 = vcmp.lt.s32.totalorder %v2905_v10, 0 }
 0x877   :  { %v2677_v56 = vshrl.u32 %v5246_v18, %v2668_v52  ;;  %v2670_v27 = vshll.u32 %v5232_v7, %v2667_v50  ;;  %v2673_v34 = vshll.u32 %v5244_v32, %v2667_v50  ;;  %v2679_v39 = vshll.u32 %v5246_v18, %v2667_v50 }
 0x878   :  { %v4973_v59 = vshrl.u32 %v2611_v54, 30  ;;  %v2683_v28 = vshrl.u32 %v5231_v38, %v2668_v52  ;;  %v2660_v62 = vand.u32 8388607, %v2653_v31  ;;  %v2666_v47 = vshrl.u32 %v2665_v0, 5 }
 0x879   :  { %v2676_v6 = vshll.u32 %v5245_v8, %v2667_v50  ;;  %v2672_v43 = vor.u32 %v2671_v19, %v2670_v27  ;;  %v2675_v40 = vor.u32 %v2674_v29, %v2673_v34  ;;  %v2681_v48 = vor.u32 %v2680_v21, %v2679_v39 }
 0x87a   :  { %v2613_v17 = vshll.u32 %v4973_v59, 30  ;;  %v2682_v53 = vshll.u32 %v5230_v61, %v2667_v50  ;;  %v2272_v32 = vmul.f32 %v4896_v11, %v2268_v26  ;;  %v4989_v18 = vsel %vm2906_vm9, 0, %v2905_v10 }
 0x87b   :  { %v2678_v24 = vor.u32 %v2677_v56, %v2676_v6  ;;  %v2417_v0 = vshll.u32 %v4887_v37, %v4955_v22  ;;  %v2418_v25 = vshrl.u32 %v2400_v60, %v2416_v42  ;;  %v2422_v8 = vshll.u32 %v2421_v55, 23 }
 0x87c   :  { %v4991_v38 = vsub.s32 %v2610_v35, %v2613_v17  ;;  %v2684_v12 = vor.u32 %v2683_v28, %v2682_v53  ;;  %v2661_v3 = vor.u32 8388608, %v2660_v62  ;;  %vm2685_vm10 = vcmp.lt.s32.totalorder %v2666_v47, 1 }
 0x87d   :  { %vm2688_vm11 = vcmp.lt.s32.totalorder %v2666_v47, 4  ;;  %v4996_v61 = vpop.eup %3244  ;;  %v2258_v50 = vmul.f32 1.0614054, %v4985_v30  ;;  %v2523_v10 = vsub.s32 4294967266, %v4989_v18  ;;  %v2693_v35 = vsel %vm2685_vm10, %v2672_v43, %v2675_v40 }
 0x87e   :  { %v2616_v49 = vsub.s32 0, %v4991_v38  ;;  %v2694_v26 = vsel %vm2688_vm11, %v2681_v48, 920167782  ;;  %v5001_v54 = vpop.eup %3246  ;;  %v2669_v22 = vshrl.u32 %v5232_v7, %v2668_v52  ;;  %vm2687_vm14 = vcmp.lt.s32.totalorder %v2666_v47, 3 }
 0x87f   :  { %v2697_v60 = vsel %vm2685_vm10, %v2675_v40, %v2678_v24  ;;  %vm2686_vm15 = vcmp.lt.s32.totalorder %v2666_v47, 2  ;;  %v2690_v42 = vsel %vm2688_vm11, %v2678_v24, 2102212464  ;;  %v2695_v19 = vsel %vm2687_vm14, %v2678_v24, %v2694_v26 }
 0x880   :  { %v2908_v37 = vmin.u32 %v2616_v49, %v4991_v38  ;;  %v2698_v29 = vsel %vm2688_vm11, %v2684_v12, 1326507024  ;;  %v2696_v55 = vsel %vm2686_vm15, %v2693_v35, %v2695_v19  ;;  %v2701_v27 = vshll.u32 %v2661_v3, 8 }
 0x881   :  { %v2699_v56 = vsel %vm2687_vm14, %v2681_v48, %v2698_v29  ;;  %v2259_v34 = vmul.f32 1.0614054, %v5001_v54  ;;  %v2524_v39 = vadd.s32 127, %v2523_v10  ;;  %v2689_v28 = vsel %vm2685_vm10, %v2669_v22, %v2672_v43 }
 0x882   :  { %v2618_v21 = vclz %v2908_v37  ;;  %v2700_v17 = vsel %vm2686_vm15, %v2697_v60, %v2699_v56  ;;  %v2691_v52 = vsel %vm2687_vm14, %v2675_v40, %v2690_v42  ;;  %v2423_v53 = vor.u32 4788187, %v2422_v8 }
 0x883   :  { %v5010_v62 = vmul.u32.u64.low %v2701_v27, %v2700_v17  ;;  %v5011_v6 = vmul.u32.u64.high %v2701_v27, %v2700_v17, %v5010_v62  ;;  %v2519_v24 = vsub.s32 32, %v4989_v18  ;;  %v2262_v48 = vadd.f32 -1.4531521, %v2258_v50 }
 0x884   :  { %v2909_v7 = vadd.s32 4294967294, %v2618_v21  ;;  %v5014_v12 = vmul.u32.u64.low %v2701_v27, %v2696_v55  ;;  %v5015_v49 = vmul.u32.u64.high %v2701_v27, %v2696_v55, %v5014_v12  ;;  %v2273_v3 = vmul.f32 %v4901_v45, %v4966_v13 }
 0x885   :  { %v2503_v43 = vadd.s32 %v4836_v5, %v4843_v20  ;;  %v2419_v10 = vor.u32 %v2418_v25, %v2417_v0  ;;  %v2525_v40 = vshll.u32 %v2524_v39, 23  ;;  %v2692_v26 = vsel %vm2686_vm15, %v2689_v28, %v2691_v52 }
 0x886   :  { %vm2910_vm1 = vcmp.lt.s32.totalorder %v2909_v7, 0  ;;  %v2263_v8 = vadd.f32 -1.4531521, %v2259_v34  ;;  %v2276_v37 = vadd.f32 -0.28449672, %v2272_v32  ;;  %vm2710_vm2 = vc.u32 %v5011_v6, %v5014_v12 }
 0x887   :  { %v2621_v35 = vsel %vm2910_vm1, 0, %v2909_v7  ;;  %v2424_v42 = vand.u32 2147483647, %v2423_v53  ;;  %v2521_v19 = vshrl.u32 %v2503_v43, %v2519_v24  ;;  %v2711_v13 = vadd.s32 1, %v5015_v49 }
 0x888   :  { %v2622_v22 = vsub.s32 32, %v2621_v35  ;;  %v2626_v60 = vsub.s32 4294967266, %v2621_v35  ;;  %v2266_v50 = vmul.f32 %v4985_v30, %v2262_v48  ;;  %v2606_v5 = vadd.s32 %v4942_v63, %v4948_v51 }
 0x889   :  { %v2708_v0 = vmul.u32 %v2701_v27, %v2692_v26  ;;  %v2426_v47 = vcvt.s32.f32 %v2419_v10  ;;  %v2520_v32 = vshll.u32 %v4899_v44, %v4989_v18  ;;  %v2526_v25 = vor.u32 4788187, %v2525_v40 }
 0x88a   :  { %v2627_v20 = vadd.s32 127, %v2626_v60  ;;  %v2712_v29 = vsel %vm2710_vm2, %v2711_v13, %v5015_v49  ;;  %v2267_v21 = vmul.f32 %v5001_v54, %v2263_v8  ;;  %v2624_v55 = vshrl.u32 %v2606_v5, %v2622_v22 }
 0x88b   :  { %v2713_v34 = vadd.s32 %v2712_v29, %v2708_v0  ;;  %v2277_v39 = vadd.f32 -0.28449672, %v2273_v3  ;;  %v2280_v28 = vmul.f32 %v4896_v11, %v2276_v37  ;;  %v2427_v17 = vmul.f32 %v2426_v47, %v2424_v42 }
 0x88c   :  { %v2628_v56 = vshll.u32 %v2627_v20, 23  ;;  %v2522_v7 = vor.u32 %v2521_v19, %v2520_v32  ;;  %v2270_v63 = vadd.f32 1.4214138, %v2266_v50  ;;  %v2623_v51 = vshll.u32 %v4991_v38, %v2621_v35 }
 0x88d   :  { %v2714_v52 = vadd.s32 536870912, %v2713_v34  ;;  %v2294_v44 = vsub.f32 0.0, %v4925_v23  ;;  %v2527_v18 = vand.u32 2147483647, %v2526_v25  ;;  %v2271_v62 = vadd.f32 1.4214138, %v2267_v21 }
 0x88e   :  { %v2629_v27 = vor.u32 4788187, %v2628_v56  ;;  %3248 = vpow2.f32 %v4962_v46  ;;  %v2625_v53 = vor.u32 %v2624_v55, %v2623_v51  ;;  %v2281_v49 = vmul.f32 %v4901_v45, %v2277_v39 }
 0x88f   :  { %v5037_v24 = vshrl.u32 %v2714_v52, 30  ;;  %v2284_v48 = vadd.f32 0.2548296, %v2280_v28  ;;  %v2295_v3 = vsub.f32 0.0, %v4928_v57  ;;  %v2529_v43 = vcvt.s32.f32 %v2522_v7 }
 0x890   :  { %v2274_v10 = vmul.f32 %v4985_v30, %v2270_v63  ;;  %v2428_v38 = vxor.u32 2147483648, %v2427_v17  ;;  %v2630_v40 = vand.u32 2147483647, %v2629_v27  ;;  %v2298_v26 = vmul.f32 %v2294_v44, %v4925_v23 }
 0x891   :  { %v2716_v35 = vshll.u32 %v5037_v24, 30  ;;  %v2530_v8 = vmul.f32 %v2529_v43, %v2527_v18  ;;  %v2275_v46 = vmul.f32 %v5001_v54, %v2271_v62  ;;  %v2632_v37 = vcvt.s32.f32 %v2625_v53 }
 0x892   :  { %v2285_v60 = vadd.f32 0.2548296, %v2281_v49  ;;  %v2288_v42 = vmul.f32 %v4896_v11, %v2284_v48  ;;  %v2299_v19 = vmul.f32 %v2295_v3, %v4928_v57  ;;  %v2278_v13 = vadd.f32 -0.28449672, %v2274_v10 }
 0x893   :  { %v2717_v22 = vsub.s32 %v2713_v34, %v2716_v35  ;;  %v2429_v50 = vsel %vm2346_vm0, %v2428_v38, %v2427_v17  ;;  %v2633_v5 = vmul.f32 %v2632_v37, %v2630_v40  ;;  %v2304_v0 = vmul.f32 1.442695, %v2298_v26 }
 0x894   :  { %v2531_v23 = vxor.u32 2147483648, %v2530_v8  ;;  %v2279_v47 = vadd.f32 -0.28449672, %v2275_v46  ;;  %vm5052_vm3 = vcmp.le.f32.partialorder %v2344_v2, 0.7853982  ;;  %v2289_v57 = vmul.f32 %v4901_v45, %v2285_v60 }
 0x895   :  { %v2719_v20 = vsub.s32 0, %v2717_v22  ;;  %v2306_v25 = vmul.f32 1.442695, %v2299_v19  ;;  %v2308_v29 = vmul.f32 %v4996_v61, %v2288_v42  ;;  %v2432_v21 = vsel %vm5052_vm3, %v4726_v1, %v2429_v50 }
 0x896   :  { %v2282_v56 = vmul.f32 %v4985_v30, %v2278_v13  ;;  %vm2449_vm4 = vcmp.lt.s32.totalorder %v4729_v4, 0  ;;  %v2634_v34 = vxor.u32 2147483648, %v2633_v5  ;;  %3250 = vpow2.f32 %v2304_v0 }
 0x897   :  { %v2912_v11 = vmin.u32 %v2719_v20, %v2717_v22  ;;  %v2430_v39 = vsub.s32 4, %v4884_v58  ;;  %v2532_v45 = vsel %vm2449_vm4, %v2531_v23, %v2530_v8  ;;  %v2283_v28 = vmul.f32 %v5001_v54, %v2279_v47 }
 0x898   :  { %v3249_v55 = vpop.eup %3248  ;;  %3252 = vcosq.f32 %v2432_v21  ;;  %v5267_v61 = vand.u32 2147483647, %v4729_v4  ;;  %v2312_v51 = vsub.f32 1.0, %v2308_v29  ;;  %vm2552_vm5 = vcmp.lt.s32.totalorder %v4891_v14, 0 }
 0x899   :  { %v2721_v2 = vclz %v2912_v11  ;;  %3254 = vpow2.f32 %v2306_v25  ;;  %v2309_v63 = vmul.f32 %v3249_v55, %v2289_v57  ;;  %v2286_v27 = vadd.f32 0.2548296, %v2282_v56 }
 0x89a   :  { %vm5069_vm12 = vcmp.le.f32.partialorder %v5267_v61, 0.7853982  ;;  %v2635_v44 = vsel %vm2552_vm5, %v2634_v34, %v2633_v5  ;;  %v2431_v18 = vsel %vm2346_vm0, %v2430_v39, %v4884_v58  ;;  %3256 = vsinq.f32 %v2432_v21 }
 0x89b   :  { %v2913_v7 = vadd.s32 4294967294, %v2721_v2  ;;  %v2535_v52 = vsel %vm5069_vm12, %v4729_v4, %v2532_v45  ;;  %v5270_v62 = vand.u32 2147483647, %v4891_v14  ;;  %v2287_v48 = vadd.f32 0.2548296, %v2283_v28 }
 0x89c   :  { %v2709_v3 = vadd.s32 %v5014_v12, %v5011_v6  ;;  %v2313_v38 = vsub.f32 1.0, %v2309_v63  ;;  %v2320_v40 = vsub.f32 0.0, %v2312_v51  ;;  %3258 = vcosq.f32 %v2535_v52 }
 0x89d   :  { %vm2914_vm6 = vcmp.lt.s32.totalorder %v2913_v7, 0  ;;  %vm5084_vm7 = vcmp.le.f32.partialorder %v5270_v62, 0.7853982  ;;  %v2290_v35 = vmul.f32 %v4985_v30, %v2286_v27  ;;  %v2433_v37 = vsel %vm5052_vm3, 0, %v2431_v18 }
 0x89e   :  { %v2724_v49 = vsel %vm2914_vm6, 0, %v2913_v7  ;;  %v2638_v58 = vsel %vm5084_vm7, %v4891_v14, %v2635_v44  ;;  %3260 = vsinq.f32 %v2535_v52  ;;  %v2291_v6 = vmul.f32 %v5001_v54, %v2287_v48 }
 0x89f   :  { %v2725_v43 = vsub.s32 32, %v2724_v49  ;;  %v2729_v10 = vsub.s32 4294967266, %v2724_v49  ;;  %v2726_v26 = vshll.u32 %v2717_v22, %v2724_v49  ;;  %3262 = vcosq.f32 %v2638_v58 }
 0x8a0   :  { %v3251_v42 = vpop.eup %3250  ;;  %vm2316_vm8 = vcmp.lt.f32.partialorder %v4851_v41, 0.0  ;;  %v2533_v19 = vsub.s32 4, %v4889_v36  ;;  %3264 = vsinq.f32 %v2638_v58  ;;  %v2321_v22 = vsub.f32 0.0, %v2313_v38 }
 0x8a1   :  { %v2727_v8 = vshrl.u32 %v2709_v3, %v2725_v43  ;;  %v2730_v46 = vadd.s32 127, %v2729_v10  ;;  %v2310_v30 = vmul.f32 %v3251_v42, %v2290_v35  ;;  %v2324_v50 = vsel %vm2316_vm8, %v2320_v40, %v2312_v51 }
 0x8a2   :  { %v5099_v13 = vpop.eup %3252  ;;  %v5101_v0 = vand.u32 3, %v2433_v37  ;;  %v2636_v54 = vsub.s32 4, %v4973_v59  ;;  %v2232_v41 = vmul.f32 0.5, %v4726_v1  ;;  %vm2317_vm9 = vcmp.lt.f32.partialorder %v4858_v9, 0.0 }
 0x8a3   :  { %v2728_v12 = vor.u32 %v2727_v8, %v2726_v26  ;;  %v2731_v60 = vshll.u32 %v2730_v46, 23  ;;  %v3255_v20 = vpop.eup %3254  ;;  %v2328_v57 = vadd.f32 1.0, %v2324_v50  ;;  %v2534_v25 = vsel %vm2449_vm4, %v2533_v19, %v4889_v36 }
 0x8a4   :  { %v2311_v23 = vmul.f32 %v3255_v20, %v2291_v6  ;;  %v3257_v11 = vpop.eup %3256  ;;  %v2314_v29 = vsub.f32 1.0, %v2310_v30  ;;  %v2325_v21 = vsel %vm2317_vm9, %v2321_v22, %v2313_v38  ;;  %v5110_v55 = vadd.f32 -1.0, %v4726_v1 }
 0x8a5   :  { %v2732_v5 = vor.u32 4788187, %v2731_v60  ;;  %v2735_v32 = vcvt.s32.f32 %v2728_v12  ;;  %v2233_v2 = vmul.f32 0.5, %v4729_v4  ;;  %v5114_v39 = vadd.f32 -1.0, %v4729_v4 }
 0x8a6   :  { %v3259_v34 = vpop.eup %3258  ;;  %vm2439_vm10 = vcmp.eq.s32.totalorder %v5101_v0, 0  ;;  %v2637_v9 = vsel %vm2552_vm5, %v2636_v54, %v4973_v59  ;;  %v2315_v45 = vsub.f32 1.0, %v2311_v23  ;;  %vm2442_vm11 = vcmp.eq.s32.totalorder %v5101_v0, 2 }
 0x8a7   :  { %v2733_v47 = vand.u32 2147483647, %v2732_v5  ;;  %v2536_v36 = vsel %vm5069_vm12, 0, %v2534_v25  ;;  %v2329_v7 = vadd.f32 1.0, %v2325_v21  ;;  %v5123_v63 = vmul.f32 %v2328_v57, %v2232_v41 }
 0x8a8   :  { %v3261_v61 = vpop.eup %3260  ;;  %vm5127_vm14 = vcmp.le.f32.partialorder %v2653_v31, 0.7853982  ;;  %vm2655_vm15 = vcmp.lt.s32.totalorder %v4903_v16, 0  ;;  %v2322_v27 = vsub.f32 0.0, %v2314_v29  ;;  %vm2438_vm1 = vcmp.lt.s32.totalorder %v5101_v0, 2 }
 0x8a9   :  { %v2736_v56 = vmul.f32 %v2735_v32, %v2733_v47  ;;  %v3263_v59 = vpop.eup %3262  ;;  %v2639_v17 = vsel %vm5084_vm7, 0, %v2637_v9  ;;  %v2739_v44 = vsub.s32 4, %v5037_v24  ;;  %v2440_v62 = vxor.u32 2147483648, %v3257_v11 }
 0x8aa   :  { %v3265_v18 = vpop.eup %3264  ;;  %v2443_v31 = vxor.u32 2147483648, %v5099_v13  ;;  %v2540_v49 = vand.u32 3, %v2536_v36  ;;  %v2323_v3 = vsub.f32 0.0, %v2315_v45  ;;  %v2543_v43 = vxor.u32 2147483648, %v3261_v61 }
 0x8ab   :  { %v2737_v28 = vxor.u32 2147483648, %v2736_v56  ;;  %v2546_v10 = vxor.u32 2147483648, %v3259_v34  ;;  %vm2318_vm2 = vcmp.lt.f32.partialorder %v4912_v15, 0.0  ;;  %v2333_v53 = vmul.f32 %v2329_v7, %v2233_v2 }
 0x8ac   :  { %vm2436_vm0 = vweird.f32 %v4726_v1  ;;  %v2643_v38 = vand.u32 3, %v2639_v17  ;;  %v2326_v40 = vsel %vm2318_vm2, %v2322_v27, %v2314_v29  ;;  %v2646_v58 = vxor.u32 2147483648, %v3265_v18 }
 0x8ad   :  { %v2738_v52 = vsel %vm2655_vm15, %v2737_v28, %v2736_v56  ;;  %v2649_v35 = vxor.u32 2147483648, %v3263_v59  ;;  %v2740_v26 = vsel %vm2655_vm15, %v2739_v44, %v5037_v24  ;;  %vm2319_vm3 = vcmp.lt.f32.partialorder %v4915_v33, 0.0 }
 0x8ae   :  { %v2741_v48 = vsel %vm5127_vm14, %v4903_v16, %v2738_v52  ;;  %v2444_v8 = vsel %vm2442_vm11, %v2443_v31, %v3257_v11  ;;  %vm2542_vm4 = vcmp.eq.s32.totalorder %v2540_v49, 0  ;;  %vm2545_vm12 = vcmp.eq.s32.totalorder %v2540_v49, 2 }
 0x8af   :  { %3266 = vcosq.f32 %v2741_v48  ;;  %v2327_v15 = vsel %vm2319_vm3, %v2323_v3, %v2315_v45  ;;  %v2441_v46 = vsel %vm2439_vm10, %v5099_v13, %v2440_v62  ;;  %v2544_v37 = vsel %vm2542_vm4, %v3259_v34, %v2543_v43 }
 0x8b0   :  { %3268 = vsinq.f32 %v2741_v48  ;;  %v2547_v6 = vsel %vm2545_vm12, %v2546_v10, %v3261_v61  ;;  %v2330_v12 = vadd.f32 1.0, %v2326_v40  ;;  %vm2645_vm5 = vcmp.eq.s32.totalorder %v2643_v38, 0 }
 0x8b1   :  { %vm2648_vm6 = vcmp.eq.s32.totalorder %v2643_v38, 2  ;;  %v2742_v24 = vsel %vm5127_vm14, 0, %v2740_v26  ;;  %vm2541_vm7 = vcmp.lt.s32.totalorder %v2540_v49, 2  ;;  %v2647_v33 = vsel %vm2645_vm5, %v3263_v59, %v2646_v58 }
 0x8b2   :  { %v2650_v60 = vsel %vm2648_vm6, %v2649_v35, %v3265_v18  ;;  %v2234_v42 = vmul.f32 0.5, %v4891_v14  ;;  %v2331_v19 = vadd.f32 1.0, %v2327_v15  ;;  %v2445_v30 = vsel %vm2438_vm1, %v2441_v46, %v2444_v8 }
 0x8b3   :  { %v2548_v22 = vsel %vm2541_vm7, %v2544_v37, %v2547_v6  ;;  %v2340_v13 = vsub.f32 %v5110_v55, %v5123_v63  ;;  %vm2539_vm8 = vweird.f32 %v4729_v4  ;;  %vm2644_vm9 = vcmp.lt.s32.totalorder %v2643_v38, 2 }
 0x8b4   :  { %v2746_v50 = vand.u32 3, %v2742_v24  ;;  %v2235_v5 = vmul.f32 0.5, %v4903_v16  ;;  %v2334_v20 = vmul.f32 %v2330_v12, %v2234_v42  ;;  %v2341_v54 = vsub.f32 %v5114_v39, %v2333_v53 }
 0x8b5   :  { %v2651_v23 = vsel %vm2644_vm9, %v2647_v33, %v2650_v60  ;;  %v2446_v32 = vsel %vm2436_vm0, nan, %v2445_v30  ;;  %v2549_v0 = vsel %vm2539_vm8, nan, %v2548_v22  ;;  %v3303_v11 = vmov 1983009808  }
 0x8b6   :  { %v2774_v41 = vunpack.c.l.s4 %v3303_v11  ;;  %v2776_v57 = vlaneseq  ;;  %v2335_v29 = vmul.f32 %v2331_v19, %v2235_v5  ;;  %v2897_v21 = vadd.f32 -1.0, %v4891_v14 }
 0x8b7   :  { %vm2642_vm10 = vweird.f32 %v4891_v14  ;;  %v2898_v56 = vadd.f32 -1.0, %v4903_v16  ;;  %vm2751_vm11 = vcmp.eq.s32.totalorder %v2746_v50, 2  ;;  %vm2748_vm14 = vcmp.eq.s32.totalorder %v2746_v50, 0 }
 0x8b8   :  { %v2652_v34 = vsel %vm2642_vm10, nan, %v2651_v23  ;;  %v2342_v39 = vsub.f32 %v2897_v21, %v2334_v20  ;;  %v2757_v45 = vadd.f32 %v2549_v0, %v2341_v54  ;;  %vm2747_vm15 = vcmp.lt.s32.totalorder %v2746_v50, 2 }
 0x8b9   :  { %v3267_v47 = vpop.eup %3266  ;;  %v2756_v28 = vadd.f32 %v2446_v32, %v2340_v13  ;;  %v2761_v61 = vmax.f32 %v4729_v4, 0.0  ;;  %v2343_v7 = vsub.f32 %v2898_v56, %v2335_v29  ;;  %vm2745_vm1 = vweird.f32 %v4903_v16 }
 0x8ba   :  { %v3269_v25 = vpop.eup %3268  ;;  %v2752_v55 = vxor.u32 2147483648, %v3267_v47  ;;  %v2758_v51 = vadd.f32 %v2652_v34, %v2342_v39  ;;  %v2760_v27 = vmax.f32 %v4726_v1, 0.0  ;;  %v2775_v17 = vunpack.c.0.s8 %v2774_v41 }
 0x8bb   :  { %v2749_v2 = vxor.u32 2147483648, %v3269_v25  ;;  %v2777_v52 = vshrl.u32 %v2776_v57, 7  ;;  %v2762_v18 = vmax.f32 %v4891_v14, 0.0  ;;  %v2763_v62 = vmax.f32 %v4903_v16, 0.0 }
 0x8bc   :  { %v2753_v9 = vsel %vm2751_vm11, %v2752_v55, %v3269_v25  ;;  %v2765_v31 = vsub.f32 %v2757_v45, %v2761_v61  ;;  %v2764_v49 = vsub.f32 %v2756_v28, %v2760_v27  ;;  %vm2793_vm2 = vcmask 1041409  }
 0x8bd   :  { %v2750_v36 = vsel %vm2748_vm14, %v3267_v47, %v2749_v2  ;;  %v2766_v48 = vsub.f32 %v2758_v51, %v2762_v18  ;;  %v2778_v43 = vsub.s32 %v2775_v17, %v2777_v52  ;;  %vm2795_vm0 = vcmask 1043459  }
 0x8be   :  { %v2754_v63 = vsel %vm2747_vm15, %v2750_v36, %v2753_v9  ;;  %v2772_v4 = vcombine.low %v2764_v49, %v2765_v31  ;;  %vm2802_vm3 = vcmask 257026   ;;  %vm2797_vm4 = vcmask 1045509  }
 0x8bf   :  { %v2755_v59 = vsel %vm2745_vm1, nan, %v2754_v63  ;;  %vm2799_vm12 = vcmask 1047559   ;;  %vm2803_vm5 = vmor %vm2802_vm3, %vm1078_vm13 }
 0x8c0   :  { %v2759_v44 = vadd.f32 %v2755_v59, %v2343_v7  ;;  %v2779_v38 = vrot.slane %v2772_v4, %v2778_v43 }
 0x8c2   :  { %v2767_v3 = vsub.f32 %v2759_v44, %v2763_v62 }
 0x8c4   :  { %v2780_v10 = vcombine.low %v2766_v48, %v2767_v3 }
 0x8c6   :  { %v2787_v53 = vrot.slane %v2780_v10, %v2778_v43 }
 0x8c8   :  { %v2792_v40 = vrot.slane %v2787_v53, 7 }
 0x8ca   :  { %v2794_v1 = vsel %vm2793_vm2, %v2792_v40, %v2779_v38 }
 0x8cb   :  { %v2796_v14 = vsel %vm2795_vm0, %v2792_v40, %v2794_v1 }
 0x8cc   :  { %v2798_v16 = vsel %vm2797_vm4, %v2792_v40, %v2796_v14 }
 0x8cd   :  { %v2800_v58 = vsel %vm2799_vm12, %v2792_v40, %v2798_v16 }
 0x8ce   :  { %2804 = vst.msk [vmem:[#allocation2] sm:$0xf] %vm2803_vm5, %v2800_v58 }
 0x8cf   :  { %3281 = shalt.err (!%p3278_p4)
}
 0x8d0   :  { %s3282_s13 = scalar_lea.hbm %s5190_s4, 64 }
 0x8d1   :  { %p3283_p5 = scmp.ne.s32.totalorder %s5190_s4, %s3282_s13  ;;  %p3286_p6 = scmp.lt.u32.totalorder %s3282_s13, %s5190_s4 }
 0x8d3   :  { %p3288_p7 = pnand %p3286_p6, %p3283_p5 }
 0x8d5   :  { %3291 = shalt.err (!%p3288_p7)
}
 0x8d6   :  { %2814 = dma.vmem_to_hbm [thread:$0]  %s2812_s9, 64, %s5190_s4, [#allocation3]  }
 0x8d7   :  { %3292 = dma.done.wait [#allocation3], 64  }
 0x8d8   :  { %3293 = vsyncadd [#allocation3], 4294967232 }
 0x8d9   :  { %2818 = vsyncpa [#allocation3], 1 }

</bundles_post_ra>
